<compile_context>
chip_gen: v7x
topology: tpu7x:2x2x1
jax: 0.10.0
libtpu: 0.0.40
codegen_flags: <defaults>
</compile_context>

<pallas_src>
import functools

import jax
import jax.numpy as jnp
from jax import lax
from jax.experimental import pallas as pl
from jax.experimental.pallas import tpu as pltpu

K = 7                  # spatial conv kernel size
PAD = (K - 1) // 2     # = 3


def _spatial_gate_kernel(x_ref, w_ref, b_ref, out_ref, *, C, H, W):
    """One batch element per grid step, lane-dense (C, H*W) layout.

    x_ref  : (C, H*W)  VMEM  -- one batch element, spatially flattened (lane-dense)
    w_ref  : (2*K*K,)  SMEM  -- BN-folded conv weight, flat index ch*49 + dy*7 + dx
                                 (ch 0 = channel-max map, ch 1 = channel-mean map)
    b_ref  : (1,)      SMEM  -- BN-folded bias
    out_ref: (C, H*W)  VMEM
    """
    HW = H * W
    FLATPAD = PAD * W + PAD       # flat halo covering +/-PAD rows and +/-PAD cols
    L = HW + 2 * FLATPAD          # length of the tap-slice window
    EXT = FLATPAD + PAD           # extra PAD of zeros so horizontal shifts stay in bounds

    x = x_ref[...]                # (C, HW), native dtype

    # --- ChannelPool: max in native dtype (exact), mean-sum accumulated in f32 ---
    mx = jnp.max(x, axis=0, keepdims=True).astype(jnp.float32)             # (1, HW)
    mn = jnp.sum(x, axis=0, keepdims=True, dtype=jnp.float32) * (1.0 / C)  # (1, HW)

    # --- Pre-shifted, wrap-masked, zero-padded flat maps (14 total, built once) ---
    zext = jnp.zeros((1, EXT), jnp.float32)
    ppext = [jnp.concatenate([zext, mx, zext], axis=1),    # (1, L + 2*PAD)
             jnp.concatenate([zext, mn, zext], axis=1)]

    # Output-column index expressed in window coordinates j in [0, L):
    # col(j) = (j - PAD) mod W matches the output column of every tap reading j
    # (vertical tap shifts are multiples of W, so they don't change the column).
    j = lax.broadcasted_iota(jnp.int32, (1, L), 1) - PAD
    if W & (W - 1) == 0:          # power-of-two fast path
        colp = j & (W - 1)
    else:
        colp = j % W              # positions where this differs hold zero data anyway

    shifted = []                  # shifted[ci][dx] : (1, L)
    for ci in range(2):
        row = []
        for dx in range(K):
            ox = dx - PAD
            base = ppext[ci][:, PAD + ox:PAD + ox + L]     # static lane slice, (1, L)
            if ox == 0:
                row.append(base)                           # no row-wrap possible
            else:
                ok = (colp + ox >= 0) & (colp + ox < W)
                row.append(jnp.where(ok, base, 0.0))
        shifted.append(row)

    # --- 7x7 conv (pad=3): 98 clean FMAs into 4 independent accumulators ---------
    accs = [jnp.zeros((1, HW), jnp.float32) for _ in range(4)]
    for ci in range(2):
        for dy in range(K):
            off0 = FLATPAD + (dy - PAD) * W                # static, in [PAD, FLATPAD+PAD*W]
            a = 2 * ci + (dy & 1)
            for dx in range(K):
                wgt = w_ref[ci * K * K + dy * K + dx]
                accs[a] = accs[a] + wgt * shifted[ci][dx][:, off0:off0 + HW]
    acc = (accs[0] + accs[1]) + (accs[2] + accs[3]) + b_ref[0]   # BN-folded bias

    # --- Gate: sigmoid on the tiny (1, HW) map, multiply in the input dtype ------
    scale = jax.nn.sigmoid(acc)                            # (1, HW) f32
    out_ref[...] = (x * scale.astype(x.dtype)).astype(out_ref.dtype)


def _round_up(a, b):
    return (a + b - 1) // b * b


def spatial_gate(x, conv_w, bn_gamma, bn_beta, bn_mean, bn_var, eps=1e-5):
    """x: (N, C, H, W); conv_w: (1, 2, K, K); bn_*: (1,). BatchNorm in eval mode."""
    N, C, H, W = x.shape
    HW = H * W

    # Fold eval-mode BatchNorm into the conv weight / bias (plain JAX glue).
    bn_scale = bn_gamma / jnp.sqrt(bn_var + eps)                                 # (1,)
    w_folded = (conv_w[0] * bn_scale[0]).reshape(2 * K * K).astype(jnp.float32)  # (98,)
    b_folded = (bn_beta - bn_mean * bn_scale).astype(jnp.float32)                # (1,)

    # Lane-dense view: NCHW row-major -> (N, C, H*W) is a free reinterpretation.
    x_flat = x.reshape(N, C, HW)

    # VMEM budget: double-buffered (sublane/lane padded) input + output blocks plus
    # O(HW) f32 conv temporaries (14 shifted maps ~ HW+2*FLATPAD, pooled maps, accs).
    itemsize = jnp.dtype(x.dtype).itemsize
    blk_bytes = _round_up(C, 8) * _round_up(HW, 128) * itemsize
    scratch_bytes = 32 * _round_up(HW, 128) * 4 + (1 << 20)

    # Generation-aware cap: ~72% of physical VMEM (v5e/v6e: 128 MiB, v7x: 64 MiB).
    try:
        phys_vmem = int(pltpu.get_tpu_info().vmem_capacity_bytes)
    except Exception:
        phys_vmem = 64 << 20       # conservative (v7x-sized) fallback
    cap = int(phys_vmem * 0.72)

    need = 4 * blk_bytes + scratch_bytes
    vmem_limit = int(min(max(need, 16 << 20), cap))

    kernel = functools.partial(_spatial_gate_kernel, C=C, H=H, W=W)

    out_flat = pl.pallas_call(
        kernel,
        out_shape=jax.ShapeDtypeStruct((N, C, HW), x.dtype),
        grid_spec=pltpu.PrefetchScalarGridSpec(
            num_scalar_prefetch=0,
            grid=(N,),
            in_specs=[
                pl.BlockSpec((None, C, HW), lambda n: (n, 0, 0)),   # batch dim squeezed
                pl.BlockSpec(memory_space=pltpu.MemorySpace.SMEM),  # folded conv weight
                pl.BlockSpec(memory_space=pltpu.MemorySpace.SMEM),  # folded bias
            ],
            out_specs=pl.BlockSpec((None, C, HW), lambda n: (n, 0, 0)),
        ),
        compiler_params=pltpu.CompilerParams(
            dimension_semantics=("parallel",),
            vmem_limit_bytes=vmem_limit,
        ),
    )(x_flat, w_folded, b_folded)

    return out_flat.reshape(N, C, H, W)


def spatial_gate_reference(x, conv_w, bn_gamma, bn_beta, bn_mean, bn_var, eps=1e-5):
    """Pure-JAX reference mirroring the PyTorch module (BN in eval mode)."""
    mx = jnp.max(x, axis=1, keepdims=True)
    mn = jnp.mean(x, axis=1, keepdims=True)
    pooled = jnp.concatenate([mx, mn], axis=1)                      # (N, 2, H, W)
    conv = lax.conv_general_dilated(
        pooled, conv_w, window_strides=(1, 1), padding=[(PAD, PAD), (PAD, PAD)],
        dimension_numbers=("NCHW", "OIHW", "NCHW"))                 # (N, 1, H, W)
    bn = (conv - bn_mean) / jnp.sqrt(bn_var + eps) * bn_gamma + bn_beta
    return x * jax.nn.sigmoid(bn)


if __name__ == "__main__":
    key = jax.random.PRNGKey(0)
    k_x, k_w = jax.random.split(key)

    N, C, H, W = 2, 4, 16, 16
    x = jax.random.normal(k_x, (N, C, H, W), dtype=jnp.float32)

    # Conv2d(2, 1, kernel_size=7, bias=False) weight, deterministic init.
    conv_w = jax.random.normal(k_w, (1, 2, K, K), dtype=jnp.float32) * 0.1

    # BatchNorm2d(1) parameters / running stats at PyTorch defaults (eval-mode semantics).
    bn_gamma = jnp.ones((1,), jnp.float32)
    bn_beta = jnp.zeros((1,), jnp.float32)
    bn_mean = jnp.zeros((1,), jnp.float32)
    bn_var = jnp.ones((1,), jnp.float32)

    out = spatial_gate(x, conv_w, bn_gamma, bn_beta, bn_mean, bn_var)
    out = jax.block_until_ready(out)

    ref = spatial_gate_reference(x, conv_w, bn_gamma, bn_beta, bn_mean, bn_var)
    assert out.shape == (N, C, H, W)
    assert jnp.allclose(out, ref, atol=1e-5, rtol=1e-5), "mismatch vs reference"

    print("KERNEL_OK")
</pallas_src>

<mosaic_0001>
module attributes {stable_mosaic.version = 11 : i64} {
  func.func @_spatial_gate_kernel(%arg0: i32, %arg1: memref<1x4x256xf32, #tpu.memory_space<vmem>>, %arg2: memref<98xf32, #tpu.memory_space<smem>>, %arg3: memref<1xf32, #tpu.memory_space<smem>>, %arg4: memref<1x4x256xf32, #tpu.memory_space<vmem>>) attributes {dimension_semantics = [#tpu.dimension_semantics<parallel>], iteration_bounds = array<i64: 2>, scalar_prefetch = 0 : i64, scratch_operands = 0 : i64, tpu.core_type = #tpu.core_type<tc>, window_params = [{transform_indices = @transform_0, window_bounds = array<i64: 1, 4, 256>}, {transform_indices = @transform_1, window_bounds = array<i64: 98>}, {transform_indices = @transform_2, window_bounds = array<i64: 1>}, {transform_indices = @transform_3, window_bounds = array<i64: 1, 4, 256>}]} {
    %c0 = arith.constant 0 : index
    %c0_0 = arith.constant 0 : index
    %c0_1 = arith.constant 0 : index
    %0 = vector.load %arg1[%c0, %c0_0, %c0_1] : memref<1x4x256xf32, #tpu.memory_space<vmem>>, vector<1x4x256xf32>
    %1 = vector.shape_cast %0 : vector<1x4x256xf32> to vector<4x256xf32>
    %cst = arith.constant dense<0xFF800000> : vector<256xf32>
    %2 = vector.multi_reduction <maximumf>, %1, %cst [0] : vector<4x256xf32> to vector<256xf32>
    %3 = vector.shape_cast %2 : vector<256xf32> to vector<1x256xf32>
    %cst_2 = arith.constant dense<0.000000e+00> : vector<256xf32>
    %4 = vector.multi_reduction <add>, %1, %cst_2 [0] : vector<4x256xf32> to vector<256xf32>
    %5 = vector.shape_cast %4 : vector<256xf32> to vector<1x256xf32>
    %cst_3 = arith.constant 2.500000e-01 : f32
    %6 = vector.broadcast %cst_3 : f32 to vector<1x256xf32>
    %7 = arith.mulf %5, %6 : vector<1x256xf32>
    %cst_4 = arith.constant 0.000000e+00 : f32
    %8 = vector.broadcast %cst_4 : f32 to vector<1x54xf32>
    %9 = tpu.concatenate %8, %3, %8 in 1 : vector<1x54xf32>, vector<1x256xf32>, vector<1x54xf32> -> vector<1x364xf32>
    %10 = tpu.concatenate %8, %7, %8 in 1 : vector<1x54xf32>, vector<1x256xf32>, vector<1x54xf32> -> vector<1x364xf32>
    %11 = tpu.iota {dimensions = array<i32: 1>} : vector<1x358xi32>
    %c3_i32 = arith.constant 3 : i32
    %12 = vector.broadcast %c3_i32 : i32 to vector<1x358xi32>
    %13 = arith.subi %11, %12 : vector<1x358xi32>
    %c15_i32 = arith.constant 15 : i32
    %14 = vector.broadcast %c15_i32 : i32 to vector<1x358xi32>
    %15 = arith.andi %13, %14 : vector<1x358xi32>
    %16 = vector.extract_strided_slice %9 {offsets = [0, 0], sizes = [1, 358], strides = [1, 1]} : vector<1x364xf32> to vector<1x358xf32>
    %c-3_i32 = arith.constant -3 : i32
    %17 = vector.broadcast %c-3_i32 : i32 to vector<1x358xi32>
    %18 = arith.addi %15, %17 : vector<1x358xi32>
    %c0_i32 = arith.constant 0 : i32
    %19 = vector.broadcast %c0_i32 : i32 to vector<1x358xi32>
    %20 = arith.cmpi sge, %18, %19 : vector<1x358xi32>
    %c-3_i32_5 = arith.constant -3 : i32
    %21 = vector.broadcast %c-3_i32_5 : i32 to vector<1x358xi32>
    %22 = arith.addi %15, %21 : vector<1x358xi32>
    %c16_i32 = arith.constant 16 : i32
    %23 = vector.broadcast %c16_i32 : i32 to vector<1x358xi32>
    %24 = arith.cmpi slt, %22, %23 : vector<1x358xi32>
    %25 = arith.andi %20, %24 : vector<1x358xi1>
    %cst_6 = arith.constant 0.000000e+00 : f32
    %26 = vector.broadcast %cst_6 : f32 to vector<1x358xf32>
    %27 = arith.select %25, %16, %26 : vector<1x358xi1>, vector<1x358xf32>
    %28 = vector.extract_strided_slice %9 {offsets = [0, 1], sizes = [1, 358], strides = [1, 1]} : vector<1x364xf32> to vector<1x358xf32>
    %c-2_i32 = arith.constant -2 : i32
    %29 = vector.broadcast %c-2_i32 : i32 to vector<1x358xi32>
    %30 = arith.addi %15, %29 : vector<1x358xi32>
    %c0_i32_7 = arith.constant 0 : i32
    %31 = vector.broadcast %c0_i32_7 : i32 to vector<1x358xi32>
    %32 = arith.cmpi sge, %30, %31 : vector<1x358xi32>
    %c-2_i32_8 = arith.constant -2 : i32
    %33 = vector.broadcast %c-2_i32_8 : i32 to vector<1x358xi32>
    %34 = arith.addi %15, %33 : vector<1x358xi32>
    %c16_i32_9 = arith.constant 16 : i32
    %35 = vector.broadcast %c16_i32_9 : i32 to vector<1x358xi32>
    %36 = arith.cmpi slt, %34, %35 : vector<1x358xi32>
    %37 = arith.andi %32, %36 : vector<1x358xi1>
    %cst_10 = arith.constant 0.000000e+00 : f32
    %38 = vector.broadcast %cst_10 : f32 to vector<1x358xf32>
    %39 = arith.select %37, %28, %38 : vector<1x358xi1>, vector<1x358xf32>
    %40 = vector.extract_strided_slice %9 {offsets = [0, 2], sizes = [1, 358], strides = [1, 1]} : vector<1x364xf32> to vector<1x358xf32>
    %c-1_i32 = arith.constant -1 : i32
    %41 = vector.broadcast %c-1_i32 : i32 to vector<1x358xi32>
    %42 = arith.addi %15, %41 : vector<1x358xi32>
    %c0_i32_11 = arith.constant 0 : i32
    %43 = vector.broadcast %c0_i32_11 : i32 to vector<1x358xi32>
    %44 = arith.cmpi sge, %42, %43 : vector<1x358xi32>
    %c-1_i32_12 = arith.constant -1 : i32
    %45 = vector.broadcast %c-1_i32_12 : i32 to vector<1x358xi32>
    %46 = arith.addi %15, %45 : vector<1x358xi32>
    %c16_i32_13 = arith.constant 16 : i32
    %47 = vector.broadcast %c16_i32_13 : i32 to vector<1x358xi32>
    %48 = arith.cmpi slt, %46, %47 : vector<1x358xi32>
    %49 = arith.andi %44, %48 : vector<1x358xi1>
    %cst_14 = arith.constant 0.000000e+00 : f32
    %50 = vector.broadcast %cst_14 : f32 to vector<1x358xf32>
    %51 = arith.select %49, %40, %50 : vector<1x358xi1>, vector<1x358xf32>
    %52 = vector.extract_strided_slice %9 {offsets = [0, 3], sizes = [1, 358], strides = [1, 1]} : vector<1x364xf32> to vector<1x358xf32>
    %53 = vector.extract_strided_slice %9 {offsets = [0, 4], sizes = [1, 358], strides = [1, 1]} : vector<1x364xf32> to vector<1x358xf32>
    %c1_i32 = arith.constant 1 : i32
    %54 = vector.broadcast %c1_i32 : i32 to vector<1x358xi32>
    %55 = arith.addi %15, %54 : vector<1x358xi32>
    %c0_i32_15 = arith.constant 0 : i32
    %56 = vector.broadcast %c0_i32_15 : i32 to vector<1x358xi32>
    %57 = arith.cmpi sge, %55, %56 : vector<1x358xi32>
    %c1_i32_16 = arith.constant 1 : i32
    %58 = vector.broadcast %c1_i32_16 : i32 to vector<1x358xi32>
    %59 = arith.addi %15, %58 : vector<1x358xi32>
    %c16_i32_17 = arith.constant 16 : i32
    %60 = vector.broadcast %c16_i32_17 : i32 to vector<1x358xi32>
    %61 = arith.cmpi slt, %59, %60 : vector<1x358xi32>
    %62 = arith.andi %57, %61 : vector<1x358xi1>
    %cst_18 = arith.constant 0.000000e+00 : f32
    %63 = vector.broadcast %cst_18 : f32 to vector<1x358xf32>
    %64 = arith.select %62, %53, %63 : vector<1x358xi1>, vector<1x358xf32>
    %65 = vector.extract_strided_slice %9 {offsets = [0, 5], sizes = [1, 358], strides = [1, 1]} : vector<1x364xf32> to vector<1x358xf32>
    %c2_i32 = arith.constant 2 : i32
    %66 = vector.broadcast %c2_i32 : i32 to vector<1x358xi32>
    %67 = arith.addi %15, %66 : vector<1x358xi32>
    %c0_i32_19 = arith.constant 0 : i32
    %68 = vector.broadcast %c0_i32_19 : i32 to vector<1x358xi32>
    %69 = arith.cmpi sge, %67, %68 : vector<1x358xi32>
    %c2_i32_20 = arith.constant 2 : i32
    %70 = vector.broadcast %c2_i32_20 : i32 to vector<1x358xi32>
    %71 = arith.addi %15, %70 : vector<1x358xi32>
    %c16_i32_21 = arith.constant 16 : i32
    %72 = vector.broadcast %c16_i32_21 : i32 to vector<1x358xi32>
    %73 = arith.cmpi slt, %71, %72 : vector<1x358xi32>
    %74 = arith.andi %69, %73 : vector<1x358xi1>
    %cst_22 = arith.constant 0.000000e+00 : f32
    %75 = vector.broadcast %cst_22 : f32 to vector<1x358xf32>
    %76 = arith.select %74, %65, %75 : vector<1x358xi1>, vector<1x358xf32>
    %77 = vector.extract_strided_slice %9 {offsets = [0, 6], sizes = [1, 358], strides = [1, 1]} : vector<1x364xf32> to vector<1x358xf32>
    %c3_i32_23 = arith.constant 3 : i32
    %78 = vector.broadcast %c3_i32_23 : i32 to vector<1x358xi32>
    %79 = arith.addi %15, %78 : vector<1x358xi32>
    %c0_i32_24 = arith.constant 0 : i32
    %80 = vector.broadcast %c0_i32_24 : i32 to vector<1x358xi32>
    %81 = arith.cmpi sge, %79, %80 : vector<1x358xi32>
    %c3_i32_25 = arith.constant 3 : i32
    %82 = vector.broadcast %c3_i32_25 : i32 to vector<1x358xi32>
    %83 = arith.addi %15, %82 : vector<1x358xi32>
    %c16_i32_26 = arith.constant 16 : i32
    %84 = vector.broadcast %c16_i32_26 : i32 to vector<1x358xi32>
    %85 = arith.cmpi slt, %83, %84 : vector<1x358xi32>
    %86 = arith.andi %81, %85 : vector<1x358xi1>
    %cst_27 = arith.constant 0.000000e+00 : f32
    %87 = vector.broadcast %cst_27 : f32 to vector<1x358xf32>
    %88 = arith.select %86, %77, %87 : vector<1x358xi1>, vector<1x358xf32>
    %89 = vector.extract_strided_slice %10 {offsets = [0, 0], sizes = [1, 358], strides = [1, 1]} : vector<1x364xf32> to vector<1x358xf32>
    %c-3_i32_28 = arith.constant -3 : i32
    %90 = vector.broadcast %c-3_i32_28 : i32 to vector<1x358xi32>
    %91 = arith.addi %15, %90 : vector<1x358xi32>
    %c0_i32_29 = arith.constant 0 : i32
    %92 = vector.broadcast %c0_i32_29 : i32 to vector<1x358xi32>
    %93 = arith.cmpi sge, %91, %92 : vector<1x358xi32>
    %c-3_i32_30 = arith.constant -3 : i32
    %94 = vector.broadcast %c-3_i32_30 : i32 to vector<1x358xi32>
    %95 = arith.addi %15, %94 : vector<1x358xi32>
    %c16_i32_31 = arith.constant 16 : i32
    %96 = vector.broadcast %c16_i32_31 : i32 to vector<1x358xi32>
    %97 = arith.cmpi slt, %95, %96 : vector<1x358xi32>
    %98 = arith.andi %93, %97 : vector<1x358xi1>
    %cst_32 = arith.constant 0.000000e+00 : f32
    %99 = vector.broadcast %cst_32 : f32 to vector<1x358xf32>
    %100 = arith.select %98, %89, %99 : vector<1x358xi1>, vector<1x358xf32>
    %101 = vector.extract_strided_slice %10 {offsets = [0, 1], sizes = [1, 358], strides = [1, 1]} : vector<1x364xf32> to vector<1x358xf32>
    %c-2_i32_33 = arith.constant -2 : i32
    %102 = vector.broadcast %c-2_i32_33 : i32 to vector<1x358xi32>
    %103 = arith.addi %15, %102 : vector<1x358xi32>
    %c0_i32_34 = arith.constant 0 : i32
    %104 = vector.broadcast %c0_i32_34 : i32 to vector<1x358xi32>
    %105 = arith.cmpi sge, %103, %104 : vector<1x358xi32>
    %c-2_i32_35 = arith.constant -2 : i32
    %106 = vector.broadcast %c-2_i32_35 : i32 to vector<1x358xi32>
    %107 = arith.addi %15, %106 : vector<1x358xi32>
    %c16_i32_36 = arith.constant 16 : i32
    %108 = vector.broadcast %c16_i32_36 : i32 to vector<1x358xi32>
    %109 = arith.cmpi slt, %107, %108 : vector<1x358xi32>
    %110 = arith.andi %105, %109 : vector<1x358xi1>
    %cst_37 = arith.constant 0.000000e+00 : f32
    %111 = vector.broadcast %cst_37 : f32 to vector<1x358xf32>
    %112 = arith.select %110, %101, %111 : vector<1x358xi1>, vector<1x358xf32>
    %113 = vector.extract_strided_slice %10 {offsets = [0, 2], sizes = [1, 358], strides = [1, 1]} : vector<1x364xf32> to vector<1x358xf32>
    %c-1_i32_38 = arith.constant -1 : i32
    %114 = vector.broadcast %c-1_i32_38 : i32 to vector<1x358xi32>
    %115 = arith.addi %15, %114 : vector<1x358xi32>
    %c0_i32_39 = arith.constant 0 : i32
    %116 = vector.broadcast %c0_i32_39 : i32 to vector<1x358xi32>
    %117 = arith.cmpi sge, %115, %116 : vector<1x358xi32>
    %c-1_i32_40 = arith.constant -1 : i32
    %118 = vector.broadcast %c-1_i32_40 : i32 to vector<1x358xi32>
    %119 = arith.addi %15, %118 : vector<1x358xi32>
    %c16_i32_41 = arith.constant 16 : i32
    %120 = vector.broadcast %c16_i32_41 : i32 to vector<1x358xi32>
    %121 = arith.cmpi slt, %119, %120 : vector<1x358xi32>
    %122 = arith.andi %117, %121 : vector<1x358xi1>
    %cst_42 = arith.constant 0.000000e+00 : f32
    %123 = vector.broadcast %cst_42 : f32 to vector<1x358xf32>
    %124 = arith.select %122, %113, %123 : vector<1x358xi1>, vector<1x358xf32>
    %125 = vector.extract_strided_slice %10 {offsets = [0, 3], sizes = [1, 358], strides = [1, 1]} : vector<1x364xf32> to vector<1x358xf32>
    %126 = vector.extract_strided_slice %10 {offsets = [0, 4], sizes = [1, 358], strides = [1, 1]} : vector<1x364xf32> to vector<1x358xf32>
    %c1_i32_43 = arith.constant 1 : i32
    %127 = vector.broadcast %c1_i32_43 : i32 to vector<1x358xi32>
    %128 = arith.addi %15, %127 : vector<1x358xi32>
    %c0_i32_44 = arith.constant 0 : i32
    %129 = vector.broadcast %c0_i32_44 : i32 to vector<1x358xi32>
    %130 = arith.cmpi sge, %128, %129 : vector<1x358xi32>
    %c1_i32_45 = arith.constant 1 : i32
    %131 = vector.broadcast %c1_i32_45 : i32 to vector<1x358xi32>
    %132 = arith.addi %15, %131 : vector<1x358xi32>
    %c16_i32_46 = arith.constant 16 : i32
    %133 = vector.broadcast %c16_i32_46 : i32 to vector<1x358xi32>
    %134 = arith.cmpi slt, %132, %133 : vector<1x358xi32>
    %135 = arith.andi %130, %134 : vector<1x358xi1>
    %cst_47 = arith.constant 0.000000e+00 : f32
    %136 = vector.broadcast %cst_47 : f32 to vector<1x358xf32>
    %137 = arith.select %135, %126, %136 : vector<1x358xi1>, vector<1x358xf32>
    %138 = vector.extract_strided_slice %10 {offsets = [0, 5], sizes = [1, 358], strides = [1, 1]} : vector<1x364xf32> to vector<1x358xf32>
    %c2_i32_48 = arith.constant 2 : i32
    %139 = vector.broadcast %c2_i32_48 : i32 to vector<1x358xi32>
    %140 = arith.addi %15, %139 : vector<1x358xi32>
    %c0_i32_49 = arith.constant 0 : i32
    %141 = vector.broadcast %c0_i32_49 : i32 to vector<1x358xi32>
    %142 = arith.cmpi sge, %140, %141 : vector<1x358xi32>
    %c2_i32_50 = arith.constant 2 : i32
    %143 = vector.broadcast %c2_i32_50 : i32 to vector<1x358xi32>
    %144 = arith.addi %15, %143 : vector<1x358xi32>
    %c16_i32_51 = arith.constant 16 : i32
    %145 = vector.broadcast %c16_i32_51 : i32 to vector<1x358xi32>
    %146 = arith.cmpi slt, %144, %145 : vector<1x358xi32>
    %147 = arith.andi %142, %146 : vector<1x358xi1>
    %cst_52 = arith.constant 0.000000e+00 : f32
    %148 = vector.broadcast %cst_52 : f32 to vector<1x358xf32>
    %149 = arith.select %147, %138, %148 : vector<1x358xi1>, vector<1x358xf32>
    %150 = vector.extract_strided_slice %10 {offsets = [0, 6], sizes = [1, 358], strides = [1, 1]} : vector<1x364xf32> to vector<1x358xf32>
    %c3_i32_53 = arith.constant 3 : i32
    %151 = vector.broadcast %c3_i32_53 : i32 to vector<1x358xi32>
    %152 = arith.addi %15, %151 : vector<1x358xi32>
    %c0_i32_54 = arith.constant 0 : i32
    %153 = vector.broadcast %c0_i32_54 : i32 to vector<1x358xi32>
    %154 = arith.cmpi sge, %152, %153 : vector<1x358xi32>
    %c3_i32_55 = arith.constant 3 : i32
    %155 = vector.broadcast %c3_i32_55 : i32 to vector<1x358xi32>
    %156 = arith.addi %15, %155 : vector<1x358xi32>
    %c16_i32_56 = arith.constant 16 : i32
    %157 = vector.broadcast %c16_i32_56 : i32 to vector<1x358xi32>
    %158 = arith.cmpi slt, %156, %157 : vector<1x358xi32>
    %159 = arith.andi %154, %158 : vector<1x358xi1>
    %cst_57 = arith.constant 0.000000e+00 : f32
    %160 = vector.broadcast %cst_57 : f32 to vector<1x358xf32>
    %161 = arith.select %159, %150, %160 : vector<1x358xi1>, vector<1x358xf32>
    %cst_58 = arith.constant 0.000000e+00 : f32
    %162 = vector.broadcast %cst_58 : f32 to vector<1x256xf32>
    %cst_59 = arith.constant 0.000000e+00 : f32
    %163 = vector.broadcast %cst_59 : f32 to vector<1x256xf32>
    %cst_60 = arith.constant 0.000000e+00 : f32
    %164 = vector.broadcast %cst_60 : f32 to vector<1x256xf32>
    %cst_61 = arith.constant 0.000000e+00 : f32
    %165 = vector.broadcast %cst_61 : f32 to vector<1x256xf32>
    %c0_62 = arith.constant 0 : index
    %166 = memref.load %arg2[%c0_62] : memref<98xf32, #tpu.memory_space<smem>>
    %167 = vector.extract_strided_slice %27 {offsets = [0, 3], sizes = [1, 256], strides = [1, 1]} : vector<1x358xf32> to vector<1x256xf32>
    %168 = vector.broadcast %166 : f32 to vector<1x256xf32>
    %169 = arith.mulf %168, %167 : vector<1x256xf32>
    %170 = arith.addf %162, %169 : vector<1x256xf32>
    %c1 = arith.constant 1 : index
    %171 = memref.load %arg2[%c1] : memref<98xf32, #tpu.memory_space<smem>>
    %172 = vector.extract_strided_slice %39 {offsets = [0, 3], sizes = [1, 256], strides = [1, 1]} : vector<1x358xf32> to vector<1x256xf32>
    %173 = vector.broadcast %171 : f32 to vector<1x256xf32>
    %174 = arith.mulf %173, %172 : vector<1x256xf32>
    %175 = arith.addf %170, %174 : vector<1x256xf32>
    %c2 = arith.constant 2 : index
    %176 = memref.load %arg2[%c2] : memref<98xf32, #tpu.memory_space<smem>>
    %177 = vector.extract_strided_slice %51 {offsets = [0, 3], sizes = [1, 256], strides = [1, 1]} : vector<1x358xf32> to vector<1x256xf32>
    %178 = vector.broadcast %176 : f32 to vector<1x256xf32>
    %179 = arith.mulf %178, %177 : vector<1x256xf32>
    %180 = arith.addf %175, %179 : vector<1x256xf32>
    %c3 = arith.constant 3 : index
    %181 = memref.load %arg2[%c3] : memref<98xf32, #tpu.memory_space<smem>>
    %182 = vector.extract_strided_slice %52 {offsets = [0, 3], sizes = [1, 256], strides = [1, 1]} : vector<1x358xf32> to vector<1x256xf32>
    %183 = vector.broadcast %181 : f32 to vector<1x256xf32>
    %184 = arith.mulf %183, %182 : vector<1x256xf32>
    %185 = arith.addf %180, %184 : vector<1x256xf32>
    %c4 = arith.constant 4 : index
    %186 = memref.load %arg2[%c4] : memref<98xf32, #tpu.memory_space<smem>>
    %187 = vector.extract_strided_slice %64 {offsets = [0, 3], sizes = [1, 256], strides = [1, 1]} : vector<1x358xf32> to vector<1x256xf32>
    %188 = vector.broadcast %186 : f32 to vector<1x256xf32>
    %189 = arith.mulf %188, %187 : vector<1x256xf32>
    %190 = arith.addf %185, %189 : vector<1x256xf32>
    %c5 = arith.constant 5 : index
    %191 = memref.load %arg2[%c5] : memref<98xf32, #tpu.memory_space<smem>>
    %192 = vector.extract_strided_slice %76 {offsets = [0, 3], sizes = [1, 256], strides = [1, 1]} : vector<1x358xf32> to vector<1x256xf32>
    %193 = vector.broadcast %191 : f32 to vector<1x256xf32>
    %194 = arith.mulf %193, %192 : vector<1x256xf32>
    %195 = arith.addf %190, %194 : vector<1x256xf32>
    %c6 = arith.constant 6 : index
    %196 = memref.load %arg2[%c6] : memref<98xf32, #tpu.memory_space<smem>>
    %197 = vector.extract_strided_slice %88 {offsets = [0, 3], sizes = [1, 256], strides = [1, 1]} : vector<1x358xf32> to vector<1x256xf32>
    %198 = vector.broadcast %196 : f32 to vector<1x256xf32>
    %199 = arith.mulf %198, %197 : vector<1x256xf32>
    %200 = arith.addf %195, %199 : vector<1x256xf32>
    %c7 = arith.constant 7 : index
    %201 = memref.load %arg2[%c7] : memref<98xf32, #tpu.memory_space<smem>>
    %202 = vector.extract_strided_slice %27 {offsets = [0, 19], sizes = [1, 256], strides = [1, 1]} : vector<1x358xf32> to vector<1x256xf32>
    %203 = vector.broadcast %201 : f32 to vector<1x256xf32>
    %204 = arith.mulf %203, %202 : vector<1x256xf32>
    %205 = arith.addf %163, %204 : vector<1x256xf32>
    %c8 = arith.constant 8 : index
    %206 = memref.load %arg2[%c8] : memref<98xf32, #tpu.memory_space<smem>>
    %207 = vector.extract_strided_slice %39 {offsets = [0, 19], sizes = [1, 256], strides = [1, 1]} : vector<1x358xf32> to vector<1x256xf32>
    %208 = vector.broadcast %206 : f32 to vector<1x256xf32>
    %209 = arith.mulf %208, %207 : vector<1x256xf32>
    %210 = arith.addf %205, %209 : vector<1x256xf32>
    %c9 = arith.constant 9 : index
    %211 = memref.load %arg2[%c9] : memref<98xf32, #tpu.memory_space<smem>>
    %212 = vector.extract_strided_slice %51 {offsets = [0, 19], sizes = [1, 256], strides = [1, 1]} : vector<1x358xf32> to vector<1x256xf32>
    %213 = vector.broadcast %211 : f32 to vector<1x256xf32>
    %214 = arith.mulf %213, %212 : vector<1x256xf32>
    %215 = arith.addf %210, %214 : vector<1x256xf32>
    %c10 = arith.constant 10 : index
    %216 = memref.load %arg2[%c10] : memref<98xf32, #tpu.memory_space<smem>>
    %217 = vector.extract_strided_slice %52 {offsets = [0, 19], sizes = [1, 256], strides = [1, 1]} : vector<1x358xf32> to vector<1x256xf32>
    %218 = vector.broadcast %216 : f32 to vector<1x256xf32>
    %219 = arith.mulf %218, %217 : vector<1x256xf32>
    %220 = arith.addf %215, %219 : vector<1x256xf32>
    %c11 = arith.constant 11 : index
    %221 = memref.load %arg2[%c11] : memref<98xf32, #tpu.memory_space<smem>>
    %222 = vector.extract_strided_slice %64 {offsets = [0, 19], sizes = [1, 256], strides = [1, 1]} : vector<1x358xf32> to vector<1x256xf32>
    %223 = vector.broadcast %221 : f32 to vector<1x256xf32>
    %224 = arith.mulf %223, %222 : vector<1x256xf32>
    %225 = arith.addf %220, %224 : vector<1x256xf32>
    %c12 = arith.constant 12 : index
    %226 = memref.load %arg2[%c12] : memref<98xf32, #tpu.memory_space<smem>>
    %227 = vector.extract_strided_slice %76 {offsets = [0, 19], sizes = [1, 256], strides = [1, 1]} : vector<1x358xf32> to vector<1x256xf32>
    %228 = vector.broadcast %226 : f32 to vector<1x256xf32>
    %229 = arith.mulf %228, %227 : vector<1x256xf32>
    %230 = arith.addf %225, %229 : vector<1x256xf32>
    %c13 = arith.constant 13 : index
    %231 = memref.load %arg2[%c13] : memref<98xf32, #tpu.memory_space<smem>>
    %232 = vector.extract_strided_slice %88 {offsets = [0, 19], sizes = [1, 256], strides = [1, 1]} : vector<1x358xf32> to vector<1x256xf32>
    %233 = vector.broadcast %231 : f32 to vector<1x256xf32>
    %234 = arith.mulf %233, %232 : vector<1x256xf32>
    %235 = arith.addf %230, %234 : vector<1x256xf32>
    %c14 = arith.constant 14 : index
    %236 = memref.load %arg2[%c14] : memref<98xf32, #tpu.memory_space<smem>>
    %237 = vector.extract_strided_slice %27 {offsets = [0, 35], sizes = [1, 256], strides = [1, 1]} : vector<1x358xf32> to vector<1x256xf32>
    %238 = vector.broadcast %236 : f32 to vector<1x256xf32>
    %239 = arith.mulf %238, %237 : vector<1x256xf32>
    %240 = arith.addf %200, %239 : vector<1x256xf32>
    %c15 = arith.constant 15 : index
    %241 = memref.load %arg2[%c15] : memref<98xf32, #tpu.memory_space<smem>>
    %242 = vector.extract_strided_slice %39 {offsets = [0, 35], sizes = [1, 256], strides = [1, 1]} : vector<1x358xf32> to vector<1x256xf32>
    %243 = vector.broadcast %241 : f32 to vector<1x256xf32>
    %244 = arith.mulf %243, %242 : vector<1x256xf32>
    %245 = arith.addf %240, %244 : vector<1x256xf32>
    %c16 = arith.constant 16 : index
    %246 = memref.load %arg2[%c16] : memref<98xf32, #tpu.memory_space<smem>>
    %247 = vector.extract_strided_slice %51 {offsets = [0, 35], sizes = [1, 256], strides = [1, 1]} : vector<1x358xf32> to vector<1x256xf32>
    %248 = vector.broadcast %246 : f32 to vector<1x256xf32>
    %249 = arith.mulf %248, %247 : vector<1x256xf32>
    %250 = arith.addf %245, %249 : vector<1x256xf32>
    %c17 = arith.constant 17 : index
    %251 = memref.load %arg2[%c17] : memref<98xf32, #tpu.memory_space<smem>>
    %252 = vector.extract_strided_slice %52 {offsets = [0, 35], sizes = [1, 256], strides = [1, 1]} : vector<1x358xf32> to vector<1x256xf32>
    %253 = vector.broadcast %251 : f32 to vector<1x256xf32>
    %254 = arith.mulf %253, %252 : vector<1x256xf32>
    %255 = arith.addf %250, %254 : vector<1x256xf32>
    %c18 = arith.constant 18 : index
    %256 = memref.load %arg2[%c18] : memref<98xf32, #tpu.memory_space<smem>>
    %257 = vector.extract_strided_slice %64 {offsets = [0, 35], sizes = [1, 256], strides = [1, 1]} : vector<1x358xf32> to vector<1x256xf32>
    %258 = vector.broadcast %256 : f32 to vector<1x256xf32>
    %259 = arith.mulf %258, %257 : vector<1x256xf32>
    %260 = arith.addf %255, %259 : vector<1x256xf32>
    %c19 = arith.constant 19 : index
    %261 = memref.load %arg2[%c19] : memref<98xf32, #tpu.memory_space<smem>>
    %262 = vector.extract_strided_slice %76 {offsets = [0, 35], sizes = [1, 256], strides = [1, 1]} : vector<1x358xf32> to vector<1x256xf32>
    %263 = vector.broadcast %261 : f32 to vector<1x256xf32>
    %264 = arith.mulf %263, %262 : vector<1x256xf32>
    %265 = arith.addf %260, %264 : vector<1x256xf32>
    %c20 = arith.constant 20 : index
    %266 = memref.load %arg2[%c20] : memref<98xf32, #tpu.memory_space<smem>>
    %267 = vector.extract_strided_slice %88 {offsets = [0, 35], sizes = [1, 256], strides = [1, 1]} : vector<1x358xf32> to vector<1x256xf32>
    %268 = vector.broadcast %266 : f32 to vector<1x256xf32>
    %269 = arith.mulf %268, %267 : vector<1x256xf32>
    %270 = arith.addf %265, %269 : vector<1x256xf32>
    %c21 = arith.constant 21 : index
    %271 = memref.load %arg2[%c21] : memref<98xf32, #tpu.memory_space<smem>>
    %272 = vector.extract_strided_slice %27 {offsets = [0, 51], sizes = [1, 256], strides = [1, 1]} : vector<1x358xf32> to vector<1x256xf32>
    %273 = vector.broadcast %271 : f32 to vector<1x256xf32>
    %274 = arith.mulf %273, %272 : vector<1x256xf32>
    %275 = arith.addf %235, %274 : vector<1x256xf32>
    %c22 = arith.constant 22 : index
    %276 = memref.load %arg2[%c22] : memref<98xf32, #tpu.memory_space<smem>>
    %277 = vector.extract_strided_slice %39 {offsets = [0, 51], sizes = [1, 256], strides = [1, 1]} : vector<1x358xf32> to vector<1x256xf32>
    %278 = vector.broadcast %276 : f32 to vector<1x256xf32>
    %279 = arith.mulf %278, %277 : vector<1x256xf32>
    %280 = arith.addf %275, %279 : vector<1x256xf32>
    %c23 = arith.constant 23 : index
    %281 = memref.load %arg2[%c23] : memref<98xf32, #tpu.memory_space<smem>>
    %282 = vector.extract_strided_slice %51 {offsets = [0, 51], sizes = [1, 256], strides = [1, 1]} : vector<1x358xf32> to vector<1x256xf32>
    %283 = vector.broadcast %281 : f32 to vector<1x256xf32>
    %284 = arith.mulf %283, %282 : vector<1x256xf32>
    %285 = arith.addf %280, %284 : vector<1x256xf32>
    %c24 = arith.constant 24 : index
    %286 = memref.load %arg2[%c24] : memref<98xf32, #tpu.memory_space<smem>>
    %287 = vector.extract_strided_slice %52 {offsets = [0, 51], sizes = [1, 256], strides = [1, 1]} : vector<1x358xf32> to vector<1x256xf32>
    %288 = vector.broadcast %286 : f32 to vector<1x256xf32>
    %289 = arith.mulf %288, %287 : vector<1x256xf32>
    %290 = arith.addf %285, %289 : vector<1x256xf32>
    %c25 = arith.constant 25 : index
    %291 = memref.load %arg2[%c25] : memref<98xf32, #tpu.memory_space<smem>>
    %292 = vector.extract_strided_slice %64 {offsets = [0, 51], sizes = [1, 256], strides = [1, 1]} : vector<1x358xf32> to vector<1x256xf32>
    %293 = vector.broadcast %291 : f32 to vector<1x256xf32>
    %294 = arith.mulf %293, %292 : vector<1x256xf32>
    %295 = arith.addf %290, %294 : vector<1x256xf32>
    %c26 = arith.constant 26 : index
    %296 = memref.load %arg2[%c26] : memref<98xf32, #tpu.memory_space<smem>>
    %297 = vector.extract_strided_slice %76 {offsets = [0, 51], sizes = [1, 256], strides = [1, 1]} : vector<1x358xf32> to vector<1x256xf32>
    %298 = vector.broadcast %296 : f32 to vector<1x256xf32>
    %299 = arith.mulf %298, %297 : vector<1x256xf32>
    %300 = arith.addf %295, %299 : vector<1x256xf32>
    %c27 = arith.constant 27 : index
    %301 = memref.load %arg2[%c27] : memref<98xf32, #tpu.memory_space<smem>>
    %302 = vector.extract_strided_slice %88 {offsets = [0, 51], sizes = [1, 256], strides = [1, 1]} : vector<1x358xf32> to vector<1x256xf32>
    %303 = vector.broadcast %301 : f32 to vector<1x256xf32>
    %304 = arith.mulf %303, %302 : vector<1x256xf32>
    %305 = arith.addf %300, %304 : vector<1x256xf32>
    %c28 = arith.constant 28 : index
    %306 = memref.load %arg2[%c28] : memref<98xf32, #tpu.memory_space<smem>>
    %307 = vector.extract_strided_slice %27 {offsets = [0, 67], sizes = [1, 256], strides = [1, 1]} : vector<1x358xf32> to vector<1x256xf32>
    %308 = vector.broadcast %306 : f32 to vector<1x256xf32>
    %309 = arith.mulf %308, %307 : vector<1x256xf32>
    %310 = arith.addf %270, %309 : vector<1x256xf32>
    %c29 = arith.constant 29 : index
    %311 = memref.load %arg2[%c29] : memref<98xf32, #tpu.memory_space<smem>>
    %312 = vector.extract_strided_slice %39 {offsets = [0, 67], sizes = [1, 256], strides = [1, 1]} : vector<1x358xf32> to vector<1x256xf32>
    %313 = vector.broadcast %311 : f32 to vector<1x256xf32>
    %314 = arith.mulf %313, %312 : vector<1x256xf32>
    %315 = arith.addf %310, %314 : vector<1x256xf32>
    %c30 = arith.constant 30 : index
    %316 = memref.load %arg2[%c30] : memref<98xf32, #tpu.memory_space<smem>>
    %317 = vector.extract_strided_slice %51 {offsets = [0, 67], sizes = [1, 256], strides = [1, 1]} : vector<1x358xf32> to vector<1x256xf32>
    %318 = vector.broadcast %316 : f32 to vector<1x256xf32>
    %319 = arith.mulf %318, %317 : vector<1x256xf32>
    %320 = arith.addf %315, %319 : vector<1x256xf32>
    %c31 = arith.constant 31 : index
    %321 = memref.load %arg2[%c31] : memref<98xf32, #tpu.memory_space<smem>>
    %322 = vector.extract_strided_slice %52 {offsets = [0, 67], sizes = [1, 256], strides = [1, 1]} : vector<1x358xf32> to vector<1x256xf32>
    %323 = vector.broadcast %321 : f32 to vector<1x256xf32>
    %324 = arith.mulf %323, %322 : vector<1x256xf32>
    %325 = arith.addf %320, %324 : vector<1x256xf32>
    %c32 = arith.constant 32 : index
    %326 = memref.load %arg2[%c32] : memref<98xf32, #tpu.memory_space<smem>>
    %327 = vector.extract_strided_slice %64 {offsets = [0, 67], sizes = [1, 256], strides = [1, 1]} : vector<1x358xf32> to vector<1x256xf32>
    %328 = vector.broadcast %326 : f32 to vector<1x256xf32>
    %329 = arith.mulf %328, %327 : vector<1x256xf32>
    %330 = arith.addf %325, %329 : vector<1x256xf32>
    %c33 = arith.constant 33 : index
    %331 = memref.load %arg2[%c33] : memref<98xf32, #tpu.memory_space<smem>>
    %332 = vector.extract_strided_slice %76 {offsets = [0, 67], sizes = [1, 256], strides = [1, 1]} : vector<1x358xf32> to vector<1x256xf32>
    %333 = vector.broadcast %331 : f32 to vector<1x256xf32>
    %334 = arith.mulf %333, %332 : vector<1x256xf32>
    %335 = arith.addf %330, %334 : vector<1x256xf32>
    %c34 = arith.constant 34 : index
    %336 = memref.load %arg2[%c34] : memref<98xf32, #tpu.memory_space<smem>>
    %337 = vector.extract_strided_slice %88 {offsets = [0, 67], sizes = [1, 256], strides = [1, 1]} : vector<1x358xf32> to vector<1x256xf32>
    %338 = vector.broadcast %336 : f32 to vector<1x256xf32>
    %339 = arith.mulf %338, %337 : vector<1x256xf32>
    %340 = arith.addf %335, %339 : vector<1x256xf32>
    %c35 = arith.constant 35 : index
    %341 = memref.load %arg2[%c35] : memref<98xf32, #tpu.memory_space<smem>>
    %342 = vector.extract_strided_slice %27 {offsets = [0, 83], sizes = [1, 256], strides = [1, 1]} : vector<1x358xf32> to vector<1x256xf32>
    %343 = vector.broadcast %341 : f32 to vector<1x256xf32>
    %344 = arith.mulf %343, %342 : vector<1x256xf32>
    %345 = arith.addf %305, %344 : vector<1x256xf32>
    %c36 = arith.constant 36 : index
    %346 = memref.load %arg2[%c36] : memref<98xf32, #tpu.memory_space<smem>>
    %347 = vector.extract_strided_slice %39 {offsets = [0, 83], sizes = [1, 256], strides = [1, 1]} : vector<1x358xf32> to vector<1x256xf32>
    %348 = vector.broadcast %346 : f32 to vector<1x256xf32>
    %349 = arith.mulf %348, %347 : vector<1x256xf32>
    %350 = arith.addf %345, %349 : vector<1x256xf32>
    %c37 = arith.constant 37 : index
    %351 = memref.load %arg2[%c37] : memref<98xf32, #tpu.memory_space<smem>>
    %352 = vector.extract_strided_slice %51 {offsets = [0, 83], sizes = [1, 256], strides = [1, 1]} : vector<1x358xf32> to vector<1x256xf32>
    %353 = vector.broadcast %351 : f32 to vector<1x256xf32>
    %354 = arith.mulf %353, %352 : vector<1x256xf32>
    %355 = arith.addf %350, %354 : vector<1x256xf32>
    %c38 = arith.constant 38 : index
    %356 = memref.load %arg2[%c38] : memref<98xf32, #tpu.memory_space<smem>>
    %357 = vector.extract_strided_slice %52 {offsets = [0, 83], sizes = [1, 256], strides = [1, 1]} : vector<1x358xf32> to vector<1x256xf32>
    %358 = vector.broadcast %356 : f32 to vector<1x256xf32>
    %359 = arith.mulf %358, %357 : vector<1x256xf32>
    %360 = arith.addf %355, %359 : vector<1x256xf32>
    %c39 = arith.constant 39 : index
    %361 = memref.load %arg2[%c39] : memref<98xf32, #tpu.memory_space<smem>>
    %362 = vector.extract_strided_slice %64 {offsets = [0, 83], sizes = [1, 256], strides = [1, 1]} : vector<1x358xf32> to vector<1x256xf32>
    %363 = vector.broadcast %361 : f32 to vector<1x256xf32>
    %364 = arith.mulf %363, %362 : vector<1x256xf32>
    %365 = arith.addf %360, %364 : vector<1x256xf32>
    %c40 = arith.constant 40 : index
    %366 = memref.load %arg2[%c40] : memref<98xf32, #tpu.memory_space<smem>>
    %367 = vector.extract_strided_slice %76 {offsets = [0, 83], sizes = [1, 256], strides = [1, 1]} : vector<1x358xf32> to vector<1x256xf32>
    %368 = vector.broadcast %366 : f32 to vector<1x256xf32>
    %369 = arith.mulf %368, %367 : vector<1x256xf32>
    %370 = arith.addf %365, %369 : vector<1x256xf32>
    %c41 = arith.constant 41 : index
    %371 = memref.load %arg2[%c41] : memref<98xf32, #tpu.memory_space<smem>>
    %372 = vector.extract_strided_slice %88 {offsets = [0, 83], sizes = [1, 256], strides = [1, 1]} : vector<1x358xf32> to vector<1x256xf32>
    %373 = vector.broadcast %371 : f32 to vector<1x256xf32>
    %374 = arith.mulf %373, %372 : vector<1x256xf32>
    %375 = arith.addf %370, %374 : vector<1x256xf32>
    %c42 = arith.constant 42 : index
    %376 = memref.load %arg2[%c42] : memref<98xf32, #tpu.memory_space<smem>>
    %377 = vector.extract_strided_slice %27 {offsets = [0, 99], sizes = [1, 256], strides = [1, 1]} : vector<1x358xf32> to vector<1x256xf32>
    %378 = vector.broadcast %376 : f32 to vector<1x256xf32>
    %379 = arith.mulf %378, %377 : vector<1x256xf32>
    %380 = arith.addf %340, %379 : vector<1x256xf32>
    %c43 = arith.constant 43 : index
    %381 = memref.load %arg2[%c43] : memref<98xf32, #tpu.memory_space<smem>>
    %382 = vector.extract_strided_slice %39 {offsets = [0, 99], sizes = [1, 256], strides = [1, 1]} : vector<1x358xf32> to vector<1x256xf32>
    %383 = vector.broadcast %381 : f32 to vector<1x256xf32>
    %384 = arith.mulf %383, %382 : vector<1x256xf32>
    %385 = arith.addf %380, %384 : vector<1x256xf32>
    %c44 = arith.constant 44 : index
    %386 = memref.load %arg2[%c44] : memref<98xf32, #tpu.memory_space<smem>>
    %387 = vector.extract_strided_slice %51 {offsets = [0, 99], sizes = [1, 256], strides = [1, 1]} : vector<1x358xf32> to vector<1x256xf32>
    %388 = vector.broadcast %386 : f32 to vector<1x256xf32>
    %389 = arith.mulf %388, %387 : vector<1x256xf32>
    %390 = arith.addf %385, %389 : vector<1x256xf32>
    %c45 = arith.constant 45 : index
    %391 = memref.load %arg2[%c45] : memref<98xf32, #tpu.memory_space<smem>>
    %392 = vector.extract_strided_slice %52 {offsets = [0, 99], sizes = [1, 256], strides = [1, 1]} : vector<1x358xf32> to vector<1x256xf32>
    %393 = vector.broadcast %391 : f32 to vector<1x256xf32>
    %394 = arith.mulf %393, %392 : vector<1x256xf32>
    %395 = arith.addf %390, %394 : vector<1x256xf32>
    %c46 = arith.constant 46 : index
    %396 = memref.load %arg2[%c46] : memref<98xf32, #tpu.memory_space<smem>>
    %397 = vector.extract_strided_slice %64 {offsets = [0, 99], sizes = [1, 256], strides = [1, 1]} : vector<1x358xf32> to vector<1x256xf32>
    %398 = vector.broadcast %396 : f32 to vector<1x256xf32>
    %399 = arith.mulf %398, %397 : vector<1x256xf32>
    %400 = arith.addf %395, %399 : vector<1x256xf32>
    %c47 = arith.constant 47 : index
    %401 = memref.load %arg2[%c47] : memref<98xf32, #tpu.memory_space<smem>>
    %402 = vector.extract_strided_slice %76 {offsets = [0, 99], sizes = [1, 256], strides = [1, 1]} : vector<1x358xf32> to vector<1x256xf32>
    %403 = vector.broadcast %401 : f32 to vector<1x256xf32>
    %404 = arith.mulf %403, %402 : vector<1x256xf32>
    %405 = arith.addf %400, %404 : vector<1x256xf32>
    %c48 = arith.constant 48 : index
    %406 = memref.load %arg2[%c48] : memref<98xf32, #tpu.memory_space<smem>>
    %407 = vector.extract_strided_slice %88 {offsets = [0, 99], sizes = [1, 256], strides = [1, 1]} : vector<1x358xf32> to vector<1x256xf32>
    %408 = vector.broadcast %406 : f32 to vector<1x256xf32>
    %409 = arith.mulf %408, %407 : vector<1x256xf32>
    %410 = arith.addf %405, %409 : vector<1x256xf32>
    %c49 = arith.constant 49 : index
    %411 = memref.load %arg2[%c49] : memref<98xf32, #tpu.memory_space<smem>>
    %412 = vector.extract_strided_slice %100 {offsets = [0, 3], sizes = [1, 256], strides = [1, 1]} : vector<1x358xf32> to vector<1x256xf32>
    %413 = vector.broadcast %411 : f32 to vector<1x256xf32>
    %414 = arith.mulf %413, %412 : vector<1x256xf32>
    %415 = arith.addf %164, %414 : vector<1x256xf32>
    %c50 = arith.constant 50 : index
    %416 = memref.load %arg2[%c50] : memref<98xf32, #tpu.memory_space<smem>>
    %417 = vector.extract_strided_slice %112 {offsets = [0, 3], sizes = [1, 256], strides = [1, 1]} : vector<1x358xf32> to vector<1x256xf32>
    %418 = vector.broadcast %416 : f32 to vector<1x256xf32>
    %419 = arith.mulf %418, %417 : vector<1x256xf32>
    %420 = arith.addf %415, %419 : vector<1x256xf32>
    %c51 = arith.constant 51 : index
    %421 = memref.load %arg2[%c51] : memref<98xf32, #tpu.memory_space<smem>>
    %422 = vector.extract_strided_slice %124 {offsets = [0, 3], sizes = [1, 256], strides = [1, 1]} : vector<1x358xf32> to vector<1x256xf32>
    %423 = vector.broadcast %421 : f32 to vector<1x256xf32>
    %424 = arith.mulf %423, %422 : vector<1x256xf32>
    %425 = arith.addf %420, %424 : vector<1x256xf32>
    %c52 = arith.constant 52 : index
    %426 = memref.load %arg2[%c52] : memref<98xf32, #tpu.memory_space<smem>>
    %427 = vector.extract_strided_slice %125 {offsets = [0, 3], sizes = [1, 256], strides = [1, 1]} : vector<1x358xf32> to vector<1x256xf32>
    %428 = vector.broadcast %426 : f32 to vector<1x256xf32>
    %429 = arith.mulf %428, %427 : vector<1x256xf32>
    %430 = arith.addf %425, %429 : vector<1x256xf32>
    %c53 = arith.constant 53 : index
    %431 = memref.load %arg2[%c53] : memref<98xf32, #tpu.memory_space<smem>>
    %432 = vector.extract_strided_slice %137 {offsets = [0, 3], sizes = [1, 256], strides = [1, 1]} : vector<1x358xf32> to vector<1x256xf32>
    %433 = vector.broadcast %431 : f32 to vector<1x256xf32>
    %434 = arith.mulf %433, %432 : vector<1x256xf32>
    %435 = arith.addf %430, %434 : vector<1x256xf32>
    %c54 = arith.constant 54 : index
    %436 = memref.load %arg2[%c54] : memref<98xf32, #tpu.memory_space<smem>>
    %437 = vector.extract_strided_slice %149 {offsets = [0, 3], sizes = [1, 256], strides = [1, 1]} : vector<1x358xf32> to vector<1x256xf32>
    %438 = vector.broadcast %436 : f32 to vector<1x256xf32>
    %439 = arith.mulf %438, %437 : vector<1x256xf32>
    %440 = arith.addf %435, %439 : vector<1x256xf32>
    %c55 = arith.constant 55 : index
    %441 = memref.load %arg2[%c55] : memref<98xf32, #tpu.memory_space<smem>>
    %442 = vector.extract_strided_slice %161 {offsets = [0, 3], sizes = [1, 256], strides = [1, 1]} : vector<1x358xf32> to vector<1x256xf32>
    %443 = vector.broadcast %441 : f32 to vector<1x256xf32>
    %444 = arith.mulf %443, %442 : vector<1x256xf32>
    %445 = arith.addf %440, %444 : vector<1x256xf32>
    %c56 = arith.constant 56 : index
    %446 = memref.load %arg2[%c56] : memref<98xf32, #tpu.memory_space<smem>>
    %447 = vector.extract_strided_slice %100 {offsets = [0, 19], sizes = [1, 256], strides = [1, 1]} : vector<1x358xf32> to vector<1x256xf32>
    %448 = vector.broadcast %446 : f32 to vector<1x256xf32>
    %449 = arith.mulf %448, %447 : vector<1x256xf32>
    %450 = arith.addf %165, %449 : vector<1x256xf32>
    %c57 = arith.constant 57 : index
    %451 = memref.load %arg2[%c57] : memref<98xf32, #tpu.memory_space<smem>>
    %452 = vector.extract_strided_slice %112 {offsets = [0, 19], sizes = [1, 256], strides = [1, 1]} : vector<1x358xf32> to vector<1x256xf32>
    %453 = vector.broadcast %451 : f32 to vector<1x256xf32>
    %454 = arith.mulf %453, %452 : vector<1x256xf32>
    %455 = arith.addf %450, %454 : vector<1x256xf32>
    %c58 = arith.constant 58 : index
    %456 = memref.load %arg2[%c58] : memref<98xf32, #tpu.memory_space<smem>>
    %457 = vector.extract_strided_slice %124 {offsets = [0, 19], sizes = [1, 256], strides = [1, 1]} : vector<1x358xf32> to vector<1x256xf32>
    %458 = vector.broadcast %456 : f32 to vector<1x256xf32>
    %459 = arith.mulf %458, %457 : vector<1x256xf32>
    %460 = arith.addf %455, %459 : vector<1x256xf32>
    %c59 = arith.constant 59 : index
    %461 = memref.load %arg2[%c59] : memref<98xf32, #tpu.memory_space<smem>>
    %462 = vector.extract_strided_slice %125 {offsets = [0, 19], sizes = [1, 256], strides = [1, 1]} : vector<1x358xf32> to vector<1x256xf32>
    %463 = vector.broadcast %461 : f32 to vector<1x256xf32>
    %464 = arith.mulf %463, %462 : vector<1x256xf32>
    %465 = arith.addf %460, %464 : vector<1x256xf32>
    %c60 = arith.constant 60 : index
    %466 = memref.load %arg2[%c60] : memref<98xf32, #tpu.memory_space<smem>>
    %467 = vector.extract_strided_slice %137 {offsets = [0, 19], sizes = [1, 256], strides = [1, 1]} : vector<1x358xf32> to vector<1x256xf32>
    %468 = vector.broadcast %466 : f32 to vector<1x256xf32>
    %469 = arith.mulf %468, %467 : vector<1x256xf32>
    %470 = arith.addf %465, %469 : vector<1x256xf32>
    %c61 = arith.constant 61 : index
    %471 = memref.load %arg2[%c61] : memref<98xf32, #tpu.memory_space<smem>>
    %472 = vector.extract_strided_slice %149 {offsets = [0, 19], sizes = [1, 256], strides = [1, 1]} : vector<1x358xf32> to vector<1x256xf32>
    %473 = vector.broadcast %471 : f32 to vector<1x256xf32>
    %474 = arith.mulf %473, %472 : vector<1x256xf32>
    %475 = arith.addf %470, %474 : vector<1x256xf32>
    %c62 = arith.constant 62 : index
    %476 = memref.load %arg2[%c62] : memref<98xf32, #tpu.memory_space<smem>>
    %477 = vector.extract_strided_slice %161 {offsets = [0, 19], sizes = [1, 256], strides = [1, 1]} : vector<1x358xf32> to vector<1x256xf32>
    %478 = vector.broadcast %476 : f32 to vector<1x256xf32>
    %479 = arith.mulf %478, %477 : vector<1x256xf32>
    %480 = arith.addf %475, %479 : vector<1x256xf32>
    %c63 = arith.constant 63 : index
    %481 = memref.load %arg2[%c63] : memref<98xf32, #tpu.memory_space<smem>>
    %482 = vector.extract_strided_slice %100 {offsets = [0, 35], sizes = [1, 256], strides = [1, 1]} : vector<1x358xf32> to vector<1x256xf32>
    %483 = vector.broadcast %481 : f32 to vector<1x256xf32>
    %484 = arith.mulf %483, %482 : vector<1x256xf32>
    %485 = arith.addf %445, %484 : vector<1x256xf32>
    %c64 = arith.constant 64 : index
    %486 = memref.load %arg2[%c64] : memref<98xf32, #tpu.memory_space<smem>>
    %487 = vector.extract_strided_slice %112 {offsets = [0, 35], sizes = [1, 256], strides = [1, 1]} : vector<1x358xf32> to vector<1x256xf32>
    %488 = vector.broadcast %486 : f32 to vector<1x256xf32>
    %489 = arith.mulf %488, %487 : vector<1x256xf32>
    %490 = arith.addf %485, %489 : vector<1x256xf32>
    %c65 = arith.constant 65 : index
    %491 = memref.load %arg2[%c65] : memref<98xf32, #tpu.memory_space<smem>>
    %492 = vector.extract_strided_slice %124 {offsets = [0, 35], sizes = [1, 256], strides = [1, 1]} : vector<1x358xf32> to vector<1x256xf32>
    %493 = vector.broadcast %491 : f32 to vector<1x256xf32>
    %494 = arith.mulf %493, %492 : vector<1x256xf32>
    %495 = arith.addf %490, %494 : vector<1x256xf32>
    %c66 = arith.constant 66 : index
    %496 = memref.load %arg2[%c66] : memref<98xf32, #tpu.memory_space<smem>>
    %497 = vector.extract_strided_slice %125 {offsets = [0, 35], sizes = [1, 256], strides = [1, 1]} : vector<1x358xf32> to vector<1x256xf32>
    %498 = vector.broadcast %496 : f32 to vector<1x256xf32>
    %499 = arith.mulf %498, %497 : vector<1x256xf32>
    %500 = arith.addf %495, %499 : vector<1x256xf32>
    %c67 = arith.constant 67 : index
    %501 = memref.load %arg2[%c67] : memref<98xf32, #tpu.memory_space<smem>>
    %502 = vector.extract_strided_slice %137 {offsets = [0, 35], sizes = [1, 256], strides = [1, 1]} : vector<1x358xf32> to vector<1x256xf32>
    %503 = vector.broadcast %501 : f32 to vector<1x256xf32>
    %504 = arith.mulf %503, %502 : vector<1x256xf32>
    %505 = arith.addf %500, %504 : vector<1x256xf32>
    %c68 = arith.constant 68 : index
    %506 = memref.load %arg2[%c68] : memref<98xf32, #tpu.memory_space<smem>>
    %507 = vector.extract_strided_slice %149 {offsets = [0, 35], sizes = [1, 256], strides = [1, 1]} : vector<1x358xf32> to vector<1x256xf32>
    %508 = vector.broadcast %506 : f32 to vector<1x256xf32>
    %509 = arith.mulf %508, %507 : vector<1x256xf32>
    %510 = arith.addf %505, %509 : vector<1x256xf32>
    %c69 = arith.constant 69 : index
    %511 = memref.load %arg2[%c69] : memref<98xf32, #tpu.memory_space<smem>>
    %512 = vector.extract_strided_slice %161 {offsets = [0, 35], sizes = [1, 256], strides = [1, 1]} : vector<1x358xf32> to vector<1x256xf32>
    %513 = vector.broadcast %511 : f32 to vector<1x256xf32>
    %514 = arith.mulf %513, %512 : vector<1x256xf32>
    %515 = arith.addf %510, %514 : vector<1x256xf32>
    %c70 = arith.constant 70 : index
    %516 = memref.load %arg2[%c70] : memref<98xf32, #tpu.memory_space<smem>>
    %517 = vector.extract_strided_slice %100 {offsets = [0, 51], sizes = [1, 256], strides = [1, 1]} : vector<1x358xf32> to vector<1x256xf32>
    %518 = vector.broadcast %516 : f32 to vector<1x256xf32>
    %519 = arith.mulf %518, %517 : vector<1x256xf32>
    %520 = arith.addf %480, %519 : vector<1x256xf32>
    %c71 = arith.constant 71 : index
    %521 = memref.load %arg2[%c71] : memref<98xf32, #tpu.memory_space<smem>>
    %522 = vector.extract_strided_slice %112 {offsets = [0, 51], sizes = [1, 256], strides = [1, 1]} : vector<1x358xf32> to vector<1x256xf32>
    %523 = vector.broadcast %521 : f32 to vector<1x256xf32>
    %524 = arith.mulf %523, %522 : vector<1x256xf32>
    %525 = arith.addf %520, %524 : vector<1x256xf32>
    %c72 = arith.constant 72 : index
    %526 = memref.load %arg2[%c72] : memref<98xf32, #tpu.memory_space<smem>>
    %527 = vector.extract_strided_slice %124 {offsets = [0, 51], sizes = [1, 256], strides = [1, 1]} : vector<1x358xf32> to vector<1x256xf32>
    %528 = vector.broadcast %526 : f32 to vector<1x256xf32>
    %529 = arith.mulf %528, %527 : vector<1x256xf32>
    %530 = arith.addf %525, %529 : vector<1x256xf32>
    %c73 = arith.constant 73 : index
    %531 = memref.load %arg2[%c73] : memref<98xf32, #tpu.memory_space<smem>>
    %532 = vector.extract_strided_slice %125 {offsets = [0, 51], sizes = [1, 256], strides = [1, 1]} : vector<1x358xf32> to vector<1x256xf32>
    %533 = vector.broadcast %531 : f32 to vector<1x256xf32>
    %534 = arith.mulf %533, %532 : vector<1x256xf32>
    %535 = arith.addf %530, %534 : vector<1x256xf32>
    %c74 = arith.constant 74 : index
    %536 = memref.load %arg2[%c74] : memref<98xf32, #tpu.memory_space<smem>>
    %537 = vector.extract_strided_slice %137 {offsets = [0, 51], sizes = [1, 256], strides = [1, 1]} : vector<1x358xf32> to vector<1x256xf32>
    %538 = vector.broadcast %536 : f32 to vector<1x256xf32>
    %539 = arith.mulf %538, %537 : vector<1x256xf32>
    %540 = arith.addf %535, %539 : vector<1x256xf32>
    %c75 = arith.constant 75 : index
    %541 = memref.load %arg2[%c75] : memref<98xf32, #tpu.memory_space<smem>>
    %542 = vector.extract_strided_slice %149 {offsets = [0, 51], sizes = [1, 256], strides = [1, 1]} : vector<1x358xf32> to vector<1x256xf32>
    %543 = vector.broadcast %541 : f32 to vector<1x256xf32>
    %544 = arith.mulf %543, %542 : vector<1x256xf32>
    %545 = arith.addf %540, %544 : vector<1x256xf32>
    %c76 = arith.constant 76 : index
    %546 = memref.load %arg2[%c76] : memref<98xf32, #tpu.memory_space<smem>>
    %547 = vector.extract_strided_slice %161 {offsets = [0, 51], sizes = [1, 256], strides = [1, 1]} : vector<1x358xf32> to vector<1x256xf32>
    %548 = vector.broadcast %546 : f32 to vector<1x256xf32>
    %549 = arith.mulf %548, %547 : vector<1x256xf32>
    %550 = arith.addf %545, %549 : vector<1x256xf32>
    %c77 = arith.constant 77 : index
    %551 = memref.load %arg2[%c77] : memref<98xf32, #tpu.memory_space<smem>>
    %552 = vector.extract_strided_slice %100 {offsets = [0, 67], sizes = [1, 256], strides = [1, 1]} : vector<1x358xf32> to vector<1x256xf32>
    %553 = vector.broadcast %551 : f32 to vector<1x256xf32>
    %554 = arith.mulf %553, %552 : vector<1x256xf32>
    %555 = arith.addf %515, %554 : vector<1x256xf32>
    %c78 = arith.constant 78 : index
    %556 = memref.load %arg2[%c78] : memref<98xf32, #tpu.memory_space<smem>>
    %557 = vector.extract_strided_slice %112 {offsets = [0, 67], sizes = [1, 256], strides = [1, 1]} : vector<1x358xf32> to vector<1x256xf32>
    %558 = vector.broadcast %556 : f32 to vector<1x256xf32>
    %559 = arith.mulf %558, %557 : vector<1x256xf32>
    %560 = arith.addf %555, %559 : vector<1x256xf32>
    %c79 = arith.constant 79 : index
    %561 = memref.load %arg2[%c79] : memref<98xf32, #tpu.memory_space<smem>>
    %562 = vector.extract_strided_slice %124 {offsets = [0, 67], sizes = [1, 256], strides = [1, 1]} : vector<1x358xf32> to vector<1x256xf32>
    %563 = vector.broadcast %561 : f32 to vector<1x256xf32>
    %564 = arith.mulf %563, %562 : vector<1x256xf32>
    %565 = arith.addf %560, %564 : vector<1x256xf32>
    %c80 = arith.constant 80 : index
    %566 = memref.load %arg2[%c80] : memref<98xf32, #tpu.memory_space<smem>>
    %567 = vector.extract_strided_slice %125 {offsets = [0, 67], sizes = [1, 256], strides = [1, 1]} : vector<1x358xf32> to vector<1x256xf32>
    %568 = vector.broadcast %566 : f32 to vector<1x256xf32>
    %569 = arith.mulf %568, %567 : vector<1x256xf32>
    %570 = arith.addf %565, %569 : vector<1x256xf32>
    %c81 = arith.constant 81 : index
    %571 = memref.load %arg2[%c81] : memref<98xf32, #tpu.memory_space<smem>>
    %572 = vector.extract_strided_slice %137 {offsets = [0, 67], sizes = [1, 256], strides = [1, 1]} : vector<1x358xf32> to vector<1x256xf32>
    %573 = vector.broadcast %571 : f32 to vector<1x256xf32>
    %574 = arith.mulf %573, %572 : vector<1x256xf32>
    %575 = arith.addf %570, %574 : vector<1x256xf32>
    %c82 = arith.constant 82 : index
    %576 = memref.load %arg2[%c82] : memref<98xf32, #tpu.memory_space<smem>>
    %577 = vector.extract_strided_slice %149 {offsets = [0, 67], sizes = [1, 256], strides = [1, 1]} : vector<1x358xf32> to vector<1x256xf32>
    %578 = vector.broadcast %576 : f32 to vector<1x256xf32>
    %579 = arith.mulf %578, %577 : vector<1x256xf32>
    %580 = arith.addf %575, %579 : vector<1x256xf32>
    %c83 = arith.constant 83 : index
    %581 = memref.load %arg2[%c83] : memref<98xf32, #tpu.memory_space<smem>>
    %582 = vector.extract_strided_slice %161 {offsets = [0, 67], sizes = [1, 256], strides = [1, 1]} : vector<1x358xf32> to vector<1x256xf32>
    %583 = vector.broadcast %581 : f32 to vector<1x256xf32>
    %584 = arith.mulf %583, %582 : vector<1x256xf32>
    %585 = arith.addf %580, %584 : vector<1x256xf32>
    %c84 = arith.constant 84 : index
    %586 = memref.load %arg2[%c84] : memref<98xf32, #tpu.memory_space<smem>>
    %587 = vector.extract_strided_slice %100 {offsets = [0, 83], sizes = [1, 256], strides = [1, 1]} : vector<1x358xf32> to vector<1x256xf32>
    %588 = vector.broadcast %586 : f32 to vector<1x256xf32>
    %589 = arith.mulf %588, %587 : vector<1x256xf32>
    %590 = arith.addf %550, %589 : vector<1x256xf32>
    %c85 = arith.constant 85 : index
    %591 = memref.load %arg2[%c85] : memref<98xf32, #tpu.memory_space<smem>>
    %592 = vector.extract_strided_slice %112 {offsets = [0, 83], sizes = [1, 256], strides = [1, 1]} : vector<1x358xf32> to vector<1x256xf32>
    %593 = vector.broadcast %591 : f32 to vector<1x256xf32>
    %594 = arith.mulf %593, %592 : vector<1x256xf32>
    %595 = arith.addf %590, %594 : vector<1x256xf32>
    %c86 = arith.constant 86 : index
    %596 = memref.load %arg2[%c86] : memref<98xf32, #tpu.memory_space<smem>>
    %597 = vector.extract_strided_slice %124 {offsets = [0, 83], sizes = [1, 256], strides = [1, 1]} : vector<1x358xf32> to vector<1x256xf32>
    %598 = vector.broadcast %596 : f32 to vector<1x256xf32>
    %599 = arith.mulf %598, %597 : vector<1x256xf32>
    %600 = arith.addf %595, %599 : vector<1x256xf32>
    %c87 = arith.constant 87 : index
    %601 = memref.load %arg2[%c87] : memref<98xf32, #tpu.memory_space<smem>>
    %602 = vector.extract_strided_slice %125 {offsets = [0, 83], sizes = [1, 256], strides = [1, 1]} : vector<1x358xf32> to vector<1x256xf32>
    %603 = vector.broadcast %601 : f32 to vector<1x256xf32>
    %604 = arith.mulf %603, %602 : vector<1x256xf32>
    %605 = arith.addf %600, %604 : vector<1x256xf32>
    %c88 = arith.constant 88 : index
    %606 = memref.load %arg2[%c88] : memref<98xf32, #tpu.memory_space<smem>>
    %607 = vector.extract_strided_slice %137 {offsets = [0, 83], sizes = [1, 256], strides = [1, 1]} : vector<1x358xf32> to vector<1x256xf32>
    %608 = vector.broadcast %606 : f32 to vector<1x256xf32>
    %609 = arith.mulf %608, %607 : vector<1x256xf32>
    %610 = arith.addf %605, %609 : vector<1x256xf32>
    %c89 = arith.constant 89 : index
    %611 = memref.load %arg2[%c89] : memref<98xf32, #tpu.memory_space<smem>>
    %612 = vector.extract_strided_slice %149 {offsets = [0, 83], sizes = [1, 256], strides = [1, 1]} : vector<1x358xf32> to vector<1x256xf32>
    %613 = vector.broadcast %611 : f32 to vector<1x256xf32>
    %614 = arith.mulf %613, %612 : vector<1x256xf32>
    %615 = arith.addf %610, %614 : vector<1x256xf32>
    %c90 = arith.constant 90 : index
    %616 = memref.load %arg2[%c90] : memref<98xf32, #tpu.memory_space<smem>>
    %617 = vector.extract_strided_slice %161 {offsets = [0, 83], sizes = [1, 256], strides = [1, 1]} : vector<1x358xf32> to vector<1x256xf32>
    %618 = vector.broadcast %616 : f32 to vector<1x256xf32>
    %619 = arith.mulf %618, %617 : vector<1x256xf32>
    %620 = arith.addf %615, %619 : vector<1x256xf32>
    %c91 = arith.constant 91 : index
    %621 = memref.load %arg2[%c91] : memref<98xf32, #tpu.memory_space<smem>>
    %622 = vector.extract_strided_slice %100 {offsets = [0, 99], sizes = [1, 256], strides = [1, 1]} : vector<1x358xf32> to vector<1x256xf32>
    %623 = vector.broadcast %621 : f32 to vector<1x256xf32>
    %624 = arith.mulf %623, %622 : vector<1x256xf32>
    %625 = arith.addf %585, %624 : vector<1x256xf32>
    %c92 = arith.constant 92 : index
    %626 = memref.load %arg2[%c92] : memref<98xf32, #tpu.memory_space<smem>>
    %627 = vector.extract_strided_slice %112 {offsets = [0, 99], sizes = [1, 256], strides = [1, 1]} : vector<1x358xf32> to vector<1x256xf32>
    %628 = vector.broadcast %626 : f32 to vector<1x256xf32>
    %629 = arith.mulf %628, %627 : vector<1x256xf32>
    %630 = arith.addf %625, %629 : vector<1x256xf32>
    %c93 = arith.constant 93 : index
    %631 = memref.load %arg2[%c93] : memref<98xf32, #tpu.memory_space<smem>>
    %632 = vector.extract_strided_slice %124 {offsets = [0, 99], sizes = [1, 256], strides = [1, 1]} : vector<1x358xf32> to vector<1x256xf32>
    %633 = vector.broadcast %631 : f32 to vector<1x256xf32>
    %634 = arith.mulf %633, %632 : vector<1x256xf32>
    %635 = arith.addf %630, %634 : vector<1x256xf32>
    %c94 = arith.constant 94 : index
    %636 = memref.load %arg2[%c94] : memref<98xf32, #tpu.memory_space<smem>>
    %637 = vector.extract_strided_slice %125 {offsets = [0, 99], sizes = [1, 256], strides = [1, 1]} : vector<1x358xf32> to vector<1x256xf32>
    %638 = vector.broadcast %636 : f32 to vector<1x256xf32>
    %639 = arith.mulf %638, %637 : vector<1x256xf32>
    %640 = arith.addf %635, %639 : vector<1x256xf32>
    %c95 = arith.constant 95 : index
    %641 = memref.load %arg2[%c95] : memref<98xf32, #tpu.memory_space<smem>>
    %642 = vector.extract_strided_slice %137 {offsets = [0, 99], sizes = [1, 256], strides = [1, 1]} : vector<1x358xf32> to vector<1x256xf32>
    %643 = vector.broadcast %641 : f32 to vector<1x256xf32>
    %644 = arith.mulf %643, %642 : vector<1x256xf32>
    %645 = arith.addf %640, %644 : vector<1x256xf32>
    %c96 = arith.constant 96 : index
    %646 = memref.load %arg2[%c96] : memref<98xf32, #tpu.memory_space<smem>>
    %647 = vector.extract_strided_slice %149 {offsets = [0, 99], sizes = [1, 256], strides = [1, 1]} : vector<1x358xf32> to vector<1x256xf32>
    %648 = vector.broadcast %646 : f32 to vector<1x256xf32>
    %649 = arith.mulf %648, %647 : vector<1x256xf32>
    %650 = arith.addf %645, %649 : vector<1x256xf32>
    %c97 = arith.constant 97 : index
    %651 = memref.load %arg2[%c97] : memref<98xf32, #tpu.memory_space<smem>>
    %652 = vector.extract_strided_slice %161 {offsets = [0, 99], sizes = [1, 256], strides = [1, 1]} : vector<1x358xf32> to vector<1x256xf32>
    %653 = vector.broadcast %651 : f32 to vector<1x256xf32>
    %654 = arith.mulf %653, %652 : vector<1x256xf32>
    %655 = arith.addf %650, %654 : vector<1x256xf32>
    %656 = arith.addf %410, %375 : vector<1x256xf32>
    %657 = arith.addf %655, %620 : vector<1x256xf32>
    %658 = arith.addf %656, %657 : vector<1x256xf32>
    %c0_63 = arith.constant 0 : index
    %659 = memref.load %arg3[%c0_63] : memref<1xf32, #tpu.memory_space<smem>>
    %660 = vector.broadcast %659 : f32 to vector<1x256xf32>
    %661 = arith.addf %658, %660 : vector<1x256xf32>
    %662 = arith.negf %661 : vector<1x256xf32>
    %663 = math.exp %662 : vector<1x256xf32>
    %cst_64 = arith.constant 1.000000e+00 : f32
    %664 = vector.broadcast %cst_64 : f32 to vector<1x256xf32>
    %665 = arith.addf %664, %663 : vector<1x256xf32>
    %666 = arith.divf %664, %665 : vector<1x256xf32>
    %667 = vector.broadcast %666 : vector<1x256xf32> to vector<4x256xf32>
    %668 = arith.mulf %1, %667 : vector<4x256xf32>
    %c0_65 = arith.constant 0 : index
    %c0_66 = arith.constant 0 : index
    %c0_67 = arith.constant 0 : index
    %669 = vector.load %arg4[%c0_65, %c0_66, %c0_67] : memref<1x4x256xf32, #tpu.memory_space<vmem>>, vector<1x4x256xf32>
    %670 = vector.shape_cast %669 : vector<1x4x256xf32> to vector<4x256xf32>
    %671 = vector.shape_cast %668 : vector<4x256xf32> to vector<1x4x256xf32>
    tpu.vector_store %arg4[%c0_65, %c0_66, %c0_67], %671 {strides = array<i32>} : memref<1x4x256xf32, #tpu.memory_space<vmem>>, vector<1x4x256xf32>,
    return
  }
  func.func @transform_0(%arg0: i32) -> (i32, i32, i32) {
    %c0_i32 = arith.constant 0 : i32
    %c0_i32_0 = arith.constant 0 : i32
    %c0_i32_1 = arith.constant 0 : i32
    return %arg0, %c0_i32, %c0_i32_0 : i32, i32, i32
  }
  func.func @transform_1(%arg0: i32) -> i32 {
    %c0_i32 = arith.constant 0 : i32
    %c0_i32_0 = arith.constant 0 : i32
    return %c0_i32 : i32
  }
  func.func @transform_2(%arg0: i32) -> i32 {
    %c0_i32 = arith.constant 0 : i32
    %c0_i32_0 = arith.constant 0 : i32
    return %c0_i32 : i32
  }
  func.func @transform_3(%arg0: i32) -> (i32, i32, i32) {
    %c0_i32 = arith.constant 0 : i32
    %c0_i32_0 = arith.constant 0 : i32
    %c0_i32_1 = arith.constant 0 : i32
    return %arg0, %c0_i32, %c0_i32_0 : i32, i32, i32
  }
}

</mosaic_0001>

<bundles_post_ra>
// kernel: tpu_custom_call.1
= control target key start
LH: loop header
LB: loop body
LE: loop exit
PB: predicated region body
PF: predicated region fallthrough
CT: control target
= control target key end

     0   :  { %s5243_s0 = inlined_call_operand.hbm [shape: f32[2,4,256], index: 0, kind: input, shape index: {}]   ;;  %s5244_s1 = inlined_call_operand.vmem [shape: f32[98], index: 1, kind: input, shape index: {}]   ;;  %s5245_s2 = inlined_call_operand.<no memory space> [shape: f32[1], index: 2, kind: input, shape index: {}]   ;;  %s5246_s3 = inlined_call_operand.hbm [shape: f32[2,4,256], index: 3, kind: output, shape index: {}]  }
   0x1   :  { %8 = sst [smem:[#allocation2]] %s5245_s2 }
   0x2   :  { %9 = vsyncpa [#allocation4], 0 }
   0x3   :  { %11 = vsyncpa [#allocation4 + $0x1], 0 }
   0x4   :  { %12 = vsyncpa [#allocation6], 0 }
   0x5   :  { %13 = vsyncpa [#allocation5], 0 }
   0x6   :  { %15 = vsyncpa [#allocation5 + $0x1], 0  ;;  %s2874_s14 = smov 0   ;;  %s2876_s15 = smov 0  }
   0x7   :  { %s2878_s16 = smov 0   ;;  %s2880_s17 = smov 0  }
   0x8 LB: > { %s2895_s2 = sadd.s32 4294967295, %s2832_s17   ;;  %s2511_s18 = sadd.s32 4294967294, %s2832_s17   ;;  %s2832_s17 = sphi %s2880_s17, %s5768_s17   ;;  %s2828_s16 = sphi %s2878_s16, %s5767_s16   ;;  %s2824_s15 = sphi %s2876_s15, %s5766_s15   ;;  %s2820_s14 = sphi %s2874_s14, %s5765_s14  }
   0x9   : > { %p41_p0 = scmp.ne.s32.totalorder %s2824_s15, %s2820_s14  ;;  %p5247_p1 = scmp.eq.s32.totalorder %s2895_s2, 0 }
   0xa   : > { %p113_p3 = scmp.eq.s32.totalorder %s2511_s18, 1  ;;  %p2512_p5 = scmp.ge.s32.totalorder %s2832_s17, 1 }
   0xb   : > { %p2904_p4 = por %p5247_p1, %p41_p0  ;;  %p120_p7 = scmp.lt.s32.totalorder %s2832_s17, 3 }
   0xc   : > { %p2909_p6 = por %p113_p3, %p41_p0  ;;  %s133_s23 = sshll.u32 %s5244_s1, 4  ;;  %s134_s23 = int_to_ptr.vmem [resolvable:$true] %s133_s23 }
   0xd   : > { %s5370_s19 = scalar_select %p2904_p4, 1, 0 }
   0xe   : > { %s5371_s20 = scalar_select %p2909_p6, 1, 0 }
   0xf   : > { %p2917_p8 = pnand %p2512_p5, %p120_p7  ;;  %s2925_s25 = sadd.s32 1, %s2832_s17  }
  0x10   : > { %s25_s27 = ssub.s32 %s2832_s17, %s2925_s25  ;;  %s28_s29 = sadd.s32 1, %s2828_s16 }
  0x11   : > { %p2640_p10 = pneg %p2917_p8  ;;  %p2935_p12 = scmp.eq.s32.totalorder %s25_s27, 0 }
  0x12   : > { %p35_p13 = scmp.ne.s32.totalorder %s2828_s16, %s2824_s15  ;;  %s2717_s30 = scalar_lea.vmem %s134_s23, 16 }
  0x13   : > { %p2929_p11 = pnand %p2640_p10, %p5247_p1  ;;  %p2718_p0 = scmp.ne.s32.totalorder %s134_s23, %s2717_s30 }
  0x14   : > { %p2725_p9 = scmp.lt.s32.totalorder %s134_s23, %s134_s23  ;;  %p2726_p2 = scmp.lt.s32.totalorder %s2717_s30, %s2717_s30 }
  0x15   : > { %p2719_p3 = pneg %p2929_p11 }
  0x16   : > { %p2727_p10 = por %p2726_p2, %p2725_p9 }
  0x17   : > { %p2720_p5 = pnand %p2719_p3, %p2718_p0 }
  0x19   : > { %p2721_p7 = pneg %p2720_p5 }
  0x1b   : > { %p2728_p1 = pnand %p2727_p10, %p2721_p7 }
  0x1d   : > { %2731 = shalt.err (!%p2728_p1)
}
  0x1e   : > { %s2834_s4 = smov [#allocation7]   ;;  %p36_p2 = scmp.eq.s32.totalorder %s2832_s17, 0 }
  0x1f   : > { %2643 = dma.vmem_to_smem (!%p2929_p11), %s134_s23, 16, %s2834_s4, [#allocation6]  }
  0x20   : > { %s2949_s5 = scalar_select %p2935_p12, %s2828_s16, %s28_s29  }
  0x21   : > { %p5375_p1 = scmp.eq.s32.totalorder %s2895_s2, 1  ;;  %p2653_p0 = scmp.lt.s32.totalorder %s2832_s17, 2 }
  0x22   : > { %s147_s7 = sand.u32 1, %s2828_s16   ;;  %p37_p3 = por %p36_p2, %p35_p13 }
  0x23   : > { %p2957_p9 = por %p5375_p1, %p35_p13  ;;  %s2515_s8 = sshll.u32 %s147_s7, 3 }
  0x24   : > { %s2630_s9 = sshll.u32 %s2832_s17, 7  ;;  %s151_s13 = scalar_lea.vmem [#allocation3], %s2515_s8 }
  0x25   : > { %s5376_s6 = scalar_select %p2957_p9, 1, 0 }
  0x26   : > { %s2970_s12 = scalar_lea.hbm %s5243_s0, %s2630_s9  ;;  %s159_s18 = sshll.u32 %s151_s13, 4  ;;  %s2976_s18 = int_to_ptr.vmem [resolvable:$true] %s159_s18 }
  0x27   : > { %p2972_p11 = pnand %p2653_p0, %p37_p3  ;;  %s148_s22 = scalar_lea.sflag [#allocation4], %s147_s7 }
  0x28   : > { %s2732_s23 = scalar_lea.hbm %s2970_s12, 128  ;;  %s2737_s28 = scalar_lea.hbm %s5243_s0, 256 }
  0x29   : > { %p2733_p12 = scmp.ne.s32.totalorder %s2970_s12, %s2732_s23  ;;  %p2734_p13 = pneg %p2972_p11 }
  0x2a   : > { %p2738_p10 = scmp.lt.u32.totalorder %s2970_s12, %s5243_s0  ;;  %p2739_p2 = scmp.lt.u32.totalorder %s2737_s28, %s2732_s23 }
  0x2b   : > { %p2735_p5 = pnand %p2734_p13, %p2733_p12  ;;  %p2741_p0 = scmp.lt.u32.totalorder %s2732_s23, %s2970_s12 }
  0x2c   : > { %p2740_p1 = por %p2739_p2, %p2738_p10 }
  0x2d   : > { %p2736_p7 = pneg %p2735_p5 }
  0x2e   : > { %p2742_p3 = por %p2741_p0, %p2740_p1 }
  0x30   : > { %p2743_p6 = pnand %p2742_p3, %p2736_p7 }
  0x32   : > { %2746 = shalt.err (!%p2743_p6)
}
  0x33   : > { %s2747_s4 = scalar_lea.vmem %s2976_s18, 128  ;;  %s2835_s7 = smov [#allocation3]  }
  0x34   : > { %p2748_p12 = scmp.ne.s32.totalorder %s2976_s18, %s2747_s4  ;;  %s2752_s8 = sshll.u32 %s2835_s7, 4  ;;  %s2753_s8 = int_to_ptr.vmem [resolvable:$false] %s2752_s8 }
  0x35   : > { %s2754_s9 = scalar_lea.vmem %s2753_s8, 256  ;;  %p2755_p4 = scmp.lt.s32.totalorder %s2976_s18, %s2753_s8 }
  0x36   : > { %p2750_p5 = pnand %p2748_p12, %p2734_p13  ;;  %p2756_p10 = scmp.lt.s32.totalorder %s2754_s9, %s2747_s4 }
  0x38   : > { %p2751_p9 = pneg %p2750_p5  ;;  %p2757_p2 = por %p2756_p10, %p2755_p4 }
  0x3a   : > { %p2758_p1 = pnand %p2757_p2, %p2751_p9 }
  0x3c   : > { %2761 = shalt.err (!%p2758_p1)
}
  0x3d   : > { %2647 = dma.hbm_to_vmem [thread:$0]  (!%p2972_p11), %s2970_s12, 128, %s2976_s18, %s148_s22  }
  0x3e   : > { %168 = sbr.rel (%p2917_p8) target bundleno = 1023 (0x3ff), region = 32 }
  0x45   : > { %s3006_s10 = sand.u32 1, %s2824_s15   ;;  %p5378_p4 = scmp.ne.s32.totalorder %s5370_s19, 0 }
  0x46   : > { %s2519_s11 = sshll.u32 %s3006_s10, 3  ;;  %s171_s13 = scalar_lea.sflag [#allocation4], %s3006_s10 }
  0x47   : > { %s3012_s23 = scalar_lea.vmem [#allocation3], %s2519_s11 }
  0x48   : > { %2807 = dma.done.wait (%p5378_p4), %s171_s13, 128  }
  0x49   : > { %2809 = vsyncadd (%p5378_p4), %s171_s13, 4294967168  ;;  %p5379_p6 = scmp.eq.s32.totalorder %s2895_s2, 0 }
  0x4b   : > { %2811 = dma.done.wait (%p5379_p6), [#allocation6], 16   ;;  %p5380_p8 = pmov %p5379_p6 }
  0x4d   : > { %2813 = vsyncadd (%p5380_p8), [#allocation6], 4294967280 }
  0x4e   : > { %183 = sfence }
  0x4f   : > { %v202_v0 = vld [vmem:[%s3012_s23] sm:$0xff]  ;;  %vm5250_vm0 = vcmask 1043456   ;;  %s2836_s19 = smov 54   ;;  %v5252_v32 = vlaneseq  ;;  %vm243_vm1 = vcmask 441344   ;;  %s2837_s24 = smov 126   ;;  %vm5262_vm9 = vcmask 1039360  }
  0x50   : > { %v207_v1 = vsel %vm5250_vm0, %v202_v0, -inf  ;;  %v204_v2 = vcombine.high %v202_v0, %v202_v0  ;;  %v221_v3 = vsel %vm5250_vm0, %v202_v0, 0.0  ;;  %s2838_s12 = smov 127   ;;  %s2559_s18 = sld [smem:[#allocation7 + $0x23]] }
  0x51   : > { %v208_v4 = vrot.slane %v207_v1, 4  ;;  %v222_v5 = vrot.slane %v221_v3, 4  ;;  %v263_v33 = vand.u32 127, %v5252_v32  ;;  %s2839_s21 = smov 123   ;;  %s2840_s22 = smov 124  }
  0x52   : > { %v214_v6 = vsel %vm5250_vm0, %v204_v2, -inf  ;;  %v228_v7 = vsel %vm5250_vm0, %v204_v2, 0.0  ;;  %s2841_s26 = smov 122   ;;  %s2566_s27 = sld [smem:[#allocation7 + $0x2a]] }
  0x53   : > { %v209_v8 = vmax.f32 %v207_v1, %v208_v4  ;;  %v215_v9 = vrot.slane %v214_v6, 4  ;;  %v223_v10 = vadd.f32 %v222_v5, %v221_v3  ;;  %v229_v11 = vrot.slane %v228_v7, 4  ;;  %s2527_s28 = sld [smem:[#allocation7 + $0x3]]  ;;  %s2534_s29 = sld [smem:[#allocation7 + $0xa]] }
  0x54   : > { %v264_v34 = vadd.s32 128, %v263_v33  ;;  %v2522_v35 = vadd.s32 4294967293, %v263_v33  ;;  %v265_v47 = vadd.s32 256, %v263_v33  ;;  %s2548_s30 = sld [smem:[#allocation7 + $0x18]]  ;;  %s2541_s4 = sld [smem:[#allocation7 + $0x11]] }
  0x55   : > { %v210_v12 = vrot.slane %v209_v8, 2  ;;  %v216_v13 = vmax.f32 %v214_v6, %v215_v9  ;;  %v224_v14 = vrot.slane %v223_v10, 2  ;;  %v230_v15 = vadd.f32 %v229_v11, %v228_v7  ;;  %s2562_s7 = sld [smem:[#allocation7 + $0x26]]  ;;  %s2555_s8 = sld [smem:[#allocation7 + $0x1f]] }
  0x56   : > { %v2523_v36 = vadd.s32 4294967293, %v264_v34  ;;  %v3028_v37 = vand.u32 15, %v2522_v35  ;;  %v2524_v51 = vadd.s32 4294967293, %v265_v47  ;;  %v3078_v53 = vstv %s2559_s18  ;;  %s2538_s9 = sld [smem:[#allocation7 + $0xe]]  ;;  %s2545_s13 = sld [smem:[#allocation7 + $0x15]] }
  0x57   : > { %v211_v16 = vmax.f32 %v209_v8, %v210_v12  ;;  %v217_v17 = vrot.slane %v216_v13, 2  ;;  %v225_v18 = vadd.f32 %v224_v14, %v223_v10  ;;  %v231_v19 = vrot.slane %v230_v15, 2  ;;  %s2552_s18 = sld [smem:[#allocation7 + $0x1c]]  ;;  %p5762_p11 = scmp.ne.s32.totalorder %s5376_s6, 0 }
  0x58   : > { %v3030_v38 = vand.u32 15, %v2523_v36  ;;  %v3033_v39 = vadd.s32 4294967293, %v3028_v37  ;;  %v3084_v55 = vand.u32 15, %v2524_v51  ;;  %v3112_v59 = vstv %s2566_s27  ;;  %s2843_s27 = smov 93  }
  0x59   : > { %v212_v20 = vrot.slane %v211_v16, 1  ;;  %v218_v21 = vmax.f32 %v216_v13, %v217_v17  ;;  %v226_v22 = vrot.slane %v225_v18, 1  ;;  %v232_v23 = vadd.f32 %v231_v19, %v230_v15 }
  0x5a   : > { %v273_v40 = vadd.s32 4294967293, %v3030_v38  ;;  %vm275_vm2 = vcmp.ge.s32.totalorder %v3033_v39, 0  ;;  %v274_v56 = vadd.s32 4294967293, %v3084_v55  ;;  %v524_v61 = vstv %s2527_s28  ;;  %s2844_s28 = smov 61  }
  0x5b   : > { %v213_v24 = vmax.f32 %v211_v16, %v212_v20  ;;  %v219_v25 = vrot.slane %v218_v21, 1  ;;  %v227_v26 = vadd.f32 %v226_v22, %v225_v18  ;;  %v233_v27 = vrot.slane %v232_v23, 1 }
  0x5c   : > { %vm276_vm3 = vcmp.ge.s32.totalorder %v273_v40, 0  ;;  %vm279_vm4 = vcmp.lt.s32.totalorder %v273_v40, 16  ;;  %vm277_vm6 = vcmp.ge.s32.totalorder %v274_v56, 0  ;;  %vm280_vm7 = vcmp.lt.s32.totalorder %v274_v56, 16 }
  0x5d   : > { %239 = vrot.lane.b32.xlu0 %v213_v24, %s2836_s19  ;;  %v220_v28 = vmax.f32 %v218_v21, %v219_v25  ;;  %v235_v29 = vmul.f32 0.25, %v227_v26  ;;  %v234_v30 = vadd.f32 %v233_v27, %v232_v23  ;;  %vm3062_vm5 = vmand %vm276_vm3, %vm279_vm4  ;;  %v3126_v62 = vstv %s2534_s29  ;;  %s2845_s29 = smov 96  }
  0x5e   : > { %vm3099_vm8 = vmand %vm277_vm6, %vm280_vm7  ;;  %v3135_v1 = vstv %s2548_s30  ;;  %v708_v2 = vstv %s2541_s4  ;;  %v3142_v5 = vstv %s2562_s7  ;;  %v1018_v6 = vstv %s2555_s8  ;;  %s2846_s30 = smov 64   ;;  %s2847_s4 = smov 32  }
  0x5f   : > { %252 = vrot.lane.b32.xlu1 %v235_v29, %s2836_s19  ;;  %v236_v31 = vmul.f32 0.25, %v234_v30  ;;  %v641_v10 = vstv %s2538_s9  ;;  %v797_v11 = vstv %s2545_s13  ;;  %v951_v14 = vstv %s2552_s18  ;;  %s3266_s7 = sld [smem:[#allocation7 + $0x7]]  ;;  %s3275_s8 = sld [smem:[#allocation7 + $0x8]] }
  0x60   : > { %v318_v51 = vadd.s32 4294967295, %v3084_v55  ;;  %v3244_v56 = vadd.s32 4294967294, %v3028_v37  ;;  %s3288_s9 = sld [smem:[#allocation7 + $0x2]]  ;;  %s3294_s13 = sld [smem:[#allocation7 + $0x13]]  ;;  %vm5263_vm4 = vcmask 1031168   ;;  %v398_v32 = vadd.s32 3, %v3030_v38 }
  0x61   : > { %241 = vrot.lane.b32.xlu0 %v220_v28, %s2836_s19  ;;  %s3300_s18 = sld [smem:[#allocation7 + $0x9]] }
  0x62   : > { %vm321_vm10 = vcmp.ge.s32.totalorder %v318_v51, 0  ;;  %vm324_vm11 = vcmp.lt.s32.totalorder %v318_v51, 16  ;;  %vm5251_vm12 = vcmp.ge.s32.totalorder %v3244_v56, 0 }
  0x63   : > { %254 = vrot.lane.b32.xlu1 %v236_v31, %s2836_s19  ;;  %s2842_s19 = smov 125   ;;  %vm3269_vm15 = vmand %vm321_vm10, %vm324_vm11 }
  0xcf   : > { %v240_v41 = vpop.permute.xlu0 %239 }
  0xd0   : > { %v3037_v42 = vsel %vm243_vm1, 0.0, %v240_v41 }
  0xd1   : > { %5381 = vst [vmem:[#allocation12_spill] sm:$0xff] %v3037_v42  ;;  %328 = vrot.lane.b32.xlu1 %v3037_v42, %s2837_s24  ;;  %301 = vrot.lane.b32.xlu0 %v3037_v42, %s2838_s12  ;;  %v3043_v43 = vpop.permute.xlu1 %252  ;;  %v525_v63 = vmul.f32 %v524_v61, %v3037_v42  ;;  %v596_v0 = vmul.f32 %v3126_v62, %v3037_v42  ;;  %v3152_v9 = vsel %vm275_vm2, %v3037_v42, 0.0 }
  0xd2   : > { %v3047_v44 = vsel %vm243_vm1, 0.0, %v3043_v43  ;;  %v864_v3 = vmul.f32 %v3135_v1, %v3037_v42  ;;  %v709_v4 = vmul.f32 %v708_v2, %v3037_v42  ;;  %v1174_v7 = vmul.f32 %v3142_v5, %v3037_v42 }
  0xd3   : > { %5382 = vst [vmem:[#allocation13_spill] sm:$0xff] %v3047_v44  ;;  %v242_v45 = vpop.permute.xlu0 %241  ;;  %v3053_v46 = vsel %vm275_vm2, %v3047_v44, 0.0  ;;  %v1019_v8 = vmul.f32 %v1018_v6, %v3037_v42  ;;  %v642_v12 = vmul.f32 %v641_v10, %v3152_v9  ;;  %v798_v13 = vmul.f32 %v797_v11, %v3152_v9 }
  0xd4   : > { %v3056_v48 = vsel %vm243_vm1, %v240_v41, %v242_v45  ;;  %v3076_v52 = vsel %vm243_vm1, %v242_v45, 0.0  ;;  %v952_v15 = vmul.f32 %v951_v14, %v3152_v9  ;;  %v1108_v16 = vmul.f32 %v3078_v53, %v3152_v9 }
  0xd5   : > { %5383 = vst [vmem:[#allocation14_spill] sm:$0xff] %v3056_v48  ;;  %382 = vrot.lane.b32.xlu1 %v3037_v42, %s2839_s21  ;;  %355 = vrot.lane.b32.xlu0 %v3037_v42, %s2840_s22  ;;  %v3069_v50 = vsel %vm3062_vm5, %v3056_v48, 0.0  ;;  %5386 = vst [vmem:[#allocation15_spill] sm:$0xff] %v3076_v52  ;;  %v3110_v58 = vsel %vm3099_vm8, %v3076_v52, 0.0  ;;  %v255_v17 = vpop.permute.xlu1 %254  ;;  %v1262_v19 = vmul.f32 %v3112_v59, %v3152_v9 }
  0xd6   : > { %v3082_v54 = vmul.f32 %v3078_v53, %v3069_v50  ;;  %v3120_v60 = vmul.f32 %v3112_v59, %v3110_v58  ;;  %v3166_v18 = vsel %vm243_vm1, %v255_v17, 0.0  ;;  %v3175_v20 = vsel %vm243_vm1, %v3043_v43, %v255_v17 }
  0xd7   : > { %5390 = vst [vmem:[#allocation17_spill] sm:$0xff] %v3166_v18  ;;  %v526_v21 = vmul.f32 %v524_v61, %v3056_v48  ;;  %v527_v22 = vmul.f32 %v524_v61, %v3076_v52  ;;  %v598_v23 = vmul.f32 %v3126_v62, %v3076_v52  ;;  %v597_v24 = vmul.f32 %v3126_v62, %v3056_v48 }
  0xd8   : > { %5389 = vst [vmem:[#allocation16_spill] sm:$0xff] %v3120_v60  ;;  %v711_v25 = vmul.f32 %v708_v2, %v3076_v52  ;;  %v710_v26 = vmul.f32 %v708_v2, %v3056_v48  ;;  %v865_v27 = vmul.f32 %v3135_v1, %v3056_v48  ;;  %v866_v28 = vmul.f32 %v3135_v1, %v3076_v52 }
  0xd9   : > { %409 = vrot.lane.b32.xlu0 %v3037_v42, %s2841_s26  ;;  %303 = vrot.lane.b32.xlu1 %v3056_v48, %s2838_s12  ;;  %v1021_v29 = vmul.f32 %v1018_v6, %v3076_v52  ;;  %v1020_v30 = vmul.f32 %v1018_v6, %v3056_v48  ;;  %v1175_v31 = vmul.f32 %v3142_v5, %v3056_v48  ;;  %v289_v61 = vadd.s32 4294967294, %v3084_v55 }
  0xda   : > { %v1176_v33 = vmul.f32 %v3142_v5, %v3076_v52  ;;  %v643_v34 = vmul.f32 %v641_v10, %v3069_v50  ;;  %v644_v35 = vmul.f32 %v641_v10, %v3110_v58  ;;  %v800_v36 = vmul.f32 %v797_v11, %v3110_v58 }
  0xdb   : > { %v799_v39 = vmul.f32 %v797_v11, %v3069_v50  ;;  %v953_v40 = vmul.f32 %v951_v14, %v3069_v50  ;;  %v954_v45 = vmul.f32 %v951_v14, %v3110_v58  ;;  %v1110_v47 = vmul.f32 %v3078_v53, %v3110_v58 }
  0xdc   : > { %v1263_v53 = vmul.f32 %v3112_v59, %v3069_v50  ;;  %vm292_vm13 = vcmp.ge.s32.totalorder %v289_v61, 0  ;;  %vm295_vm14 = vcmp.lt.s32.totalorder %v289_v61, 16  ;;  %v372_v10 = vadd.s32 2, %v3084_v55 }
  0xdd   : > { %305 = vrot.lane.b32.xlu0 %v3076_v52, %s2838_s12  ;;  %332 = vrot.lane.b32.xlu1 %v3076_v52, %s2837_s24  ;;  %vm3281_vm2 = vmand %vm292_vm13, %vm295_vm14  ;;  %v3291_v11 = vadd.s32 4294967295, %v3028_v37  ;;  %v3373_v61 = vstv %s3300_s18  ;;  %s3486_s18 = sld [smem:[#allocation7 + $0x1e]] }
  0xde   : > { %vm375_vm6 = vcmp.ge.s32.totalorder %v372_v10, 0  ;;  %vm378_vm7 = vcmp.lt.s32.totalorder %v372_v10, 16 }
  0xdf   : > { %vm5261_vm10 = vcmp.ge.s32.totalorder %v3291_v11, 0 }
  0xe1   : > { %330 = vrot.lane.b32.xlu0 %v3056_v48, %s2837_s24  ;;  %357 = vrot.lane.b32.xlu1 %v3056_v48, %s2840_s22 }
  0xe5   : > { %359 = vrot.lane.b32.xlu0 %v3076_v52, %s2840_s22  ;;  %386 = vrot.lane.b32.xlu1 %v3076_v52, %s2839_s21 }
  0xe9   : > { %384 = vrot.lane.b32.xlu0 %v3056_v48, %s2839_s21  ;;  %411 = vrot.lane.b32.xlu1 %v3056_v48, %s2841_s26 }
  0xed   : > { %413 = vrot.lane.b32.xlu0 %v3076_v52, %s2841_s26  ;;  %429 = vrot.lane.b32.xlu1 %v3047_v44, %s2838_s12 }
  0xf1   : > { %443 = vrot.lane.b32.xlu0 %v3047_v44, %s2837_s24  ;;  %457 = vrot.lane.b32.xlu1 %v3047_v44, %s2840_s22 }
  0xf5   : > { %471 = vrot.lane.b32.xlu0 %v3047_v44, %s2839_s21  ;;  %485 = vrot.lane.b32.xlu1 %v3047_v44, %s2841_s26 }
  0xf9   : > { %531 = vrot.lane.b32.xlu0 %v525_v63, %s2842_s19  ;;  %602 = vrot.lane.b32.xlu1 %v596_v0, %s2842_s19  ;;  %v288_v0 = vadd.s32 4294967294, %v3030_v38 }
  0xfb   : > { %vm291_vm1 = vcmp.ge.s32.totalorder %v288_v0, 0  ;;  %vm294_vm3 = vcmp.lt.s32.totalorder %v288_v0, 16 }
  0xfc   : > { %vm3329_vm14 = vmand %vm291_vm1, %vm294_vm3 }
  0xfd   : > { %870 = vrot.lane.b32.xlu0 %v864_v3, %s2843_s27  ;;  %715 = vrot.lane.b32.xlu1 %v709_v4, %s2843_s27  ;;  %vm3345_vm1 = vmand %vm375_vm6, %vm378_vm7 }
 0x101   : > { %1180 = vrot.lane.b32.xlu0 %v1174_v7, %s2844_s28  ;;  %1025 = vrot.lane.b32.xlu1 %v1019_v8, %s2844_s28 }
 0x105   : > { %648 = vrot.lane.b32.xlu0 %v642_v12, %s2845_s29  ;;  %804 = vrot.lane.b32.xlu1 %v798_v13, %s2845_s29  ;;  %v345_v12 = vadd.s32 1, %v3084_v55 }
 0x107   : > { %vm348_vm11 = vcmp.ge.s32.totalorder %v345_v12, 0  ;;  %vm351_vm13 = vcmp.lt.s32.totalorder %v345_v12, 16 }
 0x108   : > { %vm3358_vm3 = vmand %vm348_vm11, %vm351_vm13 }
 0x109   : > { %958 = vrot.lane.b32.xlu0 %v952_v15, %s2846_s30  ;;  %1114 = vrot.lane.b32.xlu1 %v1108_v16, %s2846_s30 }
 0x10d   : > { %1268 = vrot.lane.b32.xlu0 %v1262_v19, %s2847_s4  ;;  %433 = vrot.lane.b32.xlu1 %v3166_v18, %s2838_s12  ;;  %v317_v19 = vadd.s32 4294967295, %v3030_v38 }
 0x10f   : > { %vm320_vm0 = vcmp.ge.s32.totalorder %v317_v19, 0 }
 0x111   : > { %431 = vrot.lane.b32.xlu0 %v3175_v20, %s2838_s12  ;;  %445 = vrot.lane.b32.xlu1 %v3175_v20, %s2837_s24  ;;  %s2525_s12 = sld [smem:[#allocation7 + $0x1]] }
 0x115   : > { %447 = vrot.lane.b32.xlu0 %v3166_v18, %s2837_s24  ;;  %461 = vrot.lane.b32.xlu1 %v3166_v18, %s2840_s22  ;;  %s499_s24 = sld [smem:[#allocation7]] }
 0x117   : > { %v3264_v3 = vstv %s2525_s12  ;;  %s3325_s12 = sld [smem:[#allocation7 + $0x17]] }
 0x119   : > { %459 = vrot.lane.b32.xlu0 %v3175_v20, %s2840_s22  ;;  %473 = vrot.lane.b32.xlu1 %v3175_v20, %s2839_s21  ;;  %s2540_s22 = sld [smem:[#allocation7 + $0x10]] }
 0x11b   : > { %v3262_v59 = vstv %s499_s24  ;;  %s3318_s24 = sld [smem:[#allocation7 + $0x12]] }
 0x11c   : > { %v501_v13 = vmul.f32 %v3262_v59, %v3152_v9 }
 0x11d   : > { %475 = vrot.lane.b32.xlu0 %v3166_v18, %s2839_s21  ;;  %489 = vrot.lane.b32.xlu1 %v3166_v18, %s2841_s26  ;;  %s2560_s21 = sld [smem:[#allocation7 + $0x24]] }
 0x11f   : > { %v3285_v8 = vstv %s2540_s22  ;;  %s3401_s22 = sld [smem:[#allocation7 + $0x14]] }
 0x121   : > { %487 = vrot.lane.b32.xlu0 %v3175_v20, %s2841_s26  ;;  %533 = vrot.lane.b32.xlu1 %v526_v21, %s2842_s19  ;;  %s3253_s26 = sld [smem:[#allocation7 + $0xf]] }
 0x123   : > { %v3273_v5 = vstv %s2560_s21  ;;  %s3399_s21 = sld [smem:[#allocation7 + $0x19]] }
 0x124   : > { %5393 = vst [vmem:[#allocation18_spill] sm:$0xff] %v3273_v5 }
 0x125   : > { %535 = vrot.lane.b32.xlu0 %v527_v22, %s2842_s19  ;;  %606 = vrot.lane.b32.xlu1 %v598_v23, %s2842_s19 }
 0x127   : > { %v3303_v17 = vstv %s3253_s26  ;;  %s3429_s26 = sld [smem:[#allocation7 + $0x1b]] }
 0x129   : > { %604 = vrot.lane.b32.xlu0 %v597_v24, %s2842_s19  ;;  %719 = vrot.lane.b32.xlu1 %v711_v25, %s2843_s27 }
 0x12d   : > { %717 = vrot.lane.b32.xlu0 %v710_v26, %s2843_s27  ;;  %872 = vrot.lane.b32.xlu1 %v865_v27, %s2843_s27  ;;  %v3499_v42 = vstv %s3429_s26  ;;  %s2556_s26 = sld [smem:[#allocation7 + $0x20]] }
 0x12e   : > { %5416 = vst [vmem:[#allocation29_spill] sm:$0xff] %v3499_v42 }
 0x131   : > { %874 = vrot.lane.b32.xlu0 %v866_v28, %s2843_s27  ;;  %1029 = vrot.lane.b32.xlu1 %v1021_v29, %s2844_s28 }
 0x135   : > { %1027 = vrot.lane.b32.xlu0 %v1020_v30, %s2844_s28  ;;  %1182 = vrot.lane.b32.xlu1 %v1175_v31, %s2844_s28  ;;  %v3338_v30 = vstv %s3266_s7  ;;  %s3437_s7 = sld [smem:[#allocation7 + $0x16]] }
 0x136   : > { %v573_v60 = vmul.f32 %v3338_v30, %v3069_v50 }
 0x139   : > { %1184 = vrot.lane.b32.xlu0 %v1176_v33, %s2844_s28  ;;  %650 = vrot.lane.b32.xlu1 %v643_v34, %s2845_s29  ;;  %v5401_v34 = vmov 0 }
 0x13a   : > { %v5402_v34 = vsel %vm3345_vm1, 4294967295, %v5401_v34 }
 0x13b   : > { %5403 = vst [vmem:[#allocation22_spill] sm:$0xff] %v5402_v34 }
 0x13d   : > { %652 = vrot.lane.b32.xlu0 %v644_v35, %s2845_s29  ;;  %808 = vrot.lane.b32.xlu1 %v800_v36, %s2845_s29  ;;  %v3350_v35 = vstv %s3275_s8  ;;  %s3452_s8 = sld [smem:[#allocation7 + $0x1a]] }
 0x141   : > { %806 = vrot.lane.b32.xlu0 %v799_v39, %s2845_s29  ;;  %960 = vrot.lane.b32.xlu1 %v953_v40, %s2846_s30  ;;  %v5404_v39 = vmov 0  ;;  %v516_v40 = vstv %s3288_s9  ;;  %s3471_s9 = sld [smem:[#allocation7 + $0x1d]] }
 0x142   : > { %v5405_v39 = vsel %vm3358_vm3, 4294967295, %v5404_v39 }
 0x143   : > { %v3235_v41 = vpop.permute.xlu1 %328  ;;  %v302_v43 = vpop.permute.xlu0 %301  ;;  %5406 = vst [vmem:[#allocation23_spill] sm:$0xff] %v5405_v39 }
 0x145   : > { %962 = vrot.lane.b32.xlu0 %v954_v45, %s2846_s30  ;;  %1118 = vrot.lane.b32.xlu1 %v1110_v47, %s2846_s30  ;;  %v3368_v45 = vstv %s3294_s13  ;;  %v399_v47 = vadd.s32 3, %v3084_v55  ;;  %s3484_s13 = sld [smem:[#allocation7 + $0x21]] }
 0x147   : > { %v3247_v62 = vpop.permute.xlu1 %382  ;;  %v3249_v63 = vpop.permute.xlu0 %355  ;;  %vm402_vm7 = vcmp.ge.s32.totalorder %v399_v47, 0  ;;  %vm405_vm11 = vcmp.lt.s32.totalorder %v399_v47, 16  ;;  %v502_v47 = vmul.f32 %v3262_v59, %v3069_v50 }
 0x149   : > { %1116 = vrot.lane.b32.xlu0 %v3082_v54, %s2846_s30  ;;  %1270 = vrot.lane.b32.xlu1 %v1263_v53, %s2847_s4 }
 0x14b   : > { %v304_v1 = vpop.permute.xlu1 %303  ;;  %v3260_v2 = vpop.permute.xlu0 %409 }
 0x14c   : > { %v308_v54 = vsel %vm5262_vm9, %v302_v43, %v304_v1 }
 0x14d   : > { %v3279_v6 = vsel %vm5251_vm12, %v308_v54, 0.0  ;;  %vm323_vm12 = vcmp.lt.s32.totalorder %v317_v19, 16 }
 0x14e   : > { %v509_v14 = vmul.f32 %v3264_v3, %v3279_v6  ;;  %v3308_v21 = vmul.f32 %v3273_v5, %v3279_v6  ;;  %vm3407_vm6 = vmand %vm320_vm0, %vm323_vm12 }
 0x14f   : > { %v333_v15 = vpop.permute.xlu1 %332  ;;  %v306_v16 = vpop.permute.xlu0 %305  ;;  %vm3443_vm0 = vmand %vm402_vm7, %vm405_vm11  ;;  %vm388_vm7 = vcmask 1006592   ;;  %vm5288_vm11 = vcmask 998400  }
 0x150   : > { %5396 = vst [vmem:[#allocation19_spill] sm:$0xff] %v3308_v21  ;;  %v3312_v22 = vsel %vm3269_vm15, %v333_v15, 0.0  ;;  %v3316_v23 = vsel %vm3281_vm2, %v306_v16, 0.0  ;;  %v512_v24 = vadd.f32 %v509_v14, %v501_v13  ;;  %v309_v31 = vsel %vm5262_vm9, %v304_v1, %v306_v16 }
 0x151   : > { %5397 = vst [vmem:[#allocation20_spill] sm:$0xff] %v3312_v22  ;;  %5398 = vst [vmem:[#allocation21_spill] sm:$0xff] %v3316_v23  ;;  %v689_v25 = vmul.f32 %v3285_v8, %v3312_v22  ;;  %v667_v26 = vmul.f32 %v3303_v17, %v3316_v23  ;;  %v582_v43 = vmul.f32 %v3350_v35, %v3316_v23  ;;  %v3377_v53 = vsel %vm3329_vm14, %v309_v31, 0.0 }
 0x152   : > { %v3382_v1 = vadd.s32 1, %v3030_v38  ;;  %v3397_v13 = vstv %s3318_s24  ;;  %v510_v19 = vmul.f32 %v3264_v3, %v3377_v53  ;;  %s3501_s24 = sld [smem:[#allocation7 + $0x25]]  ;;  %vm5286_vm9 = vcmask 1014784  }
 0x153   : > { %v3333_v28 = vpop.permute.xlu1 %357  ;;  %697 = vrot.lane.b32.xlu0 %v689_v25, %s2845_s29  ;;  %675 = vrot.lane.b32.xlu1 %v667_v26, %s2845_s29  ;;  %v331_v29 = vpop.permute.xlu0 %330 }
 0x154   : > { %v335_v33 = vsel %vm5263_vm4, %v3235_v41, %v331_v29  ;;  %v574_v41 = vmul.f32 %v3338_v30, %v3110_v58  ;;  %v336_v25 = vsel %vm5263_vm4, %v331_v29, %v333_v15  ;;  %vm347_vm12 = vcmp.ge.s32.totalorder %v3382_v1, 0 }
 0x155   : > { %v3354_v36 = vsel %vm5261_vm10, %v335_v33, 0.0  ;;  %v590_v33 = vmul.f32 %v3373_v61, %v3312_v22  ;;  %vm350_vm13 = vcmp.lt.s32.totalorder %v3382_v1, 16  ;;  %v362_v7 = vsel %vm5286_vm9, %v3249_v63, %v3333_v28 }
 0x156   : > { %v517_v51 = vmul.f32 %v516_v40, %v3354_v36  ;;  %v585_v10 = vadd.f32 %v582_v43, %v574_v41  ;;  %v3419_v41 = vstv %s3325_s12  ;;  %v3435_v43 = vsel %vm3407_vm6, %v336_v25, 0.0  ;;  %s3510_s12 = sld [smem:[#allocation7 + $0x27]]  ;;  %vm3533_vm4 = vmand %vm347_vm12, %vm350_vm13 }
 0x157   : > { %v3379_v0 = vpop.permute.xlu1 %386  ;;  %v3384_v54 = vpop.permute.xlu0 %359  ;;  %v511_v25 = vmul.f32 %v3264_v3, %v3316_v23  ;;  %v518_v48 = vmul.f32 %v516_v40, %v3435_v43  ;;  %v3466_v3 = vstv %s3399_s21  ;;  %s3512_s21 = sld [smem:[#allocation7 + $0x29]]  ;;  %vm5421_vm12 = vcmp.lt.s32.totalorder %v398_v32, 16 }
 0x158   : > { %v3389_v55 = vsel %vm3345_vm1, %v3379_v0, 0.0  ;;  %v3394_v12 = vsel %vm3358_vm3, %v3384_v54, 0.0  ;;  %v3403_v14 = vadd.f32 %v517_v51, %v512_v24  ;;  %v3431_v29 = vadd.f32 %v590_v33, %v585_v10 }
 0x159   : > { %v756_v26 = vmul.f32 %v3368_v45, %v3389_v55  ;;  %v734_v31 = vmul.f32 %v3397_v13, %v3394_v12  ;;  %v844_v51 = vmul.f32 %v3419_v41, %v3312_v22  ;;  %v503_v10 = vmul.f32 %v3262_v59, %v3110_v58 }
 0x15a   : > { %5409 = vst [vmem:[#allocation24_spill] sm:$0xff] %v3431_v29  ;;  %v580_v58 = vmul.f32 %v3350_v35, %v3279_v6  ;;  %v363_v1 = vsel %vm5286_vm9, %v3333_v28, %v3384_v54  ;;  %vm5422_vm13 = vcmp.ge.s32.totalorder %v398_v32, 0  ;;  %v687_v28 = vmul.f32 %v3285_v8, %v3354_v36 }
 0x15b   : > { %v3423_v24 = vpop.permute.xlu1 %411  ;;  %764 = vrot.lane.b32.xlu1 %v756_v26, %s2845_s29  ;;  %742 = vrot.lane.b32.xlu0 %v734_v31, %s2845_s29  ;;  %v3427_v15 = vpop.permute.xlu0 %384  ;;  %v5410_v26 = vmov 0  ;;  %v513_v31 = vadd.f32 %v510_v19, %v502_v47  ;;  %v514_v39 = vadd.f32 %v511_v25, %v503_v10  ;;  %v3469_v19 = vstv %s3401_s22  ;;  %s3522_s22 = sld [smem:[#allocation7 + $0x28]]  ;;  %vm3554_vm10 = vmand %vm5422_vm13, %vm5421_vm12 }
 0x15c   : > { %v5411_v26 = vsel %vm3443_vm0, 4294967295, %v5410_v26  ;;  %v519_v47 = vmul.f32 %v516_v40, %v3312_v22  ;;  %v572_v25 = vmul.f32 %v3338_v30, %v3152_v9  ;;  %vm5453_vm9 = vcmask 1039360  }
 0x15d   : > { %5412 = vst [vmem:[#allocation25_spill] sm:$0xff] %v5411_v26  ;;  %v3482_v26 = vadd.s32 2, %v3028_v37  ;;  %v3488_v40 = vadd.f32 %v518_v48, %v513_v31  ;;  %v581_v48 = vmul.f32 %v3350_v35, %v3377_v53  ;;  %v3508_v31 = vstv %s3437_s7  ;;  %s2570_s7 = sld [smem:[#allocation7 + $0x2e]] }
 0x15e   : > { %v3490_v44 = vadd.f32 %v519_v47, %v514_v39  ;;  %v583_v39 = vadd.f32 %v580_v58, %v572_v25  ;;  %v588_v47 = vmul.f32 %v3373_v61, %v3354_v36  ;;  %v822_v30 = vmul.f32 %v3508_v31, %v3316_v23 }
 0x15f   : > { %v3454_v33 = vpop.permute.xlu1 %429  ;;  %852 = vrot.lane.b32.xlu1 %v844_v51, %s2845_s29  ;;  %v414_v34 = vpop.permute.xlu0 %413  ;;  %v888_v51 = vmul.f32 %v3466_v3, %v3394_v12  ;;  %5414 = vst [vmem:[#allocation27_spill] sm:$0xff] %v3488_v40  ;;  %v584_v35 = vadd.f32 %v581_v48, %v573_v60  ;;  %v3525_v58 = vstv %s3452_s8  ;;  %vm5428_vm12 = vcmp.lt.s32.totalorder %v3482_v26, 16  ;;  %s2558_s8 = sld [smem:[#allocation7 + $0x22]] }
 0x160   : > { %v3463_v59 = vsel %vm3443_vm0, %v414_v34, 0.0  ;;  %5415 = vst [vmem:[#allocation28_spill] sm:$0xff] %v3490_v44  ;;  %v910_v32 = vmul.f32 %v3525_v58, %v3389_v55  ;;  %vm5457_vm1 = vcmp.ge.s32.totalorder %v3291_v11, 0 }
 0x161   : > { %5413 = vst [vmem:[#allocation26_spill] sm:$0xff] %v3463_v59  ;;  %v778_v10 = vmul.f32 %v3469_v19, %v3463_v59  ;;  %v932_v50 = vmul.f32 %v3499_v42, %v3463_v59 }
 0x163   : > { %v3492_v52 = vpop.permute.xlu1 %457  ;;  %896 = vrot.lane.b32.xlu1 %v888_v51, %s2845_s29  ;;  %786 = vrot.lane.b32.xlu0 %v778_v10, %s2845_s29  ;;  %v3496_v9 = vpop.permute.xlu0 %443  ;;  %v589_v51 = vmul.f32 %v3373_v61, %v3435_v43  ;;  %v3527_v10 = vadd.f32 %v588_v47, %v583_v39  ;;  %v389_v39 = vsel %vm388_vm7, %v3247_v62, %v3427_v15  ;;  %v3568_v62 = vstv %s3484_s13  ;;  %s2574_s13 = sld [smem:[#allocation7 + $0x32]] }
 0x164   : > { %5426 = vst [vmem:[#allocation33_spill] sm:$0xff] %v3568_v62  ;;  %v3631_v29 = vstv %s2570_s7  ;;  %s3763_s7 = sld [smem:[#allocation7 + $0xc]] }
 0x165   : > { %5417 = vst [vmem:[#allocation30_spill] sm:$0xff] %v3527_v10  ;;  %v3544_v48 = vadd.f32 %v589_v51, %v584_v35  ;;  %v3561_v51 = vstv %s3471_s9  ;;  %v3579_v35 = vsel %vm5428_vm12, %v389_v39, 0.0  ;;  %v3598_v10 = vstv %s3512_s21  ;;  %5440 = vst [vmem:[#allocation46_spill] sm:$0xff] %v3631_v29  ;;  %s2581_s9 = sld [smem:[#allocation7 + $0x39]]  ;;  %s3711_s21 = sld [smem:[#allocation7 + $0x3a]] }
 0x166   : > { %5425 = vst [vmem:[#allocation32_spill] sm:$0xff] %v3561_v51  ;;  %v977_v54 = vmul.f32 %v3561_v51, %v3316_v23  ;;  %5432 = vst [vmem:[#allocation38_spill] sm:$0xff] %v3598_v10  ;;  %v1066_v39 = vmul.f32 %v3568_v62, %v3389_v55  ;;  %vm5452_vm12 = vcmask 1031168  }
 0x167   : > { %v3538_v60 = vpop.permute.xlu1 %485  ;;  %940 = vrot.lane.b32.xlu1 %v932_v50, %s2845_s29  ;;  %830 = vrot.lane.b32.xlu0 %v822_v30, %s2845_s29  ;;  %v3542_v25 = vpop.permute.xlu0 %471  ;;  %5420 = vst [vmem:[#allocation31_spill] sm:$0xff] %v3544_v48  ;;  %v417_v50 = vsel %vm5288_vm11, %v3423_v24, %v414_v34  ;;  %v3571_v30 = vstv %s3486_s18  ;;  %v3575_v34 = vsel %vm3533_vm4, %v363_v1, 0.0  ;;  %v3592_v48 = vstv %s3501_s24  ;;  %s2580_s18 = sld [smem:[#allocation7 + $0x38]]  ;;  %s2573_s24 = sld [smem:[#allocation7 + $0x31]]  ;;  %vm5454_vm11 = vmmov %vm5453_vm9 }
 0x168   : > { %5427 = vst [vmem:[#allocation34_spill] sm:$0xff] %v3571_v30  ;;  %v3583_v21 = vsel %vm3554_vm10, %v417_v50, 0.0  ;;  %5430 = vst [vmem:[#allocation36_spill] sm:$0xff] %v3592_v48  ;;  %v3595_v1 = vstv %s3510_s12  ;;  %v999_v50 = vmul.f32 %v3571_v30, %v3312_v22  ;;  %s3709_s12 = sld [smem:[#allocation7 + $0x4]]  ;;  %v733_v63 = vmul.f32 %v3397_v13, %v3575_v34 }
 0x169   : > { %5431 = vst [vmem:[#allocation37_spill] sm:$0xff] %v3595_v1  ;;  %v3621_v62 = vmul.f32 %v3598_v10, %v3583_v21 }
 0x16b   : > { %v3585_v51 = vpop.permute.xlu1 %602  ;;  %985 = vrot.lane.b32.xlu1 %v977_v54, %s2846_s30  ;;  %918 = vrot.lane.b32.xlu0 %v910_v32, %s2845_s29  ;;  %v3589_v42 = vpop.permute.xlu0 %531  ;;  %v3609_v54 = vmul.f32 %v3592_v48, %v3435_v43  ;;  %v3613_v32 = vmul.f32 %v3595_v1, %v3575_v34  ;;  %5437 = vst [vmem:[#allocation43_spill] sm:$0xff] %v3621_v62 }
 0x16c   : > { %5429 = vst [vmem:[#allocation35_spill] sm:$0xff] %v3585_v51  ;;  %v3605_v51 = vstv %s3522_s22  ;;  %v3639_v62 = vmul.f32 %v3631_v29, %v3394_v12  ;;  %s3724_s22 = sld [smem:[#allocation7 + $0xb]] }
 0x16d   : > { %5433 = vst [vmem:[#allocation39_spill] sm:$0xff] %v3605_v51  ;;  %5434 = vst [vmem:[#allocation40_spill] sm:$0xff] %v3609_v54  ;;  %v3617_v40 = vmul.f32 %v3605_v51, %v3579_v35  ;;  %v3629_v54 = vstv %s2556_s26  ;;  %v3694_v29 = vstv %s2580_s18  ;;  %s3761_s26 = sld [smem:[#allocation7 + $0x5]]  ;;  %s2567_s18 = sld [smem:[#allocation7 + $0x2b]] }
 0x16e   : > { %5435 = vst [vmem:[#allocation41_spill] sm:$0xff] %v3613_v32  ;;  %v1154_v32 = vmul.f32 %v3592_v48, %v3312_v22  ;;  %5441 = vst [vmem:[#allocation47_spill] sm:$0xff] %v3639_v62  ;;  %v1220_v62 = vmul.f32 %v3605_v51, %v3389_v55  ;;  %v547_v4 = vstv %s3709_s12  ;;  %s2569_s12 = sld [smem:[#allocation7 + $0x2d]] }
 0x16f   : > { %5436 = vst [vmem:[#allocation42_spill] sm:$0xff] %v3617_v40  ;;  %v3623_v44 = vpop.permute.xlu1 %715  ;;  %1074 = vrot.lane.b32.xlu1 %v1066_v39, %s2846_s30  ;;  %1007 = vrot.lane.b32.xlu0 %v999_v50, %s2846_s30  ;;  %v3627_v30 = vpop.permute.xlu0 %870  ;;  %v1044_v40 = vmul.f32 %v3629_v54, %v3394_v12  ;;  %v3647_v50 = vstv %s2558_s8  ;;  %s3802_s8 = sld [smem:[#allocation7 + $0x6]] }
 0x170   : > { %5438 = vst [vmem:[#allocation44_spill] sm:$0xff] %v3623_v44  ;;  %5439 = vst [vmem:[#allocation45_spill] sm:$0xff] %v3627_v30  ;;  %v1198_v30 = vmul.f32 %v3595_v1, %v3394_v12  ;;  %v1088_v22 = vmul.f32 %v3647_v50, %v3463_v59 }
 0x171   : > { %5444 = vst [vmem:[#allocation50_spill] sm:$0xff] %v3647_v50 }
 0x173   : > { %v3641_v44 = vpop.permute.xlu1 %1025  ;;  %1162 = vrot.lane.b32.xlu1 %v1154_v32, %s2846_s30  ;;  %1052 = vrot.lane.b32.xlu0 %v1044_v40, %s2846_s30  ;;  %v3645_v39 = vpop.permute.xlu0 %1180  ;;  %v1242_v40 = vmul.f32 %v3598_v10, %v3463_v59 }
 0x174   : > { %5442 = vst [vmem:[#allocation48_spill] sm:$0xff] %v3641_v44  ;;  %5443 = vst [vmem:[#allocation49_spill] sm:$0xff] %v3645_v39  ;;  %v1132_v44 = vmul.f32 %v3273_v5, %v3316_v23  ;;  %v688_v23 = vmul.f32 %v3285_v8, %v3435_v43  ;;  %v390_v8 = vsel %vm388_vm7, %v3427_v15, %v3379_v0 }
 0x175   : > { %v754_v15 = vmul.f32 %v3368_v45, %v3579_v35 }
 0x177   : > { %v3653_v48 = vpop.permute.xlu1 %804  ;;  %1206 = vrot.lane.b32.xlu1 %v1198_v30, %s2846_s30  ;;  %1096 = vrot.lane.b32.xlu0 %v1088_v22, %s2846_s30  ;;  %v3657_v32 = vpop.permute.xlu0 %648  ;;  %v371_v22 = vadd.s32 2, %v3030_v38 }
 0x178   : > { %5445 = vst [vmem:[#allocation51_spill] sm:$0xff] %v3653_v48  ;;  %5446 = vst [vmem:[#allocation52_spill] sm:$0xff] %v3657_v32  ;;  %v665_v32 = vmul.f32 %v3303_v17, %v3279_v6  ;;  %v3677_v48 = vsel %vm3099_vm8, %v3166_v18, 0.0  ;;  %v3696_v18 = vstv %s2573_s24  ;;  %s2568_s24 = sld [smem:[#allocation7 + $0x2c]] }
 0x179   : > { %5449 = vst [vmem:[#allocation55_spill] sm:$0xff] %v3677_v48  ;;  %vm374_vm13 = vcmp.ge.s32.totalorder %v371_v22, 0  ;;  %vm377_vm8 = vcmp.lt.s32.totalorder %v371_v22, 16  ;;  %v1420_v10 = vmul.f32 %v3696_v18, %v3677_v48  ;;  %v3759_v22 = vadd.s32 3, %v3028_v37 }
 0x17b   : > { %v3663_v39 = vpop.permute.xlu1 %1114  ;;  %1250 = vrot.lane.b32.xlu1 %v1242_v40, %s2846_s30  ;;  %1140 = vrot.lane.b32.xlu0 %v1132_v44, %s2846_s30  ;;  %v3667_v30 = vpop.permute.xlu0 %958  ;;  %v3682_v40 = vadd.s32 1, %v3028_v37 }
 0x17c   : > { %5447 = vst [vmem:[#allocation53_spill] sm:$0xff] %v3663_v39  ;;  %5448 = vst [vmem:[#allocation54_spill] sm:$0xff] %v3667_v30  ;;  %v3679_v39 = vstv %s2581_s9  ;;  %v3688_v30 = vstv %s2574_s13  ;;  %s3847_s9 = sld [smem:[#allocation7 + $0xd]]  ;;  %s2575_s13 = sld [smem:[#allocation7 + $0x33]] }
 0x17f   : > { %v434_v44 = vpop.permute.xlu1 %433  ;;  %671 = vrot.lane.b32.xlu1 %v665_v32, %s2845_s29  ;;  %1228 = vrot.lane.b32.xlu0 %v1220_v62, %s2846_s30  ;;  %v3686_v38 = vpop.permute.xlu0 %1268  ;;  %v666_v32 = vmul.f32 %v3303_v17, %v3377_v53  ;;  %v1490_v62 = vmul.f32 %v3694_v29, %v3677_v48 }
 0x180   : > { %5450 = vst [vmem:[#allocation56_spill] sm:$0xff] %v3686_v38  ;;  %v3692_v57 = vsel %vm3281_vm2, %v434_v44, 0.0  ;;  %vm3735_vm2 = vmand %vm374_vm13, %vm377_vm8  ;;  %vm5464_vm13 = vcmp.lt.s32.totalorder %v3482_v26, 16  ;;  %v1488_v26 = vmul.f32 %v3694_v29, %v3053_v46 }
 0x181   : > { %5451 = vst [vmem:[#allocation57_spill] sm:$0xff] %v3692_v57  ;;  %v1498_v38 = vmul.f32 %v3679_v39, %v3692_v57  ;;  %v1428_v17 = vmul.f32 %v3688_v30, %v3692_v57  ;;  %v3771_v11 = vsel %vm3735_vm2, %v390_v8, 0.0  ;;  %v3832_v8 = vstv %s3761_s26  ;;  %s2594_s26 = sld [smem:[#allocation7 + $0x46]] }
 0x182   : > { %v755_v49 = vmul.f32 %v3368_v45, %v3771_v11 }
 0x183   : > { %v446_v51 = vpop.permute.xlu1 %445  ;;  %695 = vrot.lane.b32.xlu1 %v688_v23, %s2845_s29  ;;  %673 = vrot.lane.b32.xlu0 %v666_v32, %s2845_s29  ;;  %v432_v1 = vpop.permute.xlu0 %431  ;;  %v1501_v48 = vadd.f32 %v1498_v38, %v1490_v62  ;;  %v3731_v50 = vadd.f32 %v1428_v17, %v1420_v10  ;;  %v3789_v38 = vsel %vm3062_vm5, %v3175_v20, 0.0  ;;  %v617_v62 = vstv %s3724_s22  ;;  %s2848_s22 = smov 29  }
 0x184   : > { %v449_v57 = vsel %vm5452_vm12, %v3496_v9, %v446_v51  ;;  %v435_v5 = vsel %vm5453_vm9, %v3454_v33, %v432_v1  ;;  %v436_v23 = vsel %vm5454_vm11, %v432_v1, %v434_v44  ;;  %vm5458_vm9 = vcmp.ge.s32.totalorder %v3244_v56, 0 }
 0x185   : > { %v3744_v9 = vsel %vm5457_vm1, %v449_v57, 0.0  ;;  %v3748_v33 = vsel %vm5458_vm9, %v435_v5, 0.0  ;;  %v3752_v10 = vsel %vm3329_vm14, %v436_v23, 0.0  ;;  %vm5459_vm11 = vcmp.lt.s32.totalorder %v3682_v40, 16  ;;  %vm5460_vm14 = vmmov %vm5452_vm12 }
 0x186   : > { %v3756_v1 = vsel %vm5459_vm11, %v362_v7, 0.0  ;;  %vm403_vm1 = vcmp.lt.s32.totalorder %v3759_v22, 16  ;;  %vm5462_vm5 = vcmask 1014784   ;;  %vm5466_vm8 = vmmov %vm5459_vm11  ;;  %vm964_vm12 = vcmask 523264  }
 0x187   : > { %v3765_v56 = vpop.permute.xlu1 %461  ;;  %740 = vrot.lane.b32.xlu1 %v733_v63, %s2845_s29  ;;  %693 = vrot.lane.b32.xlu0 %v687_v28, %s2845_s29  ;;  %v448_v5 = vpop.permute.xlu0 %447  ;;  %v732_v44 = vmul.f32 %v3397_v13, %v3756_v1  ;;  %v777_v63 = vmul.f32 %v3469_v19, %v3583_v21  ;;  %vm1031_vm9 = vcmask 498688   ;;  %vm1274_vm11 = vcmask 261120  }
 0x188   : > { %v450_v37 = vsel %vm5460_vm14, %v446_v51, %v448_v5  ;;  %v3776_v27 = vsel %vm3269_vm15, %v448_v5, 0.0  ;;  %v1503_v51 = vstv %s3711_s21  ;;  %vm5461_vm15 = vcmask 998400   ;;  %s2583_s21 = sld [smem:[#allocation7 + $0x3b]] }
 0x189   : > { %v3780_v0 = vsel %vm3407_vm6, %v450_v37, 0.0  ;;  %v416_v16 = vsel %vm5461_vm15, %v3260_v2, %v3423_v24  ;;  %v1506_v7 = vmul.f32 %v1503_v51, %v3776_v27  ;;  %vm5463_vm6 = vmmov %vm5462_vm5  ;;  %v3835_v5 = vstv %s3763_s7  ;;  %s2595_s7 = sld [smem:[#allocation7 + $0x47]] }
 0x18a   : > { %v1489_v37 = vmul.f32 %v3694_v29, %v3789_v38  ;;  %vm1341_vm14 = vcmask 236544  }
 0x18b   : > { %v474_v57 = vpop.permute.xlu1 %473  ;;  %760 = vrot.lane.b32.xlu1 %v754_v15, %s2845_s29  ;;  %738 = vrot.lane.b32.xlu0 %v732_v44, %s2845_s29  ;;  %v460_v13 = vpop.permute.xlu0 %459  ;;  %v3825_v23 = vadd.f32 %v1506_v7, %v1501_v48  ;;  %v820_v48 = vmul.f32 %v3508_v31, %v3279_v6  ;;  %v1496_v15 = vmul.f32 %v3679_v39, %v3748_v33 }
 0x18c   : > { %v477_v17 = vsel %vm388_vm7, %v3542_v25, %v474_v57  ;;  %v463_v2 = vsel %vm5462_vm5, %v3492_v52, %v460_v13  ;;  %v464_v24 = vsel %vm5463_vm6, %v460_v13, %v3765_v56  ;;  %v3829_v52 = vsel %vm403_vm1, %v416_v16, 0.0 }
 0x18d   : > { %v3815_v45 = vsel %vm5464_vm13, %v477_v17, 0.0  ;;  %v3819_v28 = vsel %vm5466_vm8, %v463_v2, 0.0  ;;  %v3823_v25 = vsel %vm3533_vm4, %v464_v24, 0.0  ;;  %5467 = vst [vmem:[#allocation59_spill] sm:$0xff] %v3825_v23  ;;  %5468 = vst [vmem:[#allocation60_spill] sm:$0xff] %v3829_v52  ;;  %vm537_vm4 = vcmask 1022976  }
 0x18e   : > { %5465 = vst [vmem:[#allocation58_spill] sm:$0xff] %v3815_v45  ;;  %v548_v16 = vmul.f32 %v547_v4, %v3756_v1  ;;  %v821_v13 = vmul.f32 %v3508_v31, %v3377_v53  ;;  %v776_v29 = vmul.f32 %v3469_v19, %v3829_v52  ;;  %v620_v17 = vmul.f32 %v617_v62, %v3394_v12 }
 0x18f   : > { %v3839_v40 = vpop.permute.xlu1 %489  ;;  %762 = vrot.lane.b32.xlu0 %v755_v49, %s2845_s29  ;;  %784 = vrot.lane.b32.xlu1 %v777_v63, %s2845_s29  ;;  %v3843_v61 = vpop.permute.xlu0 %475  ;;  %v1497_v49 = vmul.f32 %v3679_v39, %v3752_v10  ;;  %v549_v2 = vmul.f32 %v547_v4, %v3575_v34  ;;  %v550_v24 = vmul.f32 %v547_v4, %v3394_v12  ;;  %v563_v19 = vstv %s3802_s8  ;;  %s2596_s8 = sld [smem:[#allocation7 + $0x48]] }
 0x190   : > { %5469 = vst [vmem:[#allocation61_spill] sm:$0xff] %v3839_v40  ;;  %5470 = vst [vmem:[#allocation62_spill] sm:$0xff] %v3843_v61  ;;  %v478_v44 = vsel %vm388_vm7, %v474_v57, %v3843_v61  ;;  %v842_v57 = vmul.f32 %v3419_v41, %v3354_v36  ;;  %v843_v31 = vmul.f32 %v3419_v41, %v3435_v43 }
 0x191   : > { %v3862_v7 = vsel %vm3735_vm2, %v478_v44, 0.0  ;;  %v1499_v39 = vadd.f32 %v1496_v15, %v1488_v26  ;;  %v1500_v44 = vadd.f32 %v1497_v49, %v1489_v37  ;;  %v1504_v23 = vmul.f32 %v1503_v51, %v3744_v9  ;;  %vm5471_vm7 = vmmov %vm5461_vm15 }
 0x192   : > { %v1505_v61 = vmul.f32 %v1503_v51, %v3780_v0  ;;  %vm5472_vm2 = vmmov %vm5471_vm7  ;;  %v886_v4 = vmul.f32 %v3466_v3, %v3756_v1  ;;  %v619_v15 = vmul.f32 %v617_v62, %v3575_v34  ;;  %v633_v49 = vstv %s3847_s9  ;;  %s2597_s9 = sld [smem:[#allocation7 + $0x49]] }
 0x193   : > { %v534_v63 = vpop.permute.xlu1 %533  ;;  %782 = vrot.lane.b32.xlu0 %v776_v29, %s2845_s29  ;;  %828 = vrot.lane.b32.xlu1 %v821_v13, %s2845_s29  ;;  %v488_v32 = vpop.permute.xlu0 %487  ;;  %v887_v13 = vmul.f32 %v3466_v3, %v3575_v34  ;;  %vm5761_vm15 = vcmask 1043456  }
 0x194   : > { %v538_v45 = vsel %vm537_vm4, %v3589_v42, %v534_v63  ;;  %v491_v12 = vsel %vm5471_vm7, %v3538_v60, %v488_v32  ;;  %v492_v41 = vsel %vm5472_vm2, %v488_v32, %v3839_v40  ;;  %v3895_v42 = vadd.f32 %v1504_v23, %v1499_v39  ;;  %v5476_v32 = vld [vmem:[#allocation28_spill] sm:$0xff] }
 0x195   : > { %v543_v26 = vadd.f32 %v538_v45, %v3403_v14  ;;  %v3889_v37 = vsel %vm403_vm1, %v491_v12, 0.0  ;;  %v3893_v51 = vsel %vm3554_vm10, %v492_v41, 0.0  ;;  %v618_v60 = vmul.f32 %v617_v62, %v3756_v1  ;;  %v5475_v62 = vld [vmem:[#allocation24_spill] sm:$0xff]  ;;  %v5477_v41 = vld [vmem:[#allocation27_spill] sm:$0xff] }
 0x196   : > { %5473 = vst [vmem:[#allocation63_spill] sm:$0xff] %v3893_v51  ;;  %5474 = vst [vmem:[#allocation64_spill] sm:$0xff] %v3895_v42  ;;  %v909_v14 = vmul.f32 %v3525_v58, %v3771_v11  ;;  %v556_v23 = vmul.f32 %v3832_v8, %v3579_v35  ;;  %v3908_v29 = vadd.f32 %v1505_v61, %v1500_v44  ;;  %vm2335_vm1 = vcmask 916480  }
 0x197   : > { %v551_v45 = vadd.f32 %v548_v16, %v543_v26  ;;  %v607_v22 = vpop.permute.xlu1 %606  ;;  %826 = vrot.lane.b32.xlu0 %v820_v48, %s2845_s29  ;;  %848 = vrot.lane.b32.xlu1 %v842_v57, %s2845_s29  ;;  %v536_v47 = vpop.permute.xlu0 %535  ;;  %v564_v16 = vmul.f32 %v563_v19, %v3829_v52  ;;  %v628_v57 = vmul.f32 %v3835_v5, %v3389_v55 }
 0x198   : > { %v615_v39 = vadd.f32 %v607_v22, %v5475_v62  ;;  %v539_v3 = vsel %vm537_vm4, %v534_v63, %v536_v47  ;;  %v545_v12 = vadd.f32 %v536_v47, %v5476_v32  ;;  %v636_v42 = vmul.f32 %v633_v49, %v3463_v59 }
 0x199   : > { %v544_v26 = vadd.f32 %v539_v3, %v5477_v41  ;;  %v559_v48 = vadd.f32 %v556_v23, %v551_v45  ;;  %v557_v61 = vmul.f32 %v3832_v8, %v3771_v11  ;;  %v558_v63 = vmul.f32 %v3832_v8, %v3389_v55  ;;  %v5481_v8 = vld [vmem:[#allocation30_spill] sm:$0xff] }
 0x19a   : > { %v623_v51 = vadd.f32 %v620_v17, %v615_v39  ;;  %v553_v40 = vadd.f32 %v550_v24, %v545_v12  ;;  %v566_v62 = vmul.f32 %v563_v19, %v3463_v59  ;;  %v5480_v17 = vld [vmem:[#allocation35_spill] sm:$0xff] }
 0x19b   : > { %v552_v44 = vadd.f32 %v549_v2, %v544_v26  ;;  %v3922_v47 = vpop.permute.xlu1 %719  ;;  %850 = vrot.lane.b32.xlu0 %v843_v31, %s2845_s29  ;;  %892 = vrot.lane.b32.xlu1 %v886_v4, %s2845_s29  ;;  %v605_v45 = vpop.permute.xlu0 %604  ;;  %v3926_v23 = vadd.f32 %v564_v16, %v559_v48  ;;  %v5482_v12 = vld [vmem:[#allocation31_spill] sm:$0xff]  ;;  %v565_v31 = vmul.f32 %v563_v19, %v3583_v21 }
 0x19c   : > { %5478 = vst [vmem:[#allocation24_spill] sm:$0xff] %v3922_v47  ;;  %v608_v24 = vsel %vm537_vm4, %v5480_v17, %v605_v45  ;;  %v609_v39 = vsel %vm537_vm4, %v605_v45, %v607_v22  ;;  %v631_v3 = vadd.f32 %v628_v57, %v623_v51  ;;  %v561_v32 = vadd.f32 %v558_v63, %v553_v40 }
 0x19d   : > { %5479 = vst [vmem:[#allocation28_spill] sm:$0xff] %v3926_v23  ;;  %v613_v2 = vadd.f32 %v608_v24, %v5481_v8  ;;  %v614_v41 = vadd.f32 %v609_v39, %v5482_v12  ;;  %v560_v26 = vadd.f32 %v557_v61, %v552_v44  ;;  %v626_v48 = vmul.f32 %v3835_v5, %v3579_v35  ;;  %v5486_v61 = vld [vmem:[#allocation29_spill] sm:$0xff]  ;;  %v5488_v24 = vld [vmem:[#allocation32_spill] sm:$0xff]  ;;  %v5490_v8 = vld [vmem:[#allocation34_spill] sm:$0xff] }
 0x19e   : > { %v3935_v4 = vadd.f32 %v636_v42, %v631_v3  ;;  %v3937_v16 = vadd.f32 %v566_v62, %v561_v32  ;;  %v627_v17 = vmul.f32 %v3835_v5, %v3771_v11  ;;  %v908_v42 = vmul.f32 %v3525_v58, %v3579_v35 }
 0x19f   : > { %v621_v22 = vadd.f32 %v618_v60, %v613_v2  ;;  %v622_v51 = vadd.f32 %v619_v15, %v614_v41  ;;  %v3943_v40 = vpop.permute.xlu1 %872  ;;  %894 = vrot.lane.b32.xlu0 %v887_v13, %s2845_s29  ;;  %916 = vrot.lane.b32.xlu1 %v909_v14, %s2845_s29  ;;  %v3947_v57 = vpop.permute.xlu0 %717  ;;  %v3949_v19 = vadd.f32 %v565_v31, %v560_v26  ;;  %v1755_v47 = vstv %s2596_s8  ;;  %s2612_s8 = sld [smem:[#allocation7 + $0x58]] }
 0x1a0   : > { %5483 = vst [vmem:[#allocation27_spill] sm:$0xff] %v3937_v16  ;;  %5484 = vst [vmem:[#allocation35_spill] sm:$0xff] %v3947_v57  ;;  %v930_v63 = vmul.f32 %v5486_v61, %v3829_v52  ;;  %v634_v15 = vmul.f32 %v633_v49, %v3829_v52  ;;  %v635_v44 = vmul.f32 %v633_v49, %v3583_v21  ;;  %v1433_v49 = vstv %s2575_s13  ;;  %s2598_s13 = sld [smem:[#allocation7 + $0x4a]]  ;;  %v5556_v16 = vld [vmem:[#allocation61_spill] sm:$0xff] }
 0x1a1   : > { %5485 = vst [vmem:[#allocation30_spill] sm:$0xff] %v3949_v19  ;;  %v629_v5 = vadd.f32 %v626_v48, %v621_v22  ;;  %v630_v60 = vadd.f32 %v627_v17, %v622_v51  ;;  %v931_v62 = vmul.f32 %v5486_v61, %v3583_v21  ;;  %v975_v39 = vmul.f32 %v5488_v24, %v3279_v6 }
 0x1a2   : > { %v976_v32 = vmul.f32 %v5488_v24, %v3377_v53  ;;  %v998_v2 = vmul.f32 %v5490_v8, %v3435_v43  ;;  %v1436_v12 = vmul.f32 %v1433_v49, %v3776_v27  ;;  %v1418_v41 = vmul.f32 %v3696_v18, %v3053_v46 }
 0x1a3   : > { %v3957_v13 = vpop.permute.xlu1 %1029  ;;  %914 = vrot.lane.b32.xlu0 %v908_v42, %s2845_s29  ;;  %936 = vrot.lane.b32.xlu1 %v930_v63, %s2845_s29  ;;  %v3961_v14 = vadd.f32 %v634_v15, %v629_v5  ;;  %v3963_v45 = vadd.f32 %v635_v44, %v630_v60  ;;  %v3965_v58 = vpop.permute.xlu0 %874  ;;  %v1419_v26 = vmul.f32 %v3696_v18, %v3789_v38  ;;  %v1733_v57 = vstv %s2595_s7  ;;  %s2611_s7 = sld [smem:[#allocation7 + $0x57]] }
 0x1a4   : > { %5487 = vst [vmem:[#allocation31_spill] sm:$0xff] %v3957_v13  ;;  %v1426_v31 = vmul.f32 %v3688_v30, %v3748_v33  ;;  %v1427_v48 = vmul.f32 %v3688_v30, %v3752_v10  ;;  %v3993_v22 = vadd.f32 %v1436_v12, %v3731_v50  ;;  %v1435_v51 = vmul.f32 %v1433_v49, %v3780_v0 }
 0x1a5   : > { %v1434_v18 = vmul.f32 %v1433_v49, %v3744_v9  ;;  %v997_v30 = vmul.f32 %v5490_v8, %v3354_v36  ;;  %v1043_v5 = vmul.f32 %v3629_v54, %v3575_v34  ;;  %v1042_v44 = vmul.f32 %v3629_v54, %v3756_v1 }
 0x1a6   : > { %5492 = vst [vmem:[#allocation34_spill] sm:$0xff] %v3993_v22  ;;  %v1429_v42 = vadd.f32 %v1426_v31, %v1418_v41  ;;  %v1430_v61 = vadd.f32 %v1427_v48, %v1419_v26  ;;  %v5501_v41 = vld [vmem:[#allocation18_spill] sm:$0xff]  ;;  %v5502_v48 = vld [vmem:[#allocation36_spill] sm:$0xff] }
 0x1a7   : > { %v3971_v3 = vpop.permute.xlu1 %1182  ;;  %938 = vrot.lane.b32.xlu0 %v931_v62, %s2845_s29  ;;  %981 = vrot.lane.b32.xlu1 %v975_v39, %s2846_s30  ;;  %v3988_v17 = vpop.permute.xlu0 %1027  ;;  %v5497_v62 = vld [vmem:[#allocation33_spill] sm:$0xff]  ;;  %v1131_v26 = vmul.f32 %v5501_v41, %v3377_v53  ;;  %v5513_v41 = vld [vmem:[#allocation38_spill] sm:$0xff] }
 0x1a8   : > { %5489 = vst [vmem:[#allocation29_spill] sm:$0xff] %v3971_v3  ;;  %5491 = vst [vmem:[#allocation32_spill] sm:$0xff] %v3988_v17  ;;  %v4003_v60 = vadd.f32 %v1434_v18, %v1429_v42  ;;  %v4005_v15 = vadd.f32 %v1435_v51, %v1430_v61  ;;  %v1064_v24 = vmul.f32 %v5497_v62, %v3579_v35  ;;  %v5504_v61 = vld [vmem:[#allocation19_spill] sm:$0xff]  ;;  %v5505_v18 = vld [vmem:[#allocation37_spill] sm:$0xff]  ;;  %v1328_v17 = vstv %s2569_s12  ;;  %s2608_s12 = sld [smem:[#allocation7 + $0x54]] }
 0x1a9   : > { %v1065_v49 = vmul.f32 %v5497_v62, %v3771_v11  ;;  %v1152_v51 = vmul.f32 %v5502_v48, %v3354_v36  ;;  %v1284_v48 = vstv %s2567_s18  ;;  %s2599_s18 = sld [smem:[#allocation7 + $0x4b]] }
 0x1aa   : > { %5494 = vst [vmem:[#allocation66_spill] sm:$0xff] %v4003_v60  ;;  %5495 = vst [vmem:[#allocation67_spill] sm:$0xff] %v4005_v15 }
 0x1ab   : > { %983 = vrot.lane.b32.xlu0 %v976_v32, %s2846_s30  ;;  %1005 = vrot.lane.b32.xlu1 %v998_v2, %s2846_s30  ;;  %v3997_v63 = vpop.permute.xlu1 %650  ;;  %v4009_v50 = vpop.permute.xlu0 %1184  ;;  %v5498_v32 = vld [vmem:[#allocation50_spill] sm:$0xff] }
 0x1ac   : > { %5493 = vst [vmem:[#allocation65_spill] sm:$0xff] %v3997_v63  ;;  %5496 = vst [vmem:[#allocation68_spill] sm:$0xff] %v4009_v50  ;;  %v1087_v8 = vmul.f32 %v5498_v32, %v3583_v21  ;;  %v1086_v12 = vmul.f32 %v5498_v32, %v3829_v52  ;;  %v5510_v32 = vld [vmem:[#allocation41_spill] sm:$0xff] }
 0x1af   : > { %1003 = vrot.lane.b32.xlu0 %v997_v30, %s2846_s30  ;;  %1050 = vrot.lane.b32.xlu1 %v1043_v5, %s2846_s30  ;;  %v4015_v39 = vpop.permute.xlu1 %808  ;;  %v4023_v2 = vpop.permute.xlu0 %652  ;;  %v1196_v30 = vmul.f32 %v5505_v18, %v3756_v1 }
 0x1b0   : > { %5499 = vst [vmem:[#allocation33_spill] sm:$0xff] %v4023_v2  ;;  %v4211_v2 = vsel %vm3443_vm0, %v5556_v16, 0.0  ;;  %v2019_v16 = vstv %s2608_s12  ;;  %s2588_s12 = sld [smem:[#allocation7 + $0x40]]  ;;  %vm721_vm0 = vcmask 760832  }
 0x1b3   : > { %1048 = vrot.lane.b32.xlu0 %v1042_v44, %s2846_s30  ;;  %1070 = vrot.lane.b32.xlu1 %v1064_v24, %s2846_s30  ;;  %v4027_v54 = vpop.permute.xlu1 %960  ;;  %v4035_v31 = vpop.permute.xlu0 %806  ;;  %v5507_v44 = vld [vmem:[#allocation40_spill] sm:$0xff]  ;;  %v5509_v24 = vld [vmem:[#allocation39_spill] sm:$0xff] }
 0x1b4   : > { %5500 = vst [vmem:[#allocation50_spill] sm:$0xff] %v4027_v54 }
 0x1b7   : > { %1072 = vrot.lane.b32.xlu0 %v1065_v49, %s2846_s30  ;;  %1094 = vrot.lane.b32.xlu1 %v1087_v8, %s2846_s30  ;;  %v4039_v42 = vpop.permute.xlu1 %1118  ;;  %v4046_v5 = vpop.permute.xlu0 %962  ;;  %v1219_v49 = vmul.f32 %v5509_v24, %v3771_v11 }
 0x1b8   : > { %5503 = vst [vmem:[#allocation18_spill] sm:$0xff] %v4039_v42  ;;  %5506 = vst [vmem:[#allocation36_spill] sm:$0xff] %v4046_v5 }
 0x1bb   : > { %1092 = vrot.lane.b32.xlu0 %v1086_v12, %s2846_s30  ;;  %1138 = vrot.lane.b32.xlu1 %v1131_v26, %s2846_s30  ;;  %v4051_v62 = vpop.permute.xlu1 %1270  ;;  %v4058_v8 = vpop.permute.xlu0 %1116  ;;  %v1240_v26 = vmul.f32 %v5513_v41, %v3829_v52 }
 0x1bc   : > { %5508 = vst [vmem:[#allocation19_spill] sm:$0xff] %v4051_v62  ;;  %5511 = vst [vmem:[#allocation37_spill] sm:$0xff] %v4058_v8 }
 0x1bf   : > { %1136 = vrot.lane.b32.xlu0 %v5504_v61, %s2846_s30  ;;  %1158 = vrot.lane.b32.xlu1 %v1152_v51, %s2846_s30  ;;  %v5514_v51 = vld [vmem:[#allocation42_spill] sm:$0xff] }
 0x1c3   : > { %1202 = vrot.lane.b32.xlu1 %v1196_v30, %s2846_s30  ;;  %1160 = vrot.lane.b32.xlu0 %v5507_v44, %s2846_s30  ;;  %v1285_v30 = vmul.f32 %v1284_v48, %v3279_v6  ;;  %v5517_v44 = vld [vmem:[#allocation43_spill] sm:$0xff] }
 0x1c5   : > { %v4060_v12 = vpop.permute.xlu1 %675  ;;  %v4067_v61 = vpop.permute.xlu0 %697 }
 0x1c6   : > { %5512 = vst [vmem:[#allocation40_spill] sm:$0xff] %v4060_v12  ;;  %5515 = vst [vmem:[#allocation39_spill] sm:$0xff] %v4067_v61 }
 0x1c7   : > { %1226 = vrot.lane.b32.xlu1 %v1219_v49, %s2846_s30  ;;  %1204 = vrot.lane.b32.xlu0 %v5510_v32, %s2846_s30  ;;  %v5519_v32 = vld [vmem:[#allocation21_spill] sm:$0xff] }
 0x1c8   : > { %v1287_v41 = vmul.f32 %v1284_v48, %v5519_v32 }
 0x1cb   : > { %1246 = vrot.lane.b32.xlu1 %v1240_v26, %s2846_s30  ;;  %1224 = vrot.lane.b32.xlu0 %v5514_v51, %s2846_s30  ;;  %v5520_v26 = vld [vmem:[#allocation16_spill] sm:$0xff]  ;;  %v1306_v51 = vstv %s2568_s24  ;;  %s2600_s24 = sld [smem:[#allocation7 + $0x4c]] }
 0x1cc   : > { %v1307_v54 = vmul.f32 %v1306_v51, %v3354_v36 }
 0x1cd   : > { %v4069_v18 = vpop.permute.xlu1 %764  ;;  %v4075_v24 = vpop.permute.xlu0 %742 }
 0x1ce   : > { %5516 = vst [vmem:[#allocation41_spill] sm:$0xff] %v4069_v18  ;;  %5518 = vst [vmem:[#allocation38_spill] sm:$0xff] %v4075_v24  ;;  %v5531_v18 = vld [vmem:[#allocation14_spill] sm:$0xff] }
 0x1cf   : > { %1291 = vrot.lane.b32.xlu1 %v1285_v30, %s2847_s4  ;;  %1248 = vrot.lane.b32.xlu0 %v5517_v44, %s2846_s30  ;;  %v1308_v30 = vmul.f32 %v1306_v51, %v3435_v43  ;;  %v1286_v44 = vmul.f32 %v1284_v48, %v3377_v53  ;;  %v5526_v48 = vld [vmem:[#allocation15_spill] sm:$0xff] }
 0x1d1   : > { %v4077_v49 = vpop.permute.xlu1 %852 }
 0x1d3   : > { %1295 = vrot.lane.b32.xlu1 %v1287_v41, %s2847_s4  ;;  %1272 = vrot.lane.b32.xlu0 %v5520_v26, %s2847_s4  ;;  %v5523_v26 = vld [vmem:[#allocation12_spill] sm:$0xff] }
 0x1d4   : > { %v1329_v13 = vmul.f32 %v1328_v17, %v5523_v26 }
 0x1d5   : > { %v4083_v62 = vpop.permute.xlu1 %896  ;;  %v4085_v6 = vpop.permute.xlu0 %786 }
 0x1d6   : > { %5521 = vst [vmem:[#allocation42_spill] sm:$0xff] %v4085_v6  ;;  %v1511_v6 = vstv %s2583_s21  ;;  %s2609_s21 = sld [smem:[#allocation7 + $0x55]] }
 0x1d7   : > { %1315 = vrot.lane.b32.xlu1 %v1308_v30, %s2847_s4  ;;  %1293 = vrot.lane.b32.xlu0 %v1286_v44, %s2847_s4  ;;  %v1331_v30 = vmul.f32 %v1328_v17, %v5526_v48  ;;  %v5527_v44 = vld [vmem:[#allocation20_spill] sm:$0xff] }
 0x1d8   : > { %v1309_v5 = vmul.f32 %v1306_v51, %v5527_v44  ;;  %v5534_v44 = vld [vmem:[#allocation17_spill] sm:$0xff] }
 0x1d9   : > { %v4091_v32 = vpop.permute.xlu1 %940  ;;  %v4093_v41 = vpop.permute.xlu0 %830 }
 0x1da   : > { %5522 = vst [vmem:[#allocation43_spill] sm:$0xff] %v4091_v32 }
 0x1db   : > { %1335 = vrot.lane.b32.xlu1 %v1329_v13, %s2848_s22  ;;  %1313 = vrot.lane.b32.xlu0 %v1307_v54, %s2847_s4  ;;  %v5530_v13 = vld [vmem:[#allocation13_spill] sm:$0xff] }
 0x1dc   : > { %v1512_v54 = vmul.f32 %v1511_v6, %v5530_v13  ;;  %v2041_v15 = vstv %s2609_s21  ;;  %s2589_s21 = sld [smem:[#allocation7 + $0x41]] }
 0x1dd   : > { %v4099_v53 = vpop.permute.xlu1 %985  ;;  %v4101_v43 = vpop.permute.xlu0 %918 }
 0x1de   : > { %5524 = vst [vmem:[#allocation21_spill] sm:$0xff] %v4099_v53  ;;  %5525 = vst [vmem:[#allocation16_spill] sm:$0xff] %v4101_v43  ;;  %v1330_v53 = vmul.f32 %v1328_v17, %v5531_v18 }
 0x1df   : > { %1339 = vrot.lane.b32.xlu1 %v1331_v30, %s2848_s22  ;;  %1317 = vrot.lane.b32.xlu0 %v1309_v5, %s2847_s4  ;;  %v1514_v30 = vmul.f32 %v1511_v6, %v5534_v44  ;;  %v5535_v5 = vld [vmem:[#allocation46_spill] sm:$0xff] }
 0x1e0   : > { %v1352_v24 = vmul.f32 %v5535_v5, %v3756_v1 }
 0x1e1   : > { %v4107_v36 = vpop.permute.xlu1 %1074  ;;  %v4109_v26 = vpop.permute.xlu0 %1007 }
 0x1e2   : > { %5528 = vst [vmem:[#allocation12_spill] sm:$0xff] %v4107_v36  ;;  %5529 = vst [vmem:[#allocation15_spill] sm:$0xff] %v4109_v26  ;;  %v1711_v36 = vstv %s2594_s26  ;;  %s2610_s26 = sld [smem:[#allocation7 + $0x56]] }
 0x1e3   : > { %1518 = vrot.lane.b32.xlu1 %v1512_v54, %s2842_s19  ;;  %1337 = vrot.lane.b32.xlu0 %v1330_v53, %s2848_s22  ;;  %v1712_v53 = vmul.f32 %v1711_v36, %v3053_v46  ;;  %v1513_v54 = vmul.f32 %v1511_v6, %v3175_v20 }
 0x1e5   : > { %v4115_v48 = vpop.permute.xlu1 %1162  ;;  %v4117_v51 = vpop.permute.xlu0 %1052 }
 0x1e6   : > { %5532 = vst [vmem:[#allocation20_spill] sm:$0xff] %v4115_v48  ;;  %5533 = vst [vmem:[#allocation13_spill] sm:$0xff] %v4117_v51 }
 0x1e7   : > { %1522 = vrot.lane.b32.xlu1 %v1514_v30, %s2842_s19  ;;  %1358 = vrot.lane.b32.xlu0 %v1352_v24, %s2847_s4  ;;  %v5540_v30 = vld [vmem:[#allocation55_spill] sm:$0xff]  ;;  %v1353_v24 = vmul.f32 %v5535_v5, %v3575_v34 }
 0x1e8   : > { %v1714_v26 = vmul.f32 %v1711_v36, %v5540_v30 }
 0x1e9   : > { %v4124_v17 = vpop.permute.xlu1 %1206  ;;  %v4126_v18 = vpop.permute.xlu0 %1096 }
 0x1ea   : > { %5536 = vst [vmem:[#allocation14_spill] sm:$0xff] %v4124_v17  ;;  %5537 = vst [vmem:[#allocation17_spill] sm:$0xff] %v4126_v18 }
 0x1eb   : > { %1718 = vrot.lane.b32.xlu1 %v1712_v53, %s2845_s29  ;;  %1520 = vrot.lane.b32.xlu0 %v1513_v54, %s2842_s19  ;;  %v1735_v53 = vmul.f32 %v1733_v57, %v3752_v10  ;;  %v1713_v54 = vmul.f32 %v1711_v36, %v3789_v38 }
 0x1ed   : > { %v4132_v1 = vpop.permute.xlu1 %1250  ;;  %v4134_v51 = vpop.permute.xlu0 %1140 }
 0x1ee   : > { %5538 = vst [vmem:[#allocation46_spill] sm:$0xff] %v4132_v1  ;;  %5539 = vst [vmem:[#allocation69_spill] sm:$0xff] %v4134_v51  ;;  %v5559_v1 = vld [vmem:[#allocation22_spill] sm:$0xff] }
 0x1ef   : > { %1722 = vrot.lane.b32.xlu1 %v1714_v26, %s2845_s29  ;;  %1360 = vrot.lane.b32.xlu0 %v1353_v24, %s2847_s4  ;;  %v1756_v26 = vmul.f32 %v1755_v47, %v3744_v9  ;;  %v1734_v24 = vmul.f32 %v1733_v57, %v3748_v33  ;;  %vm5560_vm10 = vnez %v5559_v1 }
 0x1f1   : > { %v4141_v6 = vpop.permute.xlu1 %671  ;;  %v4143_v18 = vpop.permute.xlu0 %1228 }
 0x1f2   : > { %5541 = vst [vmem:[#allocation55_spill] sm:$0xff] %v4141_v6  ;;  %5542 = vst [vmem:[#allocation70_spill] sm:$0xff] %v4143_v18 }
 0x1f3   : > { %1742 = vrot.lane.b32.xlu1 %v1735_v53, %s2845_s29  ;;  %1720 = vrot.lane.b32.xlu0 %v1713_v54, %s2845_s29  ;;  %v1758_v53 = vmul.f32 %v1755_v47, %v3776_v27  ;;  %v5547_v54 = vld [vmem:[#allocation57_spill] sm:$0xff] }
 0x1f4   : > { %v1736_v23 = vmul.f32 %v1733_v57, %v5547_v54 }
 0x1f5   : > { %v4149_v34 = vpop.permute.xlu1 %695  ;;  %v4151_v5 = vpop.permute.xlu0 %673 }
 0x1f6   : > { %5543 = vst [vmem:[#allocation71_spill] sm:$0xff] %v4149_v34  ;;  %5544 = vst [vmem:[#allocation72_spill] sm:$0xff] %v4151_v5  ;;  %v1777_v34 = vstv %s2597_s9  ;;  %v5555_v5 = vld [vmem:[#allocation58_spill] sm:$0xff]  ;;  %s2613_s9 = sld [smem:[#allocation7 + $0x59]] }
 0x1f7   : > { %1762 = vrot.lane.b32.xlu1 %v1756_v26, %s2845_s29  ;;  %1740 = vrot.lane.b32.xlu0 %v1734_v24, %s2845_s29  ;;  %v1779_v26 = vmul.f32 %v1777_v34, %v3175_v20  ;;  %v1757_v24 = vmul.f32 %v1755_v47, %v3780_v0 }
 0x1f9   : > { %v4157_v36 = vpop.permute.xlu1 %740  ;;  %v4159_v61 = vpop.permute.xlu0 %693 }
 0x1fa   : > { %5545 = vst [vmem:[#allocation73_spill] sm:$0xff] %v4157_v36  ;;  %5546 = vst [vmem:[#allocation74_spill] sm:$0xff] %v4159_v61  ;;  %v1799_v36 = vstv %s2598_s13  ;;  %s2614_s13 = sld [smem:[#allocation7 + $0x5a]] }
 0x1fb   : > { %1766 = vrot.lane.b32.xlu1 %v1758_v53, %s2845_s29  ;;  %1744 = vrot.lane.b32.xlu0 %v1736_v23, %s2845_s29  ;;  %v1800_v23 = vmul.f32 %v1799_v36, %v3819_v28  ;;  %v1778_v53 = vmul.f32 %v1777_v34, %v5530_v13 }
 0x1fd   : > { %v4165_v6 = vpop.permute.xlu1 %760  ;;  %v4167_v19 = vpop.permute.xlu0 %738 }
 0x1fe   : > { %5548 = vst [vmem:[#allocation57_spill] sm:$0xff] %v4165_v6  ;;  %5549 = vst [vmem:[#allocation75_spill] sm:$0xff] %v4167_v19  ;;  %v4182_v19 = vsel %vm3358_vm3, %v3765_v56, 0.0  ;;  %v1821_v6 = vstv %s2599_s18  ;;  %s2576_s18 = sld [smem:[#allocation7 + $0x34]]  ;;  %vm654_vm3 = vcmask 785408  }
 0x1ff   : > { %1786 = vrot.lane.b32.xlu1 %v1779_v26, %s2843_s27  ;;  %1764 = vrot.lane.b32.xlu0 %v1757_v24, %s2845_s29  ;;  %v1802_v24 = vmul.f32 %v1799_v36, %v4182_v19  ;;  %v1822_v12 = vmul.f32 %v1821_v6, %v5555_v5 }
 0x201   : > { %v4173_v57 = vpop.permute.xlu1 %784  ;;  %v4175_v61 = vpop.permute.xlu0 %762 }
 0x202   : > { %5550 = vst [vmem:[#allocation76_spill] sm:$0xff] %v4173_v57  ;;  %5551 = vst [vmem:[#allocation77_spill] sm:$0xff] %v4175_v61  ;;  %v1780_v57 = vmul.f32 %v1777_v34, %v5534_v44 }
 0x203   : > { %1806 = vrot.lane.b32.xlu1 %v1800_v23, %s2845_s29  ;;  %1784 = vrot.lane.b32.xlu0 %v1778_v53, %s2843_s27  ;;  %v1823_v23 = vmul.f32 %v1821_v6, %v3862_v7  ;;  %v1801_v53 = vmul.f32 %v1799_v36, %v3823_v25  ;;  %v5558_v36 = vld [vmem:[#allocation62_spill] sm:$0xff] }
 0x205   : > { %v4186_v47 = vpop.permute.xlu1 %828  ;;  %v4188_v26 = vpop.permute.xlu0 %782 }
 0x206   : > { %5553 = vst [vmem:[#allocation23_spill] sm:$0xff] %v4188_v26  ;;  %v1843_v26 = vstv %s2600_s24  ;;  %s2587_s24 = sld [smem:[#allocation7 + $0x3f]] }
 0x207   : > { %1810 = vrot.lane.b32.xlu1 %v1802_v24, %s2845_s29  ;;  %1788 = vrot.lane.b32.xlu0 %v1780_v57, %s2843_s27  ;;  %v1844_v57 = vmul.f32 %v1843_v26, %v3889_v37  ;;  %v1846_v17 = vmul.f32 %v1843_v26, %v4211_v2 }
 0x209   : > { %v4194_v56 = vpop.permute.xlu1 %848  ;;  %v4196_v61 = vpop.permute.xlu0 %826 }
 0x20b   : > { %1830 = vrot.lane.b32.xlu1 %v1823_v23, %s2845_s29  ;;  %1808 = vrot.lane.b32.xlu0 %v1801_v53, %s2845_s29  ;;  %v4216_v23 = vsel %vm5560_vm10, %v5558_v36, 0.0 }
 0x20c   : > { %v1824_v63 = vmul.f32 %v1821_v6, %v4216_v23 }
 0x20d   : > { %v4202_v34 = vpop.permute.xlu1 %892  ;;  %v4204_v24 = vpop.permute.xlu0 %850 }
 0x20e   : > { %5554 = vst [vmem:[#allocation78_spill] sm:$0xff] %v4202_v34 }
 0x20f   : > { %1850 = vrot.lane.b32.xlu1 %v1844_v57, %s2845_s29  ;;  %1828 = vrot.lane.b32.xlu0 %v1822_v12, %s2845_s29  ;;  %v2021_v57 = vmul.f32 %v2019_v16, %v3789_v38  ;;  %v5564_v12 = vld [vmem:[#allocation63_spill] sm:$0xff] }
 0x210   : > { %v1845_v48 = vmul.f32 %v1843_v26, %v5564_v12 }
 0x211   : > { %v4220_v53 = vpop.permute.xlu1 %916  ;;  %v4222_v18 = vpop.permute.xlu0 %894 }
 0x212   : > { %5561 = vst [vmem:[#allocation58_spill] sm:$0xff] %v4220_v53 }
 0x213   : > { %1854 = vrot.lane.b32.xlu1 %v1846_v17, %s2845_s29  ;;  %1832 = vrot.lane.b32.xlu0 %v1824_v63, %s2845_s29  ;;  %v2042_v17 = vmul.f32 %v2041_v15, %v3748_v33  ;;  %v2020_v63 = vmul.f32 %v2019_v16, %v3053_v46 }
 0x215   : > { %v4228_v1 = vpop.permute.xlu1 %936  ;;  %v4230_v36 = vpop.permute.xlu0 %914 }
 0x216   : > { %5562 = vst [vmem:[#allocation61_spill] sm:$0xff] %v4228_v1  ;;  %5563 = vst [vmem:[#allocation25_spill] sm:$0xff] %v4230_v36 }
 0x217   : > { %2028 = vrot.lane.b32.xlu1 %v2021_v57, %s2846_s30  ;;  %1852 = vrot.lane.b32.xlu0 %v1845_v48, %s2845_s29  ;;  %v2044_v48 = vmul.f32 %v2041_v15, %v5547_v54  ;;  %v2022_v57 = vmul.f32 %v2019_v16, %v5540_v30 }
 0x219   : > { %v4236_v6 = vpop.permute.xlu1 %981  ;;  %v4238_v60 = vpop.permute.xlu0 %938 }
 0x21a   : > { %5565 = vst [vmem:[#allocation62_spill] sm:$0xff] %v4236_v6  ;;  %5566 = vst [vmem:[#allocation22_spill] sm:$0xff] %v4238_v60  ;;  %v2063_v6 = vstv %s2610_s26  ;;  %s2590_s26 = sld [smem:[#allocation7 + $0x42]] }
 0x21b   : > { %2048 = vrot.lane.b32.xlu1 %v2042_v17, %s2846_s30  ;;  %2026 = vrot.lane.b32.xlu0 %v2020_v63, %s2846_s30  ;;  %v2065_v17 = vmul.f32 %v2063_v6, %v3780_v0  ;;  %v2043_v63 = vmul.f32 %v2041_v15, %v3752_v10 }
 0x21d   : > { %v4244_v26 = vpop.permute.xlu1 %1005  ;;  %v4246_v51 = vpop.permute.xlu0 %983 }
 0x21e   : > { %5567 = vst [vmem:[#allocation79_spill] sm:$0xff] %v4244_v26  ;;  %5568 = vst [vmem:[#allocation80_spill] sm:$0xff] %v4246_v51  ;;  %v2085_v26 = vstv %s2611_s7  ;;  %s2584_s7 = sld [smem:[#allocation7 + $0x3c]] }
 0x21f   : > { %2052 = vrot.lane.b32.xlu1 %v2044_v48, %s2846_s30  ;;  %2030 = vrot.lane.b32.xlu0 %v2022_v57, %s2846_s30  ;;  %v2086_v57 = vmul.f32 %v2085_v26, %v5530_v13 }
 0x221   : > { %v4252_v42 = vpop.permute.xlu1 %1050  ;;  %v4254_v8 = vpop.permute.xlu0 %1003 }
 0x222   : > { %5569 = vst [vmem:[#allocation81_spill] sm:$0xff] %v4252_v42  ;;  %5570 = vst [vmem:[#allocation82_spill] sm:$0xff] %v4254_v8  ;;  %v2064_v42 = vmul.f32 %v2063_v6, %v3744_v9 }
 0x223   : > { %2072 = vrot.lane.b32.xlu1 %v2065_v17, %s2846_s30  ;;  %2050 = vrot.lane.b32.xlu0 %v2043_v63, %s2846_s30  ;;  %v2088_v17 = vmul.f32 %v2085_v26, %v5534_v44  ;;  %v2066_v63 = vmul.f32 %v2063_v6, %v3776_v27 }
 0x225   : > { %v4260_v16 = vpop.permute.xlu1 %1070  ;;  %v4262_v48 = vpop.permute.xlu0 %1048 }
 0x226   : > { %5571 = vst [vmem:[#allocation83_spill] sm:$0xff] %v4260_v16  ;;  %5572 = vst [vmem:[#allocation84_spill] sm:$0xff] %v4262_v48  ;;  %v2107_v16 = vstv %s2612_s8  ;;  %s2591_s8 = sld [smem:[#allocation7 + $0x43]] }
 0x227   : > { %2092 = vrot.lane.b32.xlu1 %v2086_v57, %s2844_s28  ;;  %2070 = vrot.lane.b32.xlu0 %v2064_v42, %s2846_s30  ;;  %v2109_v57 = vmul.f32 %v2107_v16, %v3823_v25  ;;  %v2087_v42 = vmul.f32 %v2085_v26, %v3175_v20 }
 0x229   : > { %v4268_v15 = vpop.permute.xlu1 %1094  ;;  %v4270_v8 = vpop.permute.xlu0 %1072 }
 0x22a   : > { %5573 = vst [vmem:[#allocation85_spill] sm:$0xff] %v4268_v15  ;;  %5574 = vst [vmem:[#allocation86_spill] sm:$0xff] %v4270_v8  ;;  %v2129_v15 = vstv %s2613_s9  ;;  %s2585_s9 = sld [smem:[#allocation7 + $0x3d]] }
 0x22b   : > { %2096 = vrot.lane.b32.xlu1 %v2088_v17, %s2844_s28  ;;  %2074 = vrot.lane.b32.xlu0 %v2066_v63, %s2846_s30  ;;  %v2130_v17 = vmul.f32 %v2129_v15, %v5555_v5  ;;  %v2108_v63 = vmul.f32 %v2107_v16, %v3819_v28 }
 0x22c   : > { %v1645_v36 = vstv %s2591_s8  ;;  %s2607_s8 = sld [smem:[#allocation7 + $0x53]] }
 0x22d   : > { %v4276_v48 = vpop.permute.xlu1 %1138  ;;  %v4278_v51 = vpop.permute.xlu0 %1092 }
 0x22e   : > { %5575 = vst [vmem:[#allocation87_spill] sm:$0xff] %v4276_v48  ;;  %5576 = vst [vmem:[#allocation88_spill] sm:$0xff] %v4278_v51 }
 0x22f   : > { %2116 = vrot.lane.b32.xlu1 %v2109_v57, %s2846_s30  ;;  %2094 = vrot.lane.b32.xlu0 %v2087_v42, %s2844_s28  ;;  %v2132_v57 = vmul.f32 %v2129_v15, %v4216_v23  ;;  %v2110_v42 = vmul.f32 %v2107_v16, %v4182_v19 }
 0x231   : > { %v4284_v6 = vpop.permute.xlu1 %1158  ;;  %v4286_v8 = vpop.permute.xlu0 %1136 }
 0x232   : > { %5577 = vst [vmem:[#allocation89_spill] sm:$0xff] %v4284_v6  ;;  %5578 = vst [vmem:[#allocation90_spill] sm:$0xff] %v4286_v8  ;;  %v2151_v6 = vstv %s2614_s13  ;;  %s2586_s13 = sld [smem:[#allocation7 + $0x3e]] }
 0x233   : > { %2136 = vrot.lane.b32.xlu1 %v2130_v17, %s2846_s30  ;;  %2114 = vrot.lane.b32.xlu0 %v2108_v63, %s2846_s30  ;;  %v2153_v17 = vmul.f32 %v2151_v6, %v5564_v12  ;;  %v2131_v63 = vmul.f32 %v2129_v15, %v3862_v7 }
 0x235   : > { %v4292_v26 = vpop.permute.xlu1 %1202  ;;  %v4294_v51 = vpop.permute.xlu0 %1160 }
 0x236   : > { %5579 = vst [vmem:[#allocation91_spill] sm:$0xff] %v4292_v26  ;;  %5580 = vst [vmem:[#allocation92_spill] sm:$0xff] %v4294_v51  ;;  %v1441_v26 = vstv %s2576_s18  ;;  %s2592_s18 = sld [smem:[#allocation7 + $0x44]] }
 0x237   : > { %2140 = vrot.lane.b32.xlu1 %v2132_v57, %s2846_s30  ;;  %2118 = vrot.lane.b32.xlu0 %v2110_v42, %s2846_s30  ;;  %v1442_v42 = vmul.f32 %v1441_v26, %v5530_v13 }
 0x238   : > { %v1549_v60 = vstv %s2586_s13  ;;  %s2617_s13 = sld [smem:[#allocation7 + $0x5d]] }
 0x239   : > { %v4300_v8 = vpop.permute.xlu1 %1226  ;;  %v4302_v48 = vpop.permute.xlu0 %1204 }
 0x23a   : > { %5581 = vst [vmem:[#allocation93_spill] sm:$0xff] %v4300_v8  ;;  %5582 = vst [vmem:[#allocation94_spill] sm:$0xff] %v4302_v48  ;;  %v2152_v8 = vmul.f32 %v2151_v6, %v3889_v37 }
 0x23b   : > { %2160 = vrot.lane.b32.xlu1 %v2153_v17, %s2846_s30  ;;  %2138 = vrot.lane.b32.xlu0 %v2131_v63, %s2846_s30  ;;  %v1444_v17 = vmul.f32 %v1441_v26, %v5534_v44  ;;  %v2154_v63 = vmul.f32 %v2151_v6, %v4211_v2 }
 0x23d   : > { %v4308_v16 = vpop.permute.xlu1 %1246  ;;  %v4310_v57 = vpop.permute.xlu0 %1224 }
 0x23e   : > { %5583 = vst [vmem:[#allocation95_spill] sm:$0xff] %v4308_v16  ;;  %5584 = vst [vmem:[#allocation96_spill] sm:$0xff] %v4310_v57  ;;  %v1557_v16 = vstv %s2587_s24  ;;  %s2593_s24 = sld [smem:[#allocation7 + $0x45]] }
 0x23f   : > { %1448 = vrot.lane.b32.xlu1 %v1442_v42, %s2842_s19  ;;  %2158 = vrot.lane.b32.xlu0 %v2152_v8, %s2846_s30  ;;  %v1559_v42 = vmul.f32 %v1557_v16, %v3789_v38  ;;  %v1443_v8 = vmul.f32 %v1441_v26, %v3175_v20 }
 0x241   : > { %v4316_v15 = vpop.permute.xlu1 %1291  ;;  %v4318_v48 = vpop.permute.xlu0 %1248 }
 0x242   : > { %5585 = vst [vmem:[#allocation97_spill] sm:$0xff] %v4316_v15  ;;  %5586 = vst [vmem:[#allocation98_spill] sm:$0xff] %v4318_v48  ;;  %v1579_v15 = vstv %s2588_s12  ;;  %s2602_s12 = sld [smem:[#allocation7 + $0x4e]] }
 0x243   : > { %1452 = vrot.lane.b32.xlu1 %v1444_v17, %s2842_s19  ;;  %2162 = vrot.lane.b32.xlu0 %v2154_v63, %s2846_s30  ;;  %v1580_v17 = vmul.f32 %v1579_v15, %v3748_v33  ;;  %v1558_v63 = vmul.f32 %v1557_v16, %v3053_v46 }
 0x245   : > { %v4324_v57 = vpop.permute.xlu1 %1295  ;;  %v4326_v51 = vpop.permute.xlu0 %1272 }
 0x246   : > { %5587 = vst [vmem:[#allocation99_spill] sm:$0xff] %v4324_v57  ;;  %5588 = vst [vmem:[#allocation100_spill] sm:$0xff] %v4326_v51 }
 0x247   : > { %1566 = vrot.lane.b32.xlu1 %v1559_v42, %s2845_s29  ;;  %1450 = vrot.lane.b32.xlu0 %v1443_v8, %s2842_s19  ;;  %v1582_v42 = vmul.f32 %v1579_v15, %v5547_v54  ;;  %v1560_v8 = vmul.f32 %v1557_v16, %v5540_v30 }
 0x249   : > { %v4332_v6 = vpop.permute.xlu1 %1315  ;;  %v4334_v48 = vpop.permute.xlu0 %1293 }
 0x24a   : > { %5589 = vst [vmem:[#allocation101_spill] sm:$0xff] %v4332_v6  ;;  %5590 = vst [vmem:[#allocation102_spill] sm:$0xff] %v4334_v48  ;;  %v1601_v6 = vstv %s2589_s21  ;;  %s2603_s21 = sld [smem:[#allocation7 + $0x4f]] }
 0x24b   : > { %1586 = vrot.lane.b32.xlu1 %v1580_v17, %s2845_s29  ;;  %1564 = vrot.lane.b32.xlu0 %v1558_v63, %s2845_s29  ;;  %v1603_v17 = vmul.f32 %v1601_v6, %v3780_v0  ;;  %v1581_v63 = vmul.f32 %v1579_v15, %v3752_v10  ;;  %v1533_v15 = vstv %s2584_s7  ;;  %s2606_s7 = sld [smem:[#allocation7 + $0x52]] }
 0x24c   : > { %v1536_v22 = vmul.f32 %v1533_v15, %v4182_v19 }
 0x24d   : > { %v4340_v26 = vpop.permute.xlu1 %1335  ;;  %v4342_v57 = vpop.permute.xlu0 %1313 }
 0x24e   : > { %5591 = vst [vmem:[#allocation103_spill] sm:$0xff] %v4340_v26  ;;  %5592 = vst [vmem:[#allocation104_spill] sm:$0xff] %v4342_v57  ;;  %v1623_v26 = vstv %s2590_s26  ;;  %s2604_s26 = sld [smem:[#allocation7 + $0x50]] }
 0x24f   : > { %1590 = vrot.lane.b32.xlu1 %v1582_v42, %s2845_s29  ;;  %1568 = vrot.lane.b32.xlu0 %v1560_v8, %s2845_s29  ;;  %v1624_v8 = vmul.f32 %v1623_v26, %v5530_v13  ;;  %v1625_v43 = vmul.f32 %v1623_v26, %v3175_v20 }
 0x251   : > { %v4348_v48 = vpop.permute.xlu1 %1339  ;;  %v4350_v51 = vpop.permute.xlu0 %1317 }
 0x252   : > { %5593 = vst [vmem:[#allocation105_spill] sm:$0xff] %v4348_v48  ;;  %5594 = vst [vmem:[#allocation106_spill] sm:$0xff] %v4350_v51  ;;  %v1602_v48 = vmul.f32 %v1601_v6, %v3744_v9 }
 0x253   : > { %1610 = vrot.lane.b32.xlu1 %v1603_v17, %s2845_s29  ;;  %1588 = vrot.lane.b32.xlu0 %v1581_v63, %s2845_s29  ;;  %v1626_v17 = vmul.f32 %v1623_v26, %v5534_v44  ;;  %v1604_v63 = vmul.f32 %v1601_v6, %v3776_v27  ;;  %v1647_v6 = vmul.f32 %v1645_v36, %v3823_v25 }
 0x255   : > { %v1519_v16 = vpop.permute.xlu1 %1518  ;;  %v4356_v42 = vpop.permute.xlu0 %1337 }
 0x256   : > { %5595 = vst [vmem:[#allocation107_spill] sm:$0xff] %v4356_v42  ;;  %v5597_v42 = vld [vmem:[#allocation59_spill] sm:$0xff] }
 0x257   : > { %1630 = vrot.lane.b32.xlu1 %v1624_v8, %s2843_s27  ;;  %1608 = vrot.lane.b32.xlu0 %v1602_v48, %s2845_s29  ;;  %v1541_v8 = vstv %s2585_s9  ;;  %s2615_s9 = sld [smem:[#allocation7 + $0x5b]] }
 0x258   : > { %v1544_v32 = vmul.f32 %v1541_v8, %v4216_v23 }
 0x259   : > { %v1523_v51 = vpop.permute.xlu1 %1522  ;;  %v4362_v57 = vpop.permute.xlu0 %1358 }
 0x25a   : > { %5596 = vst [vmem:[#allocation108_spill] sm:$0xff] %v4362_v57  ;;  %v1531_v1 = vadd.f32 %v1523_v51, %v5597_v42  ;;  %v1534_v57 = vmul.f32 %v1533_v15, %v3819_v28  ;;  %v1667_v42 = vstv %s2592_s18  ;;  %s2618_s18 = sld [smem:[#allocation7 + $0x5e]] }
 0x25b   : > { %1634 = vrot.lane.b32.xlu1 %v1626_v17, %s2843_s27  ;;  %1612 = vrot.lane.b32.xlu0 %v1604_v63, %s2845_s29  ;;  %v1552_v63 = vmul.f32 %v1549_v60, %v4211_v2  ;;  %v1668_v26 = vmul.f32 %v1667_v42, %v5555_v5 }
 0x25c   : > { %v1539_v48 = vadd.f32 %v1536_v22, %v1531_v1  ;;  %v1535_v22 = vmul.f32 %v1533_v15, %v3823_v25  ;;  %v5599_v1 = vld [vmem:[#allocation64_spill] sm:$0xff] }
 0x25d   : > { %v4371_v53 = vpop.permute.xlu1 %1718  ;;  %v1521_v34 = vpop.permute.xlu0 %1520 }
 0x25e   : > { %5598 = vst [vmem:[#allocation59_spill] sm:$0xff] %v4371_v53  ;;  %v1524_v3 = vsel %vm537_vm4, %v1519_v16, %v1521_v34  ;;  %v1525_v17 = vsel %vm537_vm4, %v1521_v34, %v1523_v51  ;;  %v1547_v50 = vadd.f32 %v1544_v32, %v1539_v48  ;;  %v1646_v16 = vmul.f32 %v1645_v36, %v3819_v28 }
 0x25f   : > { %v1529_v59 = vadd.f32 %v1524_v3, %v5599_v1  ;;  %v1530_v53 = vadd.f32 %v1525_v17, %v3908_v29  ;;  %1654 = vrot.lane.b32.xlu1 %v1647_v6, %s2845_s29  ;;  %1632 = vrot.lane.b32.xlu0 %v1625_v43, %s2843_s27  ;;  %v1542_v3 = vmul.f32 %v1541_v8, %v5555_v5  ;;  %s2601_s27 = sld [smem:[#allocation7 + $0x4d]] }
 0x260   : > { %v4384_v52 = vadd.f32 %v1552_v63, %v1547_v50  ;;  %v1543_v29 = vmul.f32 %v1541_v8, %v3862_v7  ;;  %v1550_v48 = vmul.f32 %v1549_v60, %v3889_v37  ;;  %v1670_v8 = vmul.f32 %v1667_v42, %v4216_v23 }
 0x261   : > { %v1537_v51 = vadd.f32 %v1534_v57, %v1529_v59  ;;  %v1538_v34 = vadd.f32 %v1535_v22, %v1530_v53  ;;  %v4388_v32 = vpop.permute.xlu1 %1722  ;;  %v4390_v15 = vpop.permute.xlu0 %1360  ;;  %v1551_v59 = vmul.f32 %v1549_v60, %v5564_v12  ;;  %v1648_v63 = vmul.f32 %v1645_v36, %v4182_v19 }
 0x262   : > { %5600 = vst [vmem:[#allocation64_spill] sm:$0xff] %v4384_v52  ;;  %5601 = vst [vmem:[#allocation109_spill] sm:$0xff] %v4388_v32  ;;  %v1689_v22 = vstv %s2593_s24  ;;  %s4569_s24 = sld [smem:[#allocation7 + $0x5f]] }
 0x263   : > { %5602 = vst [vmem:[#allocation110_spill] sm:$0xff] %v4390_v15  ;;  %1674 = vrot.lane.b32.xlu1 %v1668_v26, %s2845_s29  ;;  %1652 = vrot.lane.b32.xlu0 %v1646_v16, %s2845_s29  ;;  %v1545_v50 = vadd.f32 %v1542_v3, %v1537_v51  ;;  %v1546_v43 = vadd.f32 %v1543_v29, %v1538_v34 }
 0x264   : > { %v1691_v26 = vmul.f32 %v1689_v22, %v5564_v12  ;;  %v1669_v16 = vmul.f32 %v1667_v42, %v3862_v7  ;;  %v1690_v29 = vmul.f32 %v1689_v22, %v3889_v37 }
 0x265   : > { %v4398_v53 = vpop.permute.xlu1 %1742  ;;  %v4400_v57 = vadd.f32 %v1550_v48, %v1545_v50  ;;  %v4402_v6 = vadd.f32 %v1551_v59, %v1546_v43  ;;  %v4404_v17 = vpop.permute.xlu0 %1720  ;;  %v1865_v51 = vstv %s2601_s27  ;;  %v1692_v43 = vmul.f32 %v1689_v22, %v4211_v2  ;;  %s4571_s27 = sld [smem:[#allocation7 + $0x30]] }
 0x266   : > { %5603 = vst [vmem:[#allocation111_spill] sm:$0xff] %v4398_v53  ;;  %5605 = vst [vmem:[#allocation113_spill] sm:$0xff] %v4404_v17  ;;  %v1866_v3 = vmul.f32 %v1865_v51, %v3053_v46  ;;  %v1868_v50 = vmul.f32 %v1865_v51, %v5540_v30  ;;  %v1887_v59 = vstv %s2602_s12  ;;  %s4576_s12 = sld [smem:[#allocation7 + $0x35]] }
 0x267   : > { %5604 = vst [vmem:[#allocation112_spill] sm:$0xff] %v4400_v57  ;;  %1678 = vrot.lane.b32.xlu1 %v1670_v8, %s2845_s29  ;;  %1656 = vrot.lane.b32.xlu0 %v1648_v63, %s2845_s29 }
 0x269   : > { %v4410_v1 = vpop.permute.xlu1 %1762  ;;  %v4412_v60 = vpop.permute.xlu0 %1740 }
 0x26a   : > { %5606 = vst [vmem:[#allocation114_spill] sm:$0xff] %v4410_v1  ;;  %5607 = vst [vmem:[#allocation115_spill] sm:$0xff] %v4412_v60 }
 0x26b   : > { %1698 = vrot.lane.b32.xlu1 %v1691_v26, %s2845_s29  ;;  %1676 = vrot.lane.b32.xlu0 %v1669_v16, %s2845_s29  ;;  %v1889_v26 = vmul.f32 %v1887_v59, %v3752_v10  ;;  %v1867_v16 = vmul.f32 %v1865_v51, %v3789_v38 }
 0x26d   : > { %v4418_v36 = vpop.permute.xlu1 %1766  ;;  %v4420_v34 = vpop.permute.xlu0 %1744 }
 0x26e   : > { %5608 = vst [vmem:[#allocation116_spill] sm:$0xff] %v4418_v36 }
 0x26f   : > { %1872 = vrot.lane.b32.xlu1 %v1866_v3, %s2846_s30  ;;  %1696 = vrot.lane.b32.xlu0 %v1690_v29, %s2845_s29  ;;  %v1909_v3 = vstv %s2603_s21  ;;  %s4578_s21 = sld [smem:[#allocation7 + $0x36]] }
 0x271   : > { %v4426_v42 = vpop.permute.xlu1 %1786  ;;  %v4428_v48 = vpop.permute.xlu0 %1764 }
 0x272   : > { %5609 = vst [vmem:[#allocation117_spill] sm:$0xff] %v4428_v48 }
 0x273   : > { %1876 = vrot.lane.b32.xlu1 %v1868_v50, %s2846_s30  ;;  %1700 = vrot.lane.b32.xlu0 %v1692_v43, %s2845_s29  ;;  %v1910_v50 = vmul.f32 %v1909_v3, %v3744_v9  ;;  %v1888_v43 = vmul.f32 %v1887_v59, %v3748_v33  ;;  %s2605_s29 = sld [smem:[#allocation7 + $0x51]] }
 0x275   : > { %v4434_v8 = vpop.permute.xlu1 %1806  ;;  %v4436_v63 = vpop.permute.xlu0 %1784 }
 0x276   : > { %5610 = vst [vmem:[#allocation118_spill] sm:$0xff] %v4434_v8  ;;  %5611 = vst [vmem:[#allocation119_spill] sm:$0xff] %v4436_v63  ;;  %v1931_v8 = vstv %s2604_s26  ;;  %s4584_s26 = sld [smem:[#allocation7 + $0x37]] }
 0x277   : > { %1896 = vrot.lane.b32.xlu1 %v1889_v26, %s2846_s30  ;;  %1874 = vrot.lane.b32.xlu0 %v1867_v16, %s2846_s30  ;;  %v1912_v26 = vmul.f32 %v1909_v3, %v3776_v27  ;;  %v1890_v16 = vmul.f32 %v1887_v59, %v5547_v54  ;;  %v1725_v59 = vsel %vm654_vm3, %v4404_v17, %v4388_v32 }
 0x279   : > { %v4442_v22 = vpop.permute.xlu1 %1810  ;;  %v4444_v29 = vpop.permute.xlu0 %1788  ;;  %v1953_v57 = vstv %s2605_s29  ;;  %s4600_s29 = sld [smem:[#allocation7 + $0x60]] }
 0x27a   : > { %v1956_v52 = vmul.f32 %v1953_v57, %v4182_v19 }
 0x27b   : > { %1916 = vrot.lane.b32.xlu1 %v1910_v50, %s2846_s30  ;;  %1894 = vrot.lane.b32.xlu0 %v1888_v43, %s2846_s30  ;;  %v1933_v50 = vmul.f32 %v1931_v8, %v3175_v20  ;;  %v1911_v43 = vmul.f32 %v1909_v3, %v3780_v0  ;;  %v1747_v3 = vsel %vm654_vm3, %v4398_v53, %v4420_v34 }
 0x27c   : > { %v1934_v53 = vmul.f32 %v1931_v8, %v5534_v44 }
 0x27d   : > { %v4450_v51 = vpop.permute.xlu1 %1830  ;;  %v4452_v15 = vpop.permute.xlu0 %1808 }
 0x27f   : > { %1920 = vrot.lane.b32.xlu1 %v1912_v26, %s2846_s30  ;;  %1898 = vrot.lane.b32.xlu0 %v1890_v16, %s2846_s30 }
 0x281   : > { %v4458_v63 = vpop.permute.xlu1 %1850  ;;  %v4460_v1 = vpop.permute.xlu0 %1828 }
 0x282   : > { %5612 = vst [vmem:[#allocation120_spill] sm:$0xff] %v4458_v63  ;;  %5613 = vst [vmem:[#allocation121_spill] sm:$0xff] %v4460_v1  ;;  %v1954_v63 = vmul.f32 %v1953_v57, %v3819_v28  ;;  %v1932_v1 = vmul.f32 %v1931_v8, %v5530_v13 }
 0x283   : > { %1940 = vrot.lane.b32.xlu1 %v1933_v50, %s2844_s28  ;;  %1918 = vrot.lane.b32.xlu0 %v1911_v43, %s2846_s30  ;;  %v1730_v50 = vadd.f32 %v1725_v59, %v4402_v6  ;;  %v1769_v43 = vsel %vm654_vm3, %v4428_v48, %v4418_v36  ;;  %v1791_v6 = vsel %vm721_vm0, %v4426_v42, %v4444_v29  ;;  %v1975_v59 = vstv %s2606_s7  ;;  %s2849_s7 = smov 112  }
 0x284   : > { %v1977_v8 = vmul.f32 %v1975_v59, %v3862_v7  ;;  %v1955_v36 = vmul.f32 %v1953_v57, %v3823_v25 }
 0x285   : > { %v4469_v26 = vpop.permute.xlu1 %1854  ;;  %v4471_v16 = vpop.permute.xlu0 %1832  ;;  %v1752_v60 = vadd.f32 %v1747_v3, %v1730_v50 }
 0x286   : > { %5614 = vst [vmem:[#allocation122_spill] sm:$0xff] %v4469_v26 }
 0x287   : > { %1960 = vrot.lane.b32.xlu1 %v1954_v63, %s2846_s30  ;;  %1938 = vrot.lane.b32.xlu0 %v1932_v1, %s2844_s28  ;;  %v1774_v1 = vadd.f32 %v1769_v43, %v1752_v60  ;;  %v1813_v63 = vsel %vm654_vm3, %v4452_v15, %v4442_v22  ;;  %v1997_v43 = vstv %s2607_s8  ;;  %s2631_s8 = sshll.u32 %s2895_s2, 7  ;;  %s2415_s2 = scalar_lea.sflag [#allocation5], %s3006_s10 }
 0x289   : > { %v4484_v17 = vpop.permute.xlu1 %2028  ;;  %v4486_v32 = vpop.permute.xlu0 %1852  ;;  %v1796_v3 = vadd.f32 %v1791_v6, %v1774_v1 }
 0x28a   : > { %5615 = vst [vmem:[#allocation123_spill] sm:$0xff] %v4484_v17  ;;  %5616 = vst [vmem:[#allocation124_spill] sm:$0xff] %v4486_v32  ;;  %v1857_v60 = vsel %vm654_vm3, %v4486_v32, %v4469_v26  ;;  %v1978_v26 = vmul.f32 %v1975_v59, %v4216_v23 }
 0x28b   : > { %1964 = vrot.lane.b32.xlu1 %v1956_v52, %s2846_s30  ;;  %1942 = vrot.lane.b32.xlu0 %v1934_v53, %s2844_s28  ;;  %v1835_v52 = vsel %vm654_vm3, %v4450_v51, %v4471_v16  ;;  %v1818_v53 = vadd.f32 %v1813_v63, %v1796_v3  ;;  %s2616_s28 = sld [smem:[#allocation7 + $0x5c]] }
 0x28d   : > { %v4498_v50 = vpop.permute.xlu1 %2048  ;;  %v4500_v48 = vpop.permute.xlu0 %2026  ;;  %v1840_v6 = vadd.f32 %v1835_v52, %v1818_v53  ;;  %v2000_v53 = vmul.f32 %v1997_v43, %v4211_v2 }
 0x28e   : > { %5617 = vst [vmem:[#allocation125_spill] sm:$0xff] %v4498_v50  ;;  %5618 = vst [vmem:[#allocation126_spill] sm:$0xff] %v4500_v48  ;;  %v1998_v50 = vmul.f32 %v1997_v43, %v3889_v37  ;;  %v1976_v48 = vmul.f32 %v1975_v59, %v5555_v5 }
 0x28f   : > { %1984 = vrot.lane.b32.xlu1 %v1977_v8, %s2846_s30  ;;  %1962 = vrot.lane.b32.xlu0 %v1955_v36, %s2846_s30  ;;  %v1862_v36 = vadd.f32 %v1857_v60, %v1840_v6  ;;  %v1999_v6 = vmul.f32 %v1997_v43, %v5564_v12  ;;  %v811_v43 = vsel %vm654_vm3, %v4035_v31, %v4015_v39 }
 0x291   : > { %v4512_v1 = vpop.permute.xlu1 %2052  ;;  %v4514_v57 = vpop.permute.xlu0 %2030  ;;  %v2195_v59 = vstv %s2616_s28 }
 0x292   : > { %5619 = vst [vmem:[#allocation127_spill] sm:$0xff] %v4514_v57  ;;  %v2033_v63 = vsel %vm964_vm12, %v4484_v17, %v4514_v57  ;;  %v2173_v57 = vstv %s2615_s9  ;;  %s201_s9 = scalar_lea.vmem [#allocation8], %s2519_s11 }
 0x293   : > { %2004 = vrot.lane.b32.xlu1 %v1998_v50, %s2846_s30  ;;  %1982 = vrot.lane.b32.xlu0 %v1976_v48, %s2846_s30  ;;  %v2038_v3 = vadd.f32 %v2033_v63, %v1862_v36  ;;  %v2175_v60 = vmul.f32 %v2173_v57, %v3789_v38  ;;  %v2174_v36 = vmul.f32 %v2173_v57, %v3053_v46  ;;  %s2429_s28 = sshll.u32 %s201_s9, 4  ;;  %s5201_s28 = int_to_ptr.vmem [resolvable:$true] %s2429_s28 }
 0x294   : > { %v817_v38 = vadd.f32 %v4015_v39, %v3935_v4  ;;  %v2176_v46 = vmul.f32 %v2173_v57, %v5540_v30  ;;  %v833_v4 = vsel %vm654_vm3, %v4186_v47, %v4093_v41  ;;  %v816_v39 = vadd.f32 %v811_v43, %v3963_v45  ;;  %v5623_v45 = vld [vmem:[#allocation51_spill] sm:$0xff]  ;;  %s2762_s11 = scalar_lea.vmem %s5201_s28, 128 }
 0x295   : > { %v4523_v8 = vpop.permute.xlu1 %2072  ;;  %v4525_v52 = vpop.permute.xlu0 %2050  ;;  %v855_v30 = vsel %vm654_vm3, %v4204_v24, %v4077_v49  ;;  %v810_v57 = vsel %vm654_vm3, %v5623_v45, %v4035_v31  ;;  %p2763_p9 = scmp.ne.s32.totalorder %s5201_s28, %s2762_s11 }
 0x296   : > { %v2055_v32 = vsel %vm964_vm12, %v4525_v52, %v4512_v1  ;;  %v815_v31 = vadd.f32 %v810_v57, %v3961_v14 }
 0x297   : > { %v4532_v17 = vadd.f32 %v2055_v32, %v2038_v3  ;;  %2008 = vrot.lane.b32.xlu1 %v2000_v53, %s2846_s30  ;;  %1986 = vrot.lane.b32.xlu0 %v1978_v26, %s2846_s30  ;;  %v2196_v26 = vmul.f32 %v2195_v59, %v3748_v33  ;;  %v839_v3 = vadd.f32 %v4093_v41, %v817_v38  ;;  %p2764_p13 = pnand %p2763_p9, %p5762_p11 }
 0x298   : > { %v2198_v33 = vmul.f32 %v2195_v59, %v5547_v54  ;;  %v2239_v54 = vstv %s2618_s18 }
 0x299   : > { %5620 = vst [vmem:[#allocation128_spill] sm:$0xff] %v4532_v17  ;;  %v4536_v48 = vpop.permute.xlu1 %2092  ;;  %v4538_v50 = vpop.permute.xlu0 %2070  ;;  %v5639_v17 = vld [vmem:[#allocation58_spill] sm:$0xff]  ;;  %p2765_p7 = pneg %p2764_p13 }
 0x29b   : > { %2182 = vrot.lane.b32.xlu1 %v2175_v60, %s2847_s4  ;;  %2006 = vrot.lane.b32.xlu0 %v1999_v6, %s2846_s30  ;;  %s4564_s30 = sld [smem:[#allocation7 + $0x2f]]  ;;  %v2217_v6 = vstv %s2617_s13 }
 0x29c   : > { %v2219_v41 = vmul.f32 %v2217_v6, %v3780_v0  ;;  %v832_v0 = vsel %vm654_vm3, %v4196_v61, %v4186_v47  ;;  %v854_v47 = vsel %vm654_vm3, %v4194_v56, %v4204_v24  ;;  %v2218_v14 = vmul.f32 %v2217_v6, %v3744_v9 }
 0x29d   : > { %v4544_v32 = vpop.permute.xlu1 %2096  ;;  %v4546_v63 = vpop.permute.xlu0 %2074  ;;  %v1463_v56 = vstv %s4576_s12  ;;  %v1471_v24 = vstv %s4578_s21  ;;  %v899_v9 = vsel %vm654_vm3, %v4222_v18, %v4083_v62 }
 0x29e   : > { %5621 = vst [vmem:[#allocation129_spill] sm:$0xff] %v4544_v32  ;;  %v5649_v32 = vld [vmem:[#allocation53_spill] sm:$0xff] }
 0x29f   : > { %2202 = vrot.lane.b32.xlu1 %v2196_v26, %s2847_s4  ;;  %2180 = vrot.lane.b32.xlu0 %v2174_v36, %s2847_s4  ;;  %v861_v26 = vadd.f32 %v4077_v49, %v839_v3  ;;  %v838_v36 = vadd.f32 %v833_v4, %v816_v39  ;;  %v2240_v49 = vmul.f32 %v2239_v54, %v5530_v13  ;;  %v2261_v39 = vstv %s4569_s24 }
 0x2a0   : > { %v2242_v3 = vmul.f32 %v2239_v54, %v5534_v44  ;;  %v877_v44 = vsel %vm721_vm0, %v3943_v40, %v3965_v58 }
 0x2a1   : > { %v4558_v53 = vpop.permute.xlu1 %2116  ;;  %v4560_v60 = vpop.permute.xlu0 %2094  ;;  %v883_v61 = vadd.f32 %v3965_v58, %v861_v26  ;;  %v1373_v13 = vstv %s4564_s30  ;;  %v1479_v58 = vstv %s4584_s26  ;;  %s5199_s30 = scalar_lea.hbm %s5246_s3, %s2631_s8 }
 0x2a2   : > { %5622 = vst [vmem:[#allocation130_spill] sm:$0xff] %v4558_v53  ;;  %v4629_v45 = vmul.f32 %v1373_v13, %v3771_v11  ;;  %v5657_v53 = vld [vmem:[#allocation111_spill] sm:$0xff] }
 0x2a3   : > { %2206 = vrot.lane.b32.xlu1 %v2198_v33, %s2847_s4  ;;  %2184 = vrot.lane.b32.xlu0 %v2176_v46, %s2847_s4  ;;  %v2197_v33 = vmul.f32 %v2195_v59, %v3752_v10  ;;  %v860_v46 = vadd.f32 %v855_v30, %v838_v36  ;;  %v2241_v10 = vmul.f32 %v2239_v54, %v3175_v20  ;;  %v1395_v30 = vstv %s4571_s27 }
 0x2a4   : > { %v837_v20 = vadd.f32 %v832_v0, %v815_v31  ;;  %v905_v57 = vadd.f32 %v4083_v62, %v883_v61  ;;  %v4639_v0 = vmul.f32 %v1373_v13, %v3579_v35  ;;  %v5630_v31 = vld [vmem:[#allocation45_spill] sm:$0xff]  ;;  %v5631_v62 = vld [vmem:[#allocation60_spill] sm:$0xff]  ;;  %v1466_v35 = vmul.f32 %v1463_v56, %v4182_v19 }
 0x2a5   : > { %v4590_v38 = vpop.permute.xlu1 %2136  ;;  %v4592_v43 = vpop.permute.xlu0 %2114  ;;  %v876_v11 = vsel %vm721_vm0, %v5630_v31, %v3943_v40  ;;  %v4651_v61 = vmul.f32 %v1395_v30, %v5631_v62  ;;  %v5634_v40 = vld [vmem:[#allocation68_spill] sm:$0xff] }
 0x2a6   : > { %5624 = vst [vmem:[#allocation51_spill] sm:$0xff] %v4590_v38  ;;  %5625 = vst [vmem:[#allocation131_spill] sm:$0xff] %v4592_v43  ;;  %v859_v54 = vadd.f32 %v854_v47, %v837_v20  ;;  %v5632_v47 = vld [vmem:[#allocation26_spill] sm:$0xff]  ;;  %v2264_v20 = vmul.f32 %v2261_v39, %v4182_v19  ;;  %v5640_v19 = vld [vmem:[#allocation43_spill] sm:$0xff] }
 0x2a7   : > { %2226 = vrot.lane.b32.xlu1 %v2219_v41, %s2847_s4  ;;  %2204 = vrot.lane.b32.xlu0 %v2197_v33, %s2847_s4  ;;  %v882_v41 = vadd.f32 %v877_v44, %v860_v46  ;;  %v2220_v33 = vmul.f32 %v2217_v6, %v3776_v27  ;;  %v4642_v46 = vmul.f32 %v1373_v13, %v3389_v55  ;;  %v4661_v6 = vstv %s4600_s29  ;;  %v5656_v43 = vld [vmem:[#allocation87_spill] sm:$0xff] }
 0x2a8   : > { %v2262_v55 = vmul.f32 %v2261_v39, %v3819_v28  ;;  %v881_v44 = vadd.f32 %v876_v11, %v859_v54  ;;  %v5641_v11 = vld [vmem:[#allocation22_spill] sm:$0xff] }
 0x2a9   : > { %v4610_v59 = vpop.permute.xlu1 %2140  ;;  %v4612_v4 = vpop.permute.xlu0 %2118  ;;  %v904_v27 = vadd.f32 %v899_v9, %v882_v41  ;;  %v5636_v41 = vld [vmem:[#allocation16_spill] sm:$0xff]  ;;  %v5637_v9 = vld [vmem:[#allocation78_spill] sm:$0xff] }
 0x2aa   : > { %5626 = vst [vmem:[#allocation132_spill] sm:$0xff] %v4610_v59  ;;  %5627 = vst [vmem:[#allocation133_spill] sm:$0xff] %v4612_v4  ;;  %v2263_v59 = vmul.f32 %v2261_v39, %v3823_v25  ;;  %v921_v54 = vsel %vm654_vm3, %v5639_v17, %v5636_v41 }
 0x2ab   : > { %2246 = vrot.lane.b32.xlu1 %v2240_v49, %s2848_s22  ;;  %2224 = vrot.lane.b32.xlu0 %v2218_v14, %s2847_s4  ;;  %v4648_v49 = vmul.f32 %v1395_v30, %v3583_v21  ;;  %v4654_v14 = vmul.f32 %v1395_v30, %v5632_v47  ;;  %v5635_v21 = vld [vmem:[#allocation29_spill] sm:$0xff]  ;;  %v1464_v30 = vmul.f32 %v1463_v56, %v3819_v28 }
 0x2ac   : > { %v4666_v13 = vsel %vm1031_vm9, %v5635_v21, %v5634_v40  ;;  %v1465_v47 = vmul.f32 %v1463_v56, %v3823_v25  ;;  %v943_v28 = vsel %vm654_vm3, %v5641_v11, %v5640_v19  ;;  %v926_v56 = vadd.f32 %v921_v54, %v904_v27 }
 0x2ad   : > { %v4633_v26 = vpop.permute.xlu1 %2160  ;;  %v4635_v36 = vpop.permute.xlu0 %2138  ;;  %5633 = vst [vmem:[#allocation45_spill] sm:$0xff] %v4654_v14  ;;  %v4693_v25 = vmul.f32 %v1479_v58, %v3889_v37 }
 0x2ae   : > { %5628 = vst [vmem:[#allocation134_spill] sm:$0xff] %v4633_v26  ;;  %5629 = vst [vmem:[#allocation135_spill] sm:$0xff] %v4635_v36  ;;  %v5643_v26 = vld [vmem:[#allocation109_spill] sm:$0xff] }
 0x2af   : > { %2250 = vrot.lane.b32.xlu1 %v2242_v3, %s2848_s22  ;;  %2228 = vrot.lane.b32.xlu0 %v2220_v33, %s2847_s4  ;;  %v927_v3 = vadd.f32 %v5636_v41, %v905_v57  ;;  %v898_v33 = vsel %vm654_vm3, %v5637_v9, %v4222_v18  ;;  %v5642_v57 = vld [vmem:[#allocation64_spill] sm:$0xff]  ;;  %v1472_v18 = vmul.f32 %v1471_v24, %v5555_v5  ;;  %v5644_v9 = vld [vmem:[#allocation25_spill] sm:$0xff] }
 0x2b0   : > { %v1731_v4 = vadd.f32 %v5643_v26, %v5642_v57  ;;  %v903_v39 = vadd.f32 %v898_v33, %v881_v44  ;;  %v2284_v26 = vmul.f32 %v4661_v6, %v5555_v5  ;;  %v1473_v57 = vmul.f32 %v1471_v24, %v3862_v7  ;;  %v5647_v33 = vld [vmem:[#allocation34_spill] sm:$0xff]  ;;  %v5648_v36 = vld [vmem:[#allocation37_spill] sm:$0xff] }
 0x2b1   : > { %v1449_v31 = vpop.permute.xlu1 %1448  ;;  %v4674_v62 = vpop.permute.xlu0 %2158  ;;  %v949_v38 = vadd.f32 %v5640_v19, %v927_v3  ;;  %v1482_v5 = vmul.f32 %v1479_v58, %v4211_v2  ;;  %v1120_v3 = vsel %vm964_vm12, %v5649_v32, %v5648_v36  ;;  %v5650_v19 = vld [vmem:[#allocation18_spill] sm:$0xff] }
 0x2b2   : > { %5638 = vst [vmem:[#allocation60_spill] sm:$0xff] %v4674_v62  ;;  %v920_v62 = vsel %vm654_vm3, %v5644_v9, %v5639_v17  ;;  %v1753_v41 = vadd.f32 %v4420_v34, %v1731_v4  ;;  %v5645_v17 = vld [vmem:[#allocation61_spill] sm:$0xff]  ;;  %v1474_v9 = vmul.f32 %v1471_v24, %v4216_v23  ;;  %v1481_v4 = vmul.f32 %v1479_v58, %v5564_v12 }
 0x2b3   : > { %2268 = vrot.lane.b32.xlu1 %v2262_v55, %s2847_s4  ;;  %2248 = vrot.lane.b32.xlu0 %v2241_v10, %s2848_s22  ;;  %v942_v27 = vsel %vm654_vm3, %v5645_v17, %v5641_v11  ;;  %v948_v55 = vadd.f32 %v943_v28, %v926_v56  ;;  %v925_v44 = vadd.f32 %v920_v62, %v903_v39  ;;  %v5651_v28 = vld [vmem:[#allocation47_spill] sm:$0xff]  ;;  %v5652_v56 = vld [vmem:[#allocation113_spill] sm:$0xff]  ;;  %v5654_v17 = vld [vmem:[#allocation116_spill] sm:$0xff]  ;;  %s4740_s22 = sld [smem:[#allocation7 + $0x61]] }
 0x2b4   : > { %v1121_v11 = vsel %vm964_vm12, %v5648_v36, %v5650_v19  ;;  %v2286_v24 = vmul.f32 %v4661_v6, %v4216_v23  ;;  %v5653_v39 = vld [vmem:[#allocation59_spill] sm:$0xff]  ;;  %v5655_v36 = vld [vmem:[#allocation69_spill] sm:$0xff] }
 0x2b5   : > { %v1453_v54 = vpop.permute.xlu1 %1452  ;;  %v4703_v10 = vpop.permute.xlu0 %2162  ;;  %v947_v62 = vadd.f32 %v942_v27, %v925_v44  ;;  %v1724_v58 = vsel %vm654_vm3, %v5653_v39, %v5652_v56  ;;  %v1126_v14 = vadd.f32 %v1121_v11, %v948_v55  ;;  %v5660_v55 = vld [vmem:[#allocation66_spill] sm:$0xff]  ;;  %v5661_v11 = vld [vmem:[#allocation67_spill] sm:$0xff] }
 0x2b6   : > { %5646 = vst [vmem:[#allocation26_spill] sm:$0xff] %v4703_v10  ;;  %v1461_v34 = vadd.f32 %v1453_v54, %v5647_v33  ;;  %v1775_v33 = vadd.f32 %v5654_v17, %v1753_v41  ;;  %v1127_v10 = vadd.f32 %v5650_v19, %v949_v38  ;;  %v5662_v17 = vld [vmem:[#allocation117_spill] sm:$0xff] }
 0x2b7   : > { %2272 = vrot.lane.b32.xlu1 %v2264_v20, %s2847_s4  ;;  %1362 = vrot.lane.b32.xlu0 %v5651_v28, %s2847_s4  ;;  %v1143_v20 = vsel %vm964_vm12, %v5656_v43, %v5655_v36  ;;  %v5658_v28 = vld [vmem:[#allocation115_spill] sm:$0xff] }
 0x2b8   : > { %v1469_v32 = vadd.f32 %v1466_v35, %v1461_v34  ;;  %v1746_v12 = vsel %vm654_vm3, %v5658_v28, %v5657_v53  ;;  %v1797_v44 = vadd.f32 %v4444_v29, %v1775_v33  ;;  %v5659_v34 = vld [vmem:[#allocation112_spill] sm:$0xff]  ;;  %v1148_v53 = vadd.f32 %v1143_v20, %v1126_v14  ;;  %v5667_v14 = vld [vmem:[#allocation119_spill] sm:$0xff] }
 0x2b9   : > { %v1567_v23 = vpop.permute.xlu1 %1566  ;;  %v1451_v27 = vpop.permute.xlu0 %1450  ;;  %v1729_v38 = vadd.f32 %v1724_v58, %v5659_v34  ;;  %v1125_v29 = vadd.f32 %v1120_v3, %v947_v62  ;;  %v5664_v58 = vld [vmem:[#allocation90_spill] sm:$0xff]  ;;  %v1790_v3 = vsel %vm721_vm0, %v5667_v14, %v4426_v42 }
 0x2ba   : > { %v1454_v56 = vsel %vm537_vm4, %v1449_v31, %v1451_v27  ;;  %v1455_v41 = vsel %vm537_vm4, %v1451_v27, %v1453_v54  ;;  %v1477_v35 = vadd.f32 %v1474_v9, %v1469_v32  ;;  %v5663_v31 = vld [vmem:[#allocation114_spill] sm:$0xff]  ;;  %v1142_v33 = vsel %vm964_vm12, %v5664_v58, %v5656_v43 }
 0x2bb   : > { %v1459_v19 = vadd.f32 %v1454_v56, %v5660_v55  ;;  %v1460_v39 = vadd.f32 %v1455_v41, %v5661_v11  ;;  %1382 = vrot.lane.b32.xlu1 %v4629_v45, %s2847_s4  ;;  %2270 = vrot.lane.b32.xlu0 %v2263_v59, %s2847_s4  ;;  %v1768_v54 = vsel %vm654_vm3, %v5663_v31, %v5662_v17  ;;  %v5665_v41 = vld [vmem:[#allocation20_spill] sm:$0xff] }
 0x2bc   : > { %v1485_v9 = vadd.f32 %v1482_v5, %v1477_v35  ;;  %v1751_v32 = vadd.f32 %v1746_v12, %v1729_v38  ;;  %v5666_v59 = vld [vmem:[#allocation92_spill] sm:$0xff]  ;;  %v1819_v62 = vadd.f32 %v4442_v22, %v1797_v44  ;;  %v1149_v43 = vadd.f32 %v5655_v36, %v1127_v10  ;;  %v5670_v10 = vld [vmem:[#allocation121_spill] sm:$0xff] }
 0x2bd   : > { %v1467_v28 = vadd.f32 %v1464_v30, %v1459_v19  ;;  %v1468_v27 = vadd.f32 %v1465_v47, %v1460_v39  ;;  %v1587_v56 = vpop.permute.xlu1 %1586  ;;  %v1565_v45 = vpop.permute.xlu0 %1564  ;;  %v1165_v34 = vsel %vm964_vm12, %v5666_v59, %v5665_v41  ;;  %v1147_v30 = vadd.f32 %v1142_v33, %v1125_v29  ;;  %v5668_v47 = vld [vmem:[#allocation118_spill] sm:$0xff]  ;;  %v5671_v29 = vld [vmem:[#allocation124_spill] sm:$0xff] }
 0x2be   : > { %v1570_v5 = vsel %vm654_vm3, %v1565_v45, %v1567_v23  ;;  %v1773_v20 = vadd.f32 %v1768_v54, %v1751_v32  ;;  %v1812_v38 = vsel %vm654_vm3, %v5668_v47, %v4452_v15  ;;  %v1841_v42 = vadd.f32 %v4471_v16, %v1819_v62  ;;  %v5672_v17 = vld [vmem:[#allocation120_spill] sm:$0xff]  ;;  %v5673_v54 = vld [vmem:[#allocation122_spill] sm:$0xff] }
 0x2bf   : > { %v1475_v35 = vadd.f32 %v1472_v18, %v1467_v28  ;;  %2290 = vrot.lane.b32.xlu1 %v2284_v26, %s2847_s4  ;;  %1380 = vrot.lane.b32.xlu0 %v4639_v0, %s2847_s4  ;;  %v1476_v12 = vadd.f32 %v1473_v57, %v1468_v27  ;;  %v1170_v22 = vadd.f32 %v1165_v34, %v1148_v53  ;;  %v5669_v0 = vld [vmem:[#allocation89_spill] sm:$0xff]  ;;  %v5675_v27 = vld [vmem:[#allocation126_spill] sm:$0xff] }
 0x2c0   : > { %v1795_v44 = vadd.f32 %v1790_v3, %v1773_v20  ;;  %v1164_v57 = vsel %vm964_vm12, %v5669_v0, %v5666_v59  ;;  %v1834_v36 = vsel %vm654_vm3, %v5670_v10, %v4450_v51  ;;  %v1856_v31 = vsel %vm654_vm3, %v5672_v17, %v5671_v29  ;;  %v5678_v20 = vld [vmem:[#allocation14_spill] sm:$0xff]  ;;  %v5682_v0 = vld [vmem:[#allocation63_spill] sm:$0xff]  ;;  %v5684_v10 = vld [vmem:[#allocation93_spill] sm:$0xff] }
 0x2c1   : > { %v1483_v18 = vadd.f32 %v4693_v25, %v1475_v35  ;;  %v1591_v55 = vpop.permute.xlu1 %1590  ;;  %v1484_v26 = vadd.f32 %v1481_v4, %v1476_v12  ;;  %v1569_v19 = vpop.permute.xlu0 %1568  ;;  %v2305_v25 = vstv %s4740_s22  ;;  %v1171_v4 = vadd.f32 %v5665_v41, %v1149_v43  ;;  %v5676_v41 = vld [vmem:[#allocation127_spill] sm:$0xff]  ;;  %v5679_v35 = vld [vmem:[#allocation94_spill] sm:$0xff]  ;;  %v5680_v12 = vld [vmem:[#allocation125_spill] sm:$0xff] }
 0x2c2   : > { %v1571_v15 = vsel %vm654_vm3, %v1567_v23, %v1569_v19  ;;  %v1577_v11 = vadd.f32 %v1569_v19, %v1485_v9  ;;  %v1817_v16 = vadd.f32 %v1812_v38, %v1795_v44  ;;  %v1863_v51 = vadd.f32 %v5673_v54, %v1841_v42  ;;  %v5687_v29 = vld [vmem:[#allocation98_spill] sm:$0xff] }
 0x2c3   : > { %v1575_v39 = vadd.f32 %v1570_v5, %v1483_v18  ;;  %v1576_v53 = vadd.f32 %v1571_v15, %v1484_v26  ;;  %2294 = vrot.lane.b32.xlu1 %v2286_v24, %s2847_s4  ;;  %1384 = vrot.lane.b32.xlu0 %v4642_v46, %s2847_s4  ;;  %v1169_v23 = vadd.f32 %v1164_v57, %v1147_v30  ;;  %v5674_v46 = vld [vmem:[#allocation123_spill] sm:$0xff]  ;;  %v5683_v57 = vld [vmem:[#allocation70_spill] sm:$0xff] }
 0x2c4   : > { %v1599_v58 = vadd.f32 %v1591_v55, %v1577_v11  ;;  %v1192_v9 = vadd.f32 %v4666_v13, %v1170_v22  ;;  %v1839_v33 = vadd.f32 %v1834_v36, %v1817_v16  ;;  %v2285_v24 = vmul.f32 %v4661_v6, %v3862_v7  ;;  %v5677_v7 = vld [vmem:[#allocation49_spill] sm:$0xff]  ;;  %v5685_v11 = vld [vmem:[#allocation96_spill] sm:$0xff] }
 0x2c5   : > { %v1611_v32 = vpop.permute.xlu1 %1610  ;;  %v1589_v28 = vpop.permute.xlu0 %1588  ;;  %v2032_v45 = vsel %vm964_vm12, %v5675_v27, %v5674_v46  ;;  %v2039_v59 = vadd.f32 %v5676_v41, %v1863_v51  ;;  %v1186_v6 = vsel %vm1031_vm9, %v5677_v7, %v5635_v21  ;;  %v1193_v13 = vadd.f32 %v5634_v40, %v1171_v4  ;;  %v5681_v21 = vld [vmem:[#allocation91_spill] sm:$0xff]  ;;  %v5686_v4 = vld [vmem:[#allocation46_spill] sm:$0xff]  ;;  %v5691_v46 = vld [vmem:[#allocation129_spill] sm:$0xff] }
 0x2c6   : > { %v1592_v34 = vsel %vm654_vm3, %v1587_v56, %v1589_v28  ;;  %v1593_v14 = vsel %vm654_vm3, %v1589_v28, %v1591_v55  ;;  %v1861_v3 = vadd.f32 %v1856_v31, %v1839_v33  ;;  %v1209_v56 = vsel %vm964_vm12, %v5679_v35, %v5678_v20  ;;  %v5688_v31 = vld [vmem:[#allocation130_spill] sm:$0xff]  ;;  %v5690_v28 = vld [vmem:[#allocation45_spill] sm:$0xff]  ;;  %v5693_v41 = vld [vmem:[#allocation51_spill] sm:$0xff] }
 0x2c7   : > { %v1597_v62 = vadd.f32 %v1592_v34, %v1575_v39  ;;  %v1598_v5 = vadd.f32 %v1593_v14, %v1576_v53  ;;  %1404 = vrot.lane.b32.xlu1 %v4648_v49, %s2847_s4  ;;  %2292 = vrot.lane.b32.xlu0 %v2285_v24, %s2847_s4  ;;  %v2054_v43 = vsel %vm964_vm12, %v5680_v12, %v4525_v52  ;;  %v5694_v14 = vld [vmem:[#allocation95_spill] sm:$0xff] }
 0x2c8   : > { %v1191_v30 = vadd.f32 %v1186_v6, %v1169_v23  ;;  %v2037_v47 = vadd.f32 %v2032_v45, %v1861_v3  ;;  %v2306_v42 = vmul.f32 %v2305_v25, %v3889_v37  ;;  %v2308_v22 = vmul.f32 %v2305_v25, %v4211_v2  ;;  %v5692_v45 = vld [vmem:[#allocation135_spill] sm:$0xff]  ;;  %v5695_v6 = vld [vmem:[#allocation133_spill] sm:$0xff] }
 0x2c9   : > { %v1631_v38 = vpop.permute.xlu1 %1630  ;;  %v1609_v49 = vpop.permute.xlu0 %1608  ;;  %v1208_v40 = vsel %vm964_vm12, %v5681_v21, %v5679_v35  ;;  %v2076_v44 = vsel %vm964_vm12, %v4538_v50, %v4523_v8  ;;  %v2061_v18 = vadd.f32 %v4512_v1, %v2039_v59  ;;  %v1214_v55 = vadd.f32 %v1209_v56, %v1192_v9  ;;  %v5697_v35 = vld [vmem:[#allocation60_spill] sm:$0xff] }
 0x2ca   : > { %v1614_v52 = vsel %vm654_vm3, %v1609_v49, %v1611_v32  ;;  %v2059_v26 = vadd.f32 %v2054_v43, %v2037_v47  ;;  %v1215_v37 = vadd.f32 %v5678_v20, %v1193_v13  ;;  %v2098_v50 = vsel %vm1031_vm9, %v4536_v48, %v4560_v60  ;;  %v5689_v48 = vld [vmem:[#allocation131_spill] sm:$0xff]  ;;  %v5696_v20 = vld [vmem:[#allocation134_spill] sm:$0xff] }
 0x2cb   : > { %v1619_v19 = vadd.f32 %v1614_v52, %v1597_v62  ;;  %2312 = vrot.lane.b32.xlu1 %v2306_v42, %s2847_s4  ;;  %1402 = vrot.lane.b32.xlu0 %v4651_v61, %s2847_s4  ;;  %v2083_v2 = vadd.f32 %v4546_v63, %v2061_v18  ;;  %v2307_v1 = vmul.f32 %v2305_v25, %v5682_v0  ;;  %v5700_v0 = vld [vmem:[#allocation26_spill] sm:$0xff] }
 0x2cc   : > { %v1231_v36 = vsel %vm964_vm12, %v5684_v10, %v5683_v57  ;;  %v1213_v15 = vadd.f32 %v1208_v40, %v1191_v30  ;;  %v1230_v16 = vsel %vm964_vm12, %v5685_v11, %v5684_v10  ;;  %v2081_v61 = vadd.f32 %v2076_v44, %v2059_v26  ;;  %v5699_v26 = vld [vmem:[#allocation132_spill] sm:$0xff] }
 0x2cd   : > { %v1635_v39 = vpop.permute.xlu1 %1634  ;;  %v1613_v53 = vpop.permute.xlu0 %1612  ;;  %v1253_v17 = vsel %vm964_vm12, %v5687_v29, %v5686_v4  ;;  %v2120_v25 = vsel %vm964_vm12, %v5689_v48, %v5688_v31  ;;  %v1236_v23 = vadd.f32 %v1231_v36, %v1214_v55  ;;  %v2105_v27 = vadd.f32 %v5691_v46, %v2083_v2 }
 0x2ce   : > { %v1615_v54 = vsel %vm654_vm3, %v1611_v32, %v1613_v53  ;;  %v1621_v51 = vadd.f32 %v1613_v53, %v1599_v58  ;;  %v2103_v9 = vadd.f32 %v2098_v50, %v2081_v61  ;;  %v1235_v24 = vadd.f32 %v1230_v16, %v1213_v15 }
 0x2cf   : > { %v1620_v33 = vadd.f32 %v1615_v54, %v1598_v5  ;;  %2316 = vrot.lane.b32.xlu1 %v2308_v22, %s2847_s4  ;;  %1406 = vrot.lane.b32.xlu0 %v5690_v28, %s2847_s4  ;;  %v2142_v59 = vsel %vm964_vm12, %v5693_v41, %v5692_v45  ;;  %v1252_v58 = vsel %vm964_vm12, %v5694_v14, %v5687_v29  ;;  %v5698_v22 = vld [vmem:[#allocation128_spill] sm:$0xff] }
 0x2d0   : > { %v1643_v34 = vadd.f32 %v1635_v39, %v1621_v51  ;;  %v1258_v32 = vadd.f32 %v1253_v17, %v1236_v23  ;;  %v2077_v3 = vsel %vm964_vm12, %v4523_v8, %v4546_v63  ;;  %v2125_v62 = vadd.f32 %v2120_v25, %v2103_v9 }
 0x2d1   : > { %v1655_v5 = vpop.permute.xlu1 %1654  ;;  %v1633_v7 = vpop.permute.xlu0 %1632  ;;  %v2127_v13 = vadd.f32 %v5695_v6, %v2105_v27  ;;  %v2164_v56 = vsel %vm964_vm12, %v5697_v35, %v5696_v20  ;;  %v2099_v8 = vsel %vm1031_vm9, %v4560_v60, %v5691_v46  ;;  %v1237_v63 = vadd.f32 %v5683_v57, %v1215_v37 }
 0x2d2   : > { %v1636_v12 = vsel %vm721_vm0, %v1631_v38, %v1633_v7  ;;  %v1637_v43 = vsel %vm721_vm0, %v1633_v7, %v1635_v39  ;;  %v2147_v30 = vadd.f32 %v2142_v59, %v2125_v62  ;;  %v1257_v42 = vadd.f32 %v1252_v58, %v1235_v24 }
 0x2d3   : > { %v1641_v47 = vadd.f32 %v1636_v12, %v1619_v19  ;;  %v1642_v49 = vadd.f32 %v1637_v43, %v1620_v33  ;;  %2331 = vrot.lane.b32.xlu1 %v1258_v32, %s2849_s7  ;;  %2314 = vrot.lane.b32.xlu0 %v2307_v1, %s2847_s4  ;;  %v2082_v21 = vadd.f32 %v2077_v3, %v5698_v22  ;;  %s5114_s4 = sld [smem:[#allocation2]] }
 0x2d4   : > { %v2169_v38 = vadd.f32 %v2164_v56, %v2147_v30  ;;  %v2121_v18 = vsel %vm964_vm12, %v5688_v31, %v5695_v6  ;;  %v2149_v19 = vadd.f32 %v5699_v26, %v2127_v13  ;;  %v2143_v60 = vsel %vm964_vm12, %v5692_v45, %v5699_v26 }
 0x2d5   : > { %v1675_v40 = vpop.permute.xlu1 %1674  ;;  %v1653_v44 = vpop.permute.xlu0 %1652  ;;  %v2104_v55 = vadd.f32 %v2099_v8, %v2082_v21  ;;  %v1259_v37 = vadd.f32 %v5686_v4, %v1237_v63  ;;  %v2165_v36 = vsel %vm964_vm12, %v5696_v20, %v5700_v0 }
 0x2d6   : > { %v1658_v52 = vsel %vm654_vm3, %v1653_v44, %v1655_v5  ;;  %v2171_v1 = vadd.f32 %v5700_v0, %v2149_v19 }
 0x2d7   : > { %v1663_v2 = vadd.f32 %v1658_v52, %v1641_v47  ;;  %2329 = vrot.lane.b32.xlu0 %v1257_v42, %s2849_s7  ;;  %2347 = vrot.lane.b32.xlu1 %v2169_v38, %s2849_s7  ;;  %v2126_v50 = vadd.f32 %v2121_v18, %v2104_v55 }
 0x2d9   : > { %v1679_v57 = vpop.permute.xlu1 %1678  ;;  %v1657_v10 = vpop.permute.xlu0 %1656  ;;  %v2148_v16 = vadd.f32 %v2143_v60, %v2126_v50 }
 0x2da   : > { %v1659_v15 = vsel %vm654_vm3, %v1655_v5, %v1657_v10  ;;  %v1665_v11 = vadd.f32 %v1657_v10, %v1643_v34  ;;  %v5701_v10 = vld [vmem:[#allocation33_spill] sm:$0xff] }
 0x2db   : > { %v1664_v61 = vadd.f32 %v1659_v15, %v1642_v49  ;;  %2333 = vrot.lane.b32.xlu0 %v1259_v37, %s2849_s7  ;;  %2351 = vrot.lane.b32.xlu1 %v2171_v1, %s2849_s7  ;;  %v2170_v53 = vadd.f32 %v2165_v36, %v2148_v16  ;;  %v5702_v36 = vld [vmem:[#allocation65_spill] sm:$0xff] }
 0x2dc   : > { %v1687_v39 = vadd.f32 %v1679_v57, %v1665_v11  ;;  %v656_v15 = vsel %vm654_vm3, %v5702_v36, %v5701_v10 }
 0x2dd   : > { %v1699_v4 = vpop.permute.xlu1 %1698  ;;  %v1677_v29 = vpop.permute.xlu0 %1676 }
 0x2de   : > { %v1680_v17 = vsel %vm654_vm3, %v1675_v40, %v1677_v29  ;;  %v1681_v31 = vsel %vm654_vm3, %v1677_v29, %v1679_v57 }
 0x2df   : > { %v1685_v48 = vadd.f32 %v1680_v17, %v1663_v2  ;;  %v1686_v25 = vadd.f32 %v1681_v31, %v1664_v61  ;;  %2349 = vrot.lane.b32.xlu0 %v2170_v53, %s2849_s7  ;;  %v5703_v61 = vld [vmem:[#allocation27_spill] sm:$0xff]  ;;  %v5704_v53 = vld [vmem:[#allocation40_spill] sm:$0xff]  ;;  %v5706_v17 = vld [vmem:[#allocation30_spill] sm:$0xff] }
 0x2e0   : > { %v661_v31 = vadd.f32 %v656_v15, %v5706_v17  ;;  %v5721_v15 = vld [vmem:[#allocation57_spill] sm:$0xff] }
 0x2e1   : > { %v1873_v54 = vpop.permute.xlu1 %1872  ;;  %v1697_v51 = vpop.permute.xlu0 %1696 }
 0x2e2   : > { %v1702_v23 = vsel %vm654_vm3, %v1697_v51, %v1699_v4  ;;  %v5707_v51 = vld [vmem:[#allocation52_spill] sm:$0xff] }
 0x2e3   : > { %v1707_v9 = vadd.f32 %v1702_v23, %v1685_v48  ;;  %v655_v23 = vsel %vm654_vm3, %v5707_v51, %v5702_v36  ;;  %v5724_v51 = vld [vmem:[#allocation23_spill] sm:$0xff] }
 0x2e5   : > { %v1877_v33 = vpop.permute.xlu1 %1876  ;;  %v1701_v28 = vpop.permute.xlu0 %1700 }
 0x2e6   : > { %v1703_v24 = vsel %vm654_vm3, %v1699_v4, %v1701_v28  ;;  %v1709_v46 = vadd.f32 %v1701_v28, %v1687_v39  ;;  %v662_v39 = vadd.f32 %v5701_v10, %v5703_v61  ;;  %v5705_v4 = vld [vmem:[#allocation72_spill] sm:$0xff] }
 0x2e7   : > { %v1708_v27 = vadd.f32 %v1703_v24, %v1686_v25  ;;  %v678_v29 = vsel %vm654_vm3, %v5705_v4, %v5704_v53  ;;  %v5709_v24 = vld [vmem:[#allocation28_spill] sm:$0xff] }
 0x2e8   : > { %v1885_v45 = vadd.f32 %v1877_v33, %v1709_v46  ;;  %v684_v48 = vadd.f32 %v5704_v53, %v662_v39  ;;  %v660_v46 = vadd.f32 %v655_v23, %v5709_v24  ;;  %v5722_v53 = vld [vmem:[#allocation42_spill] sm:$0xff]  ;;  %v5725_v24 = vld [vmem:[#allocation36_spill] sm:$0xff] }
 0x2e9   : > { %v1897_v41 = vpop.permute.xlu1 %1896  ;;  %v1875_v59 = vpop.permute.xlu0 %1874 }
 0x2ea   : > { %v1878_v34 = vsel %vm964_vm12, %v1873_v54, %v1875_v59  ;;  %v1879_v14 = vsel %vm964_vm12, %v1875_v59, %v1877_v33  ;;  %v5708_v33 = vld [vmem:[#allocation55_spill] sm:$0xff] }
 0x2eb   : > { %v1883_v58 = vadd.f32 %v1878_v34, %v1707_v9  ;;  %v1884_v32 = vadd.f32 %v1879_v14, %v1708_v27  ;;  %v683_v9 = vadd.f32 %v678_v29, %v661_v31  ;;  %v677_v28 = vsel %vm654_vm3, %v5708_v33, %v5705_v4  ;;  %v5710_v27 = vld [vmem:[#allocation39_spill] sm:$0xff] }
 0x2ed   : > { %v1917_v3 = vpop.permute.xlu1 %1916  ;;  %v1895_v62 = vpop.permute.xlu0 %1894 }
 0x2ee   : > { %v1900_v5 = vsel %vm964_vm12, %v1895_v62, %v1897_v41  ;;  %v682_v62 = vadd.f32 %v677_v28, %v660_v46 }
 0x2ef   : > { %v1905_v7 = vadd.f32 %v1900_v5, %v1883_v58  ;;  %v5713_v5 = vld [vmem:[#allocation24_spill] sm:$0xff] }
 0x2f1   : > { %v1921_v6 = vpop.permute.xlu1 %1920  ;;  %v1899_v13 = vpop.permute.xlu0 %1898 }
 0x2f2   : > { %v1901_v20 = vsel %vm964_vm12, %v1897_v41, %v1899_v13  ;;  %v1907_v35 = vadd.f32 %v1899_v13, %v1885_v45  ;;  %v706_v45 = vadd.f32 %v5710_v27, %v684_v48  ;;  %v5711_v41 = vld [vmem:[#allocation71_spill] sm:$0xff]  ;;  %v5723_v48 = vld [vmem:[#allocation76_spill] sm:$0xff] }
 0x2f3   : > { %v1906_v56 = vadd.f32 %v1901_v20, %v1884_v32  ;;  %v700_v59 = vsel %vm654_vm3, %v5711_v41, %v5710_v27  ;;  %v5712_v32 = vld [vmem:[#allocation74_spill] sm:$0xff]  ;;  %v788_v23 = vsel %vm654_vm3, %v5724_v51, %v5723_v48 }
 0x2f4   : > { %v4888_v12 = vadd.f32 %v1921_v6, %v1907_v35  ;;  %v705_v58 = vadd.f32 %v700_v59, %v683_v9  ;;  %v729_v13 = vadd.f32 %v5713_v5, %v706_v45  ;;  %v789_v9 = vsel %vm654_vm3, %v5723_v48, %v5722_v53  ;;  %v5726_v59 = vld [vmem:[#allocation50_spill] sm:$0xff] }
 0x2f5   : > { %v1941_v43 = vpop.permute.xlu1 %1940  ;;  %v1919_v30 = vpop.permute.xlu0 %1918 }
 0x2f6   : > { %v1922_v47 = vsel %vm964_vm12, %v1917_v3, %v1919_v30  ;;  %v1923_v49 = vsel %vm964_vm12, %v1919_v30, %v1921_v6  ;;  %v699_v3 = vsel %vm654_vm3, %v5712_v32, %v5711_v41  ;;  %v5715_v30 = vld [vmem:[#allocation38_spill] sm:$0xff]  ;;  %v5727_v32 = vld [vmem:[#allocation21_spill] sm:$0xff] }
 0x2f7   : > { %v1927_v8 = vadd.f32 %v1922_v47, %v1905_v7  ;;  %v1928_v63 = vadd.f32 %v1923_v49, %v1906_v56  ;;  %v5714_v7 = vld [vmem:[#allocation35_spill] sm:$0xff]  ;;  %v704_v20 = vadd.f32 %v699_v3, %v682_v62  ;;  %v751_v47 = vadd.f32 %v5715_v30, %v729_v13  ;;  %v5716_v49 = vld [vmem:[#allocation44_spill] sm:$0xff] }
 0x2f8   : > { %v723_v6 = vsel %vm721_vm0, %v5714_v7, %v5713_v5  ;;  %v5728_v62 = vld [vmem:[#allocation80_spill] sm:$0xff] }
 0x2f9   : > { %v1961_v42 = vpop.permute.xlu1 %1960  ;;  %v1939_v22 = vpop.permute.xlu0 %1938  ;;  %v988_v5 = vsel %vm964_vm12, %v5728_v62, %v5727_v32 }
 0x2fa   : > { %v1944_v21 = vsel %vm1031_vm9, %v1939_v22, %v1941_v43 }
 0x2fb   : > { %v1949_v38 = vadd.f32 %v1944_v21, %v1927_v8  ;;  %v722_v8 = vsel %vm721_vm0, %v5716_v49, %v5714_v7  ;;  %v5718_v21 = vld [vmem:[#allocation41_spill] sm:$0xff]  ;;  %v5729_v7 = vld [vmem:[#allocation54_spill] sm:$0xff] }
 0x2fc   : > { %v727_v22 = vadd.f32 %v722_v8, %v704_v20  ;;  %v773_v36 = vadd.f32 %v5718_v21, %v751_v47  ;;  %v5730_v20 = vld [vmem:[#allocation62_spill] sm:$0xff] }
 0x2fd   : > { %v4893_v40 = vpop.permute.xlu1 %1964  ;;  %v4895_v44 = vpop.permute.xlu0 %1942 }
 0x2fe   : > { %v1945_v18 = vsel %vm1031_vm9, %v1941_v43, %v4895_v44  ;;  %v728_v43 = vadd.f32 %v723_v6, %v705_v58  ;;  %v795_v4 = vadd.f32 %v5722_v53, %v773_v36  ;;  %v966_v58 = vsel %vm964_vm12, %v5726_v59, %v5725_v24  ;;  %v5735_v53 = vld [vmem:[#allocation32_spill] sm:$0xff] }
 0x2ff   : > { %v1950_v52 = vadd.f32 %v1945_v18, %v1928_v63  ;;  %v5717_v63 = vld [vmem:[#allocation73_spill] sm:$0xff]  ;;  %v965_v6 = vsel %vm964_vm12, %v5729_v7, %v5726_v59  ;;  %v1951_v48 = vadd.f32 %v4895_v44, %v4888_v12  ;;  %v5739_v59 = vld [vmem:[#allocation84_spill] sm:$0xff] }
 0x300   : > { %v972_v46 = vadd.f32 %v5725_v24, %v795_v4  ;;  %v5736_v4 = vld [vmem:[#allocation48_spill] sm:$0xff] }
 0x301   : > { %v4899_v55 = vpop.permute.xlu1 %1984  ;;  %v1963_v26 = vpop.permute.xlu0 %1962  ;;  %v1973_v44 = vadd.f32 %v4893_v40, %v1951_v48  ;;  %v5748_v48 = vld [vmem:[#allocation100_spill] sm:$0xff] }
 0x302   : > { %v1966_v19 = vsel %vm964_vm12, %v1961_v42, %v1963_v26  ;;  %v1967_v2 = vsel %vm964_vm12, %v1963_v26, %v4893_v40  ;;  %v745_v42 = vsel %vm654_vm3, %v5717_v63, %v5715_v30  ;;  %v994_v3 = vadd.f32 %v5727_v32, %v972_v46  ;;  %v5731_v30 = vld [vmem:[#allocation15_spill] sm:$0xff]  ;;  %v5740_v32 = vld [vmem:[#allocation86_spill] sm:$0xff] }
 0x303   : > { %v4904_v60 = vadd.f32 %v1966_v19, %v1949_v38  ;;  %v4906_v37 = vadd.f32 %v1967_v2, %v1950_v52  ;;  %v5719_v38 = vld [vmem:[#allocation77_spill] sm:$0xff]  ;;  %v750_v19 = vadd.f32 %v745_v42, %v728_v43  ;;  %v5720_v2 = vld [vmem:[#allocation75_spill] sm:$0xff]  ;;  %v987_v43 = vsel %vm964_vm12, %v5730_v20, %v5728_v62  ;;  %v5742_v62 = vld [vmem:[#allocation12_spill] sm:$0xff] }
 0x304   : > { %v767_v18 = vsel %vm654_vm3, %v5719_v38, %v5718_v21  ;;  %v744_v10 = vsel %vm654_vm3, %v5720_v2, %v5717_v63  ;;  %v766_v61 = vsel %vm654_vm3, %v5721_v15, %v5719_v38  ;;  %v1016_v47 = vadd.f32 %v5731_v30, %v994_v3  ;;  %v5733_v21 = vld [vmem:[#allocation82_spill] sm:$0xff]  ;;  %v5741_v3 = vld [vmem:[#allocation83_spill] sm:$0xff] }
 0x305   : > { %v4908_v50 = vpop.permute.xlu1 %2004  ;;  %v4910_v0 = vpop.permute.xlu0 %1982  ;;  %v772_v39 = vadd.f32 %v767_v18, %v750_v19  ;;  %v749_v29 = vadd.f32 %v744_v10, %v727_v22  ;;  %v5732_v22 = vld [vmem:[#allocation79_spill] sm:$0xff]  ;;  %v1076_v12 = vsel %vm964_vm12, %v5741_v3, %v5740_v32 }
 0x306   : > { %v1009_v38 = vsel %vm964_vm12, %v5733_v21, %v5732_v22  ;;  %v5734_v19 = vld [vmem:[#allocation31_spill] sm:$0xff]  ;;  %v1010_v10 = vsel %vm964_vm12, %v5732_v22, %v5731_v30 }
 0x307   : > { %v771_v33 = vadd.f32 %v766_v61, %v749_v29  ;;  %v794_v28 = vadd.f32 %v789_v9, %v772_v39  ;;  %v1039_v2 = vadd.f32 %v5734_v19, %v1016_v47  ;;  %v1032_v29 = vsel %vm1031_vm9, %v5736_v4, %v5735_v53  ;;  %v5743_v47 = vld [vmem:[#allocation85_spill] sm:$0xff] }
 0x308   : > { %v1033_v51 = vsel %vm1031_vm9, %v5735_v53, %v5734_v19  ;;  %v5747_v53 = vld [vmem:[#allocation56_spill] sm:$0xff] }
 0x309   : > { %v4912_v1 = vpop.permute.xlu1 %2008  ;;  %v4914_v57 = vpop.permute.xlu0 %1986  ;;  %v793_v27 = vadd.f32 %v788_v23, %v771_v33  ;;  %v971_v13 = vadd.f32 %v966_v58, %v794_v28  ;;  %v5737_v23 = vld [vmem:[#allocation13_spill] sm:$0xff] }
 0x30a   : > { %v1061_v9 = vadd.f32 %v5737_v23, %v1039_v2 }
 0x30b   : > { %v970_v49 = vadd.f32 %v965_v6, %v793_v27  ;;  %v993_v42 = vadd.f32 %v988_v5, %v971_v13  ;;  %v5738_v27 = vld [vmem:[#allocation81_spill] sm:$0xff]  ;;  %v1077_v13 = vsel %vm964_vm12, %v5740_v32, %v5742_v62 }
 0x30c   : > { %v1054_v58 = vsel %vm964_vm12, %v5739_v59, %v5738_v27  ;;  %v1083_v5 = vadd.f32 %v5742_v62, %v1061_v9  ;;  %v1055_v7 = vsel %vm964_vm12, %v5738_v27, %v5737_v23  ;;  %v1988_v59 = vsel %vm964_vm12, %v4910_v0, %v4899_v55 }
 0x30d   : > { %v4919_v11 = vpop.permute.xlu1 %2182  ;;  %v4921_v16 = vpop.permute.xlu0 %2006  ;;  %v992_v18 = vadd.f32 %v987_v43, %v970_v49  ;;  %v1015_v39 = vadd.f32 %v1010_v10, %v993_v42  ;;  %v5744_v49 = vld [vmem:[#allocation88_spill] sm:$0xff]  ;;  %v1995_v42 = vadd.f32 %v4914_v57, %v1973_v44  ;;  %v1989_v62 = vsel %vm964_vm12, %v4899_v55, %v4914_v57 }
 0x30e   : > { %v1098_v40 = vsel %vm964_vm12, %v5744_v49, %v5743_v47  ;;  %v5753_v49 = vld [vmem:[#allocation104_spill] sm:$0xff]  ;;  %v2011_v55 = vsel %vm964_vm12, %v4921_v16, %v4912_v1 }
 0x30f   : > { %v1014_v36 = vadd.f32 %v1009_v38, %v992_v18  ;;  %v1038_v46 = vadd.f32 %v1033_v51, %v1015_v39  ;;  %v5745_v38 = vld [vmem:[#allocation17_spill] sm:$0xff]  ;;  %v5746_v39 = vld [vmem:[#allocation19_spill] sm:$0xff] }
 0x310   : > { %v1105_v18 = vadd.f32 %v5745_v38, %v1083_v5  ;;  %v1275_v4 = vsel %vm1274_vm11, %v5747_v53, %v5746_v39  ;;  %v1276_v51 = vsel %vm1274_vm11, %v5746_v39, %v5748_v48  ;;  %v2010_v5 = vsel %vm964_vm12, %v4908_v50, %v4921_v16  ;;  %v5756_v16 = vld [vmem:[#allocation103_spill] sm:$0xff] }
 0x311   : > { %v4930_v25 = vpop.permute.xlu1 %2202  ;;  %v4932_v54 = vpop.permute.xlu0 %2180  ;;  %v1037_v33 = vadd.f32 %v1032_v29, %v1014_v36  ;;  %v1060_v30 = vadd.f32 %v1055_v7, %v1038_v46  ;;  %v2017_v36 = vadd.f32 %v4912_v1, %v1995_v42  ;;  %v1099_v29 = vsel %vm964_vm12, %v5743_v47, %v5745_v38  ;;  %v5750_v46 = vld [vmem:[#allocation97_spill] sm:$0xff]  ;;  %v5751_v7 = vld [vmem:[#allocation99_spill] sm:$0xff]  ;;  %v5754_v42 = vld [vmem:[#allocation106_spill] sm:$0xff] }
 0x312   : > { %v1282_v23 = vadd.f32 %v5748_v48, %v1105_v18  ;;  %v5752_v47 = vld [vmem:[#allocation101_spill] sm:$0xff]  ;;  %v2186_v50 = vsel %vm1274_vm11, %v4932_v54, %v4919_v11  ;;  %v5755_v1 = vld [vmem:[#allocation107_spill] sm:$0xff] }
 0x313   : > { %v1059_v6 = vadd.f32 %v1054_v58, %v1037_v33  ;;  %v1082_v21 = vadd.f32 %v1077_v13, %v1060_v30  ;;  %v5749_v33 = vld [vmem:[#allocation102_spill] sm:$0xff]  ;;  %v1993_v30 = vadd.f32 %v1988_v59, %v4904_v60 }
 0x314   : > { %v1297_v27 = vsel %vm1274_vm11, %v5750_v46, %v5749_v33  ;;  %v1298_v0 = vsel %vm1274_vm11, %v5749_v33, %v5751_v7  ;;  %v1304_v13 = vadd.f32 %v5751_v7, %v1282_v23  ;;  %v5759_v33 = vld [vmem:[#allocation108_spill] sm:$0xff] }
 0x315   : > { %v4945_v34 = vpop.permute.xlu1 %2206  ;;  %v4947_v14 = vpop.permute.xlu0 %2184  ;;  %v1081_v22 = vadd.f32 %v1076_v12, %v1059_v6  ;;  %v1104_v9 = vadd.f32 %v1099_v29, %v1082_v21  ;;  %v1994_v21 = vadd.f32 %v1989_v62, %v4906_v37  ;;  %v2015_v38 = vadd.f32 %v2010_v5, %v1993_v30 }
 0x316   : > { %v2193_v58 = vadd.f32 %v4947_v14, %v2017_v36  ;;  %v1326_v60 = vadd.f32 %v5754_v42, %v1304_v13  ;;  %v1342_v36 = vsel %vm1341_vm14, %v5756_v16, %v5755_v1  ;;  %v2187_v54 = vsel %vm1274_vm11, %v4919_v11, %v4947_v14 }
 0x317   : > { %v1103_v19 = vadd.f32 %v1098_v40, %v1081_v22  ;;  %v1281_v44 = vadd.f32 %v1276_v51, %v1104_v9  ;;  %v1319_v40 = vsel %vm1274_vm11, %v5753_v49, %v5752_v47  ;;  %v1320_v22 = vsel %vm1274_vm11, %v5752_v47, %v5754_v42  ;;  %v5757_v51 = vld [vmem:[#allocation105_spill] sm:$0xff]  ;;  %v5758_v9 = vld [vmem:[#allocation110_spill] sm:$0xff] }
 0x318   : > { %v2215_v57 = vadd.f32 %v4945_v34, %v2193_v58  ;;  %v2016_v29 = vadd.f32 %v2011_v55, %v1994_v21  ;;  %v2191_v48 = vadd.f32 %v2186_v50, %v2015_v38  ;;  %v1343_v23 = vsel %vm1341_vm14, %v5755_v1, %v5757_v51 }
 0x319   : > { %v4956_v35 = vpop.permute.xlu1 %2226  ;;  %v4958_v56 = vpop.permute.xlu0 %2204  ;;  %v1280_v32 = vadd.f32 %v1275_v4, %v1103_v19  ;;  %v1303_v37 = vadd.f32 %v1298_v0, %v1281_v44  ;;  %v1364_v46 = vsel %vm1274_vm11, %v5759_v33, %v5758_v9  ;;  %v2365_v55 = vstv %s5114_s4 }
 0x31a   : > { %v2208_v39 = vsel %vm1274_vm11, %v4930_v25, %v4958_v56  ;;  %v2209_v11 = vsel %vm1274_vm11, %v4958_v56, %v4945_v34  ;;  %v2192_v59 = vadd.f32 %v2187_v54, %v2016_v29  ;;  %v1349_v56 = vadd.f32 %v5757_v51, %v1326_v60 }
 0x31b   : > { %v1302_v6 = vadd.f32 %v1297_v27, %v1280_v32  ;;  %v1325_v14 = vadd.f32 %v1320_v22, %v1303_v37  ;;  %v2213_v58 = vadd.f32 %v2208_v39, %v2191_v48 }
 0x31c   : > { %v2214_v0 = vadd.f32 %v2209_v11, %v2192_v59 }
 0x31d   : > { %v4970_v52 = vpop.permute.xlu1 %2246  ;;  %v4972_v26 = vpop.permute.xlu0 %2224  ;;  %v1324_v4 = vadd.f32 %v1319_v40, %v1302_v6 }
 0x31e   : > { %v2230_v25 = vsel %vm1274_vm11, %v4972_v26, %v4956_v35  ;;  %v1348_v26 = vadd.f32 %v1343_v23, %v1325_v14 }
 0x31f   : > { %v1347_v27 = vadd.f32 %v1342_v36, %v1324_v4  ;;  %v2235_v6 = vadd.f32 %v2230_v25, %v2213_v58 }
 0x321   : > { %v4982_v17 = vpop.permute.xlu1 %2250  ;;  %v4984_v31 = vpop.permute.xlu0 %2228  ;;  %v1369_v7 = vadd.f32 %v1364_v46, %v1347_v27 }
 0x322   : > { %v2237_v53 = vadd.f32 %v4984_v31, %v2215_v57  ;;  %v2231_v62 = vsel %vm1274_vm11, %v4956_v35, %v4984_v31 }
 0x323   : > { %v2236_v31 = vadd.f32 %v2231_v62, %v2214_v0  ;;  %v5760_v0 = vlaneseq }
 0x324   : > { %v2259_v34 = vadd.f32 %v4982_v17, %v2237_v53 }
 0x325   : > { %v4993_v45 = vpop.permute.xlu1 %2268  ;;  %v4995_v41 = vpop.permute.xlu0 %2248 }
 0x326   : > { %v2252_v5 = vsel %vm1341_vm14, %v4970_v52, %v4995_v41  ;;  %v2253_v13 = vsel %vm1341_vm14, %v4995_v41, %v4982_v17 }
 0x327   : > { %v2257_v47 = vadd.f32 %v2252_v5, %v2235_v6  ;;  %v2258_v42 = vadd.f32 %v2253_v13, %v2236_v31  ;;  %v2388_v6 = vshrl.u32 %v5760_v0, 7 }
 0x329   : > { %v5011_v8 = vpop.permute.xlu1 %2272  ;;  %v5013_v63 = vpop.permute.xlu0 %1362 }
 0x32a   : > { %v2281_v30 = vadd.f32 %v5011_v8, %v2259_v34  ;;  %v1365_v35 = vsel %vm1274_vm11, %v5758_v9, %v5013_v63  ;;  %v1371_v52 = vadd.f32 %v5013_v63, %v1349_v56 }
 0x32b   : > { %v1370_v63 = vadd.f32 %v1365_v35, %v1348_v26 }
 0x32d   : > { %v5022_v15 = vpop.permute.xlu1 %1382  ;;  %v5024_v61 = vpop.permute.xlu0 %2270 }
 0x32e   : > { %v2274_v50 = vsel %vm1274_vm11, %v4993_v45, %v5024_v61  ;;  %v2275_v17 = vsel %vm1274_vm11, %v5024_v61, %v5011_v8 }
 0x32f   : > { %v2279_v38 = vadd.f32 %v2274_v50, %v2257_v47  ;;  %v2280_v1 = vadd.f32 %v2275_v17, %v2258_v42 }
 0x331   : > { %v5035_v28 = vpop.permute.xlu1 %2290  ;;  %v5037_v24 = vpop.permute.xlu0 %1380 }
 0x332   : > { %v1386_v22 = vsel %vm1274_vm11, %v5037_v24, %v5022_v15 }
 0x335   : > { %v5053_v20 = vpop.permute.xlu1 %2294  ;;  %v5055_v43 = vpop.permute.xlu0 %1384 }
 0x336   : > { %v2303_v41 = vadd.f32 %v5053_v20, %v2281_v30  ;;  %v1393_v57 = vadd.f32 %v5055_v43, %v1371_v52  ;;  %v1387_v60 = vsel %vm1274_vm11, %v5022_v15, %v5055_v43  ;;  %v2389_v30 = vsub.s32 0, %v2388_v6 }
 0x337   : > { %v1392_v39 = vadd.f32 %v1387_v60, %v1370_v63 }
 0x339   : > { %v5062_v2 = vpop.permute.xlu1 %1404  ;;  %v5064_v10 = vpop.permute.xlu0 %2292 }
 0x33a   : > { %v2296_v45 = vsel %vm1274_vm11, %v5035_v28, %v5064_v10  ;;  %v2297_v8 = vsel %vm1274_vm11, %v5064_v10, %v5053_v20  ;;  %v1391_v10 = vadd.f32 %v1386_v22, %v1369_v7  ;;  %v2716_v22 = vld [vmem:[%s3012_s23] sm:$0xff] }
 0x33b   : > { %v2301_v53 = vadd.f32 %v2296_v45, %v2279_v38  ;;  %v2302_v37 = vadd.f32 %v2297_v8, %v2280_v1 }
 0x33d   : > { %v5084_v3 = vpop.permute.xlu1 %2312  ;;  %v5086_v12 = vpop.permute.xlu0 %1402 }
 0x33e   : > { %v1408_v24 = vsel %vm1274_vm11, %v5086_v12, %v5062_v2 }
 0x33f   : > { %v1413_v48 = vadd.f32 %v1408_v24, %v1391_v10 }
 0x341   : > { %v2317_v18 = vpop.permute.xlu1 %2316  ;;  %v1407_v19 = vpop.permute.xlu0 %1406 }
 0x342   : > { %v2325_v61 = vadd.f32 %v2317_v18, %v2303_v41  ;;  %v1415_v21 = vadd.f32 %v1407_v19, %v1393_v57  ;;  %v1409_v16 = vsel %vm1274_vm11, %v5062_v2, %v1407_v19 }
 0x343   : > { %v1414_v2 = vadd.f32 %v1409_v16, %v1392_v39 }
 0x345   : > { %v2332_v32 = vpop.permute.xlu1 %2331  ;;  %v2315_v44 = vpop.permute.xlu0 %2314 }
 0x346   : > { %v2318_v28 = vsel %vm1274_vm11, %v5084_v3, %v2315_v44  ;;  %v2319_v36 = vsel %vm1274_vm11, %v2315_v44, %v2317_v18 }
 0x347   : > { %v2323_v19 = vadd.f32 %v2318_v28, %v2301_v53  ;;  %v2324_v51 = vadd.f32 %v2319_v36, %v2302_v37 }
 0x349   : > { %v2348_v49 = vpop.permute.xlu1 %2347  ;;  %v2330_v40 = vpop.permute.xlu0 %2329 }
 0x34a   : > { %v2336_v4 = vsel %vm2335_vm1, %v2330_v40, %v2332_v32 }
 0x34b   : > { %v2341_v33 = vadd.f32 %v2336_v4, %v1413_v48 }
 0x34d   : > { %v2352_v15 = vpop.permute.xlu1 %2351  ;;  %v2334_v43 = vpop.permute.xlu0 %2333 }
 0x34e   : > { %v2360_v54 = vadd.f32 %v2352_v15, %v2325_v61  ;;  %v2343_v20 = vadd.f32 %v2334_v43, %v1415_v21  ;;  %v2337_v12 = vsel %vm2335_vm1, %v2332_v32, %v2334_v43 }
 0x34f   : > { %v2342_v46 = vadd.f32 %v2337_v12, %v1414_v2 }
 0x350   : > { %v2363_v29 = vadd.f32 %v2360_v54, %v2343_v20 }
 0x351   : > { %v2350_v23 = vpop.permute.xlu0 %2349 }
 0x352   : > { %v2368_v9 = vadd.f32 %v2365_v55, %v2363_v29  ;;  %v2353_v3 = vsel %vm2335_vm1, %v2348_v49, %v2350_v23  ;;  %v2354_v18 = vsel %vm2335_vm1, %v2350_v23, %v2352_v15 }
 0x353   : > { %v2358_v11 = vadd.f32 %v2353_v3, %v2323_v19  ;;  %v2359_v25 = vadd.f32 %v2354_v18, %v2324_v51 }
 0x354   : > { %v2624_v14 = vmul.f32 -1.442695, %v2368_v9 }
 0x355   : > { %v2361_v27 = vadd.f32 %v2358_v11, %v2341_v33  ;;  %v2362_v59 = vadd.f32 %v2359_v25, %v2342_v46 }
 0x356   : > { %2704 = vpow2.f32 %v2624_v14 }
 0x357   : > { %v2366_v58 = vadd.f32 %v2365_v55, %v2361_v27  ;;  %v2367_v32 = vadd.f32 %v2365_v55, %v2362_v59 }
 0x359   : > { %v2622_v44 = vmul.f32 -1.442695, %v2366_v58  ;;  %v2623_v62 = vmul.f32 -1.442695, %v2367_v32 }
 0x35b   : > { %2706 = vpow2.f32 %v2622_v44 }
 0x35c   : > { %2708 = vpow2.f32 %v2623_v62 }
 0x360   : > { %v2705_v5 = vpop.eup %2704 }
 0x361   : > { %v2380_v34 = vadd.f32 1.0, %v2705_v5 }
 0x363   : > { %2710 = vrcp.f32 %v2380_v34 }
 0x365   : > { %v2707_v56 = vpop.eup %2706 }
 0x366   : > { %v2709_v26 = vpop.eup %2708  ;;  %v2378_v7 = vadd.f32 1.0, %v2707_v56 }
 0x367   : > { %v2379_v13 = vadd.f32 1.0, %v2709_v26 }
 0x368   : > { %2712 = vrcp.f32 %v2378_v7 }
 0x369   : > { %2714 = vrcp.f32 %v2379_v13 }
 0x36d   : > { %v2711_v35 = vpop.eup %2710 }
 0x36e   : > { %v2398_v52 = vrot.slane %v2711_v35, %v2389_v30 }
 0x370   : > { %2405 = vrot.lane.b32.xlu1 %v2398_v52, %s2842_s19 }
 0x372   : > { %v2713_v31 = vpop.eup %2712 }
 0x373   : > { %v2715_v47 = vpop.eup %2714  ;;  %v2390_v49 = vrot.slane %v2713_v31, %v2389_v30 }
 0x374   : > { %v2394_v40 = vrot.slane %v2715_v47, %v2389_v30 }
 0x376   : > { %v2402_v55 = vcombine.low %v2390_v49, %v2394_v40 }
 0x378   : > { %2403 = vrot.lane.b32.xlu0 %v2402_v55, %s2842_s19  ;;  %s2850_s19 = smov [#allocation8]  }
 0x379   : > { %s2766_s23 = sshll.u32 %s2850_s19, 4  ;;  %s2767_s23 = int_to_ptr.vmem [resolvable:$false] %s2766_s23 }
 0x37a   : > { %s2768_s24 = scalar_lea.vmem %s2767_s23, 256  ;;  %p2769_p0 = scmp.lt.s32.totalorder %s5201_s28, %s2767_s23 }
 0x37b   : > { %p2770_p3 = scmp.lt.s32.totalorder %s2768_s24, %s2762_s11 }
 0x37d   : > { %p2771_p12 = por %p2770_p3, %p2769_p0 }
 0x37f   : > { %p2772_p5 = pnand %p2771_p12, %p2765_p7 }
 0x3e2   : > { %v2406_v50 = vpop.permute.xlu1 %2405 }
 0x3e3   : > { %v2408_v41 = vrot.slane %v2406_v50, 4 }
 0x3ea   : > { %v2404_v17 = vpop.permute.xlu0 %2403 }
 0x3eb   : > { %v2407_v57 = vrot.slane %v2404_v17, 4 }
 0x3ed   : > { %v2409_v42 = vsel %vm5761_vm15, %v2407_v57, %v2408_v41 }
 0x3ee   : > { %v2410_v63 = vsel %vm537_vm4, %v2404_v17, %v2409_v42 }
 0x3ef   : > { %v2412_v60 = vmul.f32 %v2716_v22, %v2410_v63 }
 0x3f1   : > { %2413 = vst [vmem:[%s201_s9] sm:$0xff] %v2412_v60 }
 0x3f2   : > { %2775 = shalt.err (!%p2772_p5)
}
 0x3f3   : > { %s2776_s10 = scalar_lea.hbm %s5199_s30, 128  ;;  %s2780_s21 = scalar_lea.hbm %s5246_s3, 256 }
 0x3f4   : > { %p2777_p10 = scmp.ne.s32.totalorder %s5199_s30, %s2776_s10  ;;  %p2781_p4 = scmp.lt.u32.totalorder %s5199_s30, %s5246_s3 }
 0x3f5   : > { %p2782_p6 = scmp.lt.u32.totalorder %s2780_s21, %s2776_s10  ;;  %p2784_p9 = scmp.lt.u32.totalorder %s2776_s10, %s5199_s30 }
 0x3f6   : > { %p2778_p2 = pnand %p2777_p10, %p5762_p11 }
 0x3f7   : > { %p2783_p8 = por %p2782_p6, %p2781_p4 }
 0x3f8   : > { %p2779_p1 = pneg %p2778_p2 }
 0x3f9   : > { %p2785_p13 = por %p2784_p9, %p2783_p8 }
 0x3fb   : > { %p2786_p7 = pnand %p2785_p13, %p2779_p1 }
 0x3fd   : > { %2789 = shalt.err (!%p2786_p7)
}
 0x3fe   : > { %2638 = dma.vmem_to_hbm [thread:$0]  (%p5762_p11), %s5201_s28, 128, %s5199_s30, %s2415_s2  }
 0x3ff PF: > { %s2441_s22 = sand.u32 1, %s2820_s14   ;;  %p5763_p0 = scmp.ne.s32.totalorder %s5371_s20, 0 }
 0x400   : > { %p5764_p3 = scmp.ge.s32.totalorder %s2832_s17, 2  ;;  %s2442_s7 = scalar_lea.sflag [#allocation5], %s2441_s22 }
 0x402   : > { %p2649_p12 = pnand %p5764_p3, %p5763_p0 }
 0x404   : > { %2815 = dma.done.wait (!%p2649_p12), %s2442_s7, 128  }
 0x405   : > { %2817 = vsyncadd (!%p2649_p12), %s2442_s7, 4294967168  ;;  %p18_p5 = scmp.ge.s32.totalorder %s2925_s25, 4   ;;  %s5765_s14 = smov %s2824_s15 }
 0x406   : > { %s5766_s15 = smov %s2828_s16  ;;  %s5767_s16 = smov %s2949_s5 }
 0x407   : > { %s5768_s17 = smov %s2925_s25  ;;  %20 = sbr.rel (!%p18_p5) target bundleno = 8 (0x8), region = 82 }
 0x40e   :  { %2447 = vsyncpa [#allocation4], 1 }
 0x40f   :  { %2449 = vsyncpa [#allocation4 + $0x1], 1 }
 0x410   :  { %2450 = vsyncpa [#allocation5], 1 }
 0x411   :  { %2452 = vsyncpa [#allocation5 + $0x1], 1 }
 0x412   :  { %2453 = vsyncpa [#allocation6], 1 }
 0x413   :  { %2455 = vsyncpa [#allocation6 + $0x1], 1 }

</bundles_post_ra>
